<compile_context>
chip_gen: v5e
topology: v5e:2x2
jax: 0.10.0
libtpu: 0.0.40
codegen_flags: <defaults>
</compile_context>

<pallas_src>
import functools

import jax
import jax.numpy as jnp
from jax.experimental import pallas as pl
from jax.experimental.pallas import tpu as pltpu


# ----------------------------------------------------------------------------
# Pallas kernel: transposed matmul  W^T @ A^T  (+ optional fused ReLU)
# ----------------------------------------------------------------------------
def _round_up(x, m):
    return (x + m - 1) // m * m


def _mm_t_kernel(wt_ref, at_ref, o_ref, *, relu: bool):
    acc = jnp.dot(wt_ref[...], at_ref[...], preferred_element_type=jnp.float32)
    if relu:
        acc = jnp.maximum(acc, 0.0)
    o_ref[...] = acc


def pallas_matmul_t(wt, at, relu=False, tm=512):
    """wt: [Cout, K], at: [K, M]  ->  [Cout, M] f32 (optionally ReLU'd).

    Lane-dense: M (= N*Do*Ho*Wo) is the output lane axis instead of Cout=16.
    Inputs are cast to bf16 (f32 accumulation); K is zero-padded to 128n.
    """
    cout, K = wt.shape
    K2, M = at.shape
    assert K == K2
    kp = _round_up(max(K, 128), 128)
    if kp != K:
        wt = jnp.pad(wt, ((0, 0), (0, kp - K)))
        at = jnp.pad(at, ((0, kp - K), (0, 0)))
    wt = wt.astype(jnp.bfloat16)
    at = at.astype(jnp.bfloat16)

    if M <= tm:                      # single full-extent block (always legal)
        tm_eff, grid_m = M, 1
    else:                            # M-tiled grid (scales to 2 TCs on v7x)
        tm_eff, grid_m = tm, pl.cdiv(M, tm)

    cost = pl.CostEstimate(
        flops=2 * M * kp * cout,
        transcendentals=0,
        bytes_accessed=wt.size * 2 + at.size * 2 + cout * M * 4,
    )
    return pl.pallas_call(
        functools.partial(_mm_t_kernel, relu=relu),
        out_shape=jax.ShapeDtypeStruct((cout, M), jnp.float32),
        grid=(grid_m,),
        in_specs=[
            pl.BlockSpec((cout, kp), lambda i: (0, 0)),
            pl.BlockSpec((kp, tm_eff), lambda i: (0, i)),
        ],
        out_specs=pl.BlockSpec((cout, tm_eff), lambda i: (0, i)),
        compiler_params=pltpu.CompilerParams(dimension_semantics=("parallel",)),
        cost_estimate=cost,
    )(wt, at)


# ----------------------------------------------------------------------------
# im2col for 3D convolution on CNDHW activations (glue; indexing only)
# ----------------------------------------------------------------------------
def im2col_t(x, ksize, stride, padding):
    """x: (C, N, D, H, W) -> A^T: (C*kd*kh*kw, N*Do*Ho*Wo), K ordered (c,dz,dy,dx)."""
    C, N, D, H, W = x.shape
    kd, kh, kw = ksize
    sd, sh, sw = stride
    pd, ph, pw = padding
    xp = jnp.pad(x, ((0, 0), (0, 0), (pd, pd), (ph, ph), (pw, pw)))
    Do = (D + 2 * pd - kd) // sd + 1
    Ho = (H + 2 * ph - kh) // sh + 1
    Wo = (W + 2 * pw - kw) // sw + 1
    patches = []
    for dz in range(kd):
        for dy in range(kh):
            for dx in range(kw):
                patches.append(xp[:, :, dz:dz + sd * Do:sd,
                                  dy:dy + sh * Ho:sh, dx:dx + sw * Wo:sw])
    cols = jnp.stack(patches, axis=1)                       # (C, KK, N, Do, Ho, Wo)
    return cols.reshape(C * kd * kh * kw, N * Do * Ho * Wo), (Do, Ho, Wo)


# ----------------------------------------------------------------------------
# Fused FastKANConv3DLayer group: sum_i [Conv(PReLU_i(x)) + Conv(RBF(IN(x)))]
# lowered to ONE Pallas matmul (+ fused ReLU epilogue)
# ----------------------------------------------------------------------------
def fastkan_conv_group(x, branch_params, ksizes, strides, paddings, relu_out,
                       grid_min=-2.0, grid_max=2.0, rbf_grid_size=2):
    """x: (C, N, D, H, W).  Returns (Cout, N, Do, Ho, Wo)."""
    C, N = x.shape[0], x.shape[1]

    # spline-path prologue, shared across branches (InstanceNorm/RBF have no
    # per-branch parameters).
    # TODO(synk): InstanceNorm + RBF exp + im2col gather remain XLA fusions;
    # expressing the im2col gather via BlockSpec index_maps would let them fold
    # into the matmul kernel prologue, but is not done here.
    mean = jnp.mean(x, axis=(2, 3, 4), keepdims=True)
    var = jnp.var(x, axis=(2, 3, 4), keepdims=True)        # biased, matches torch
    xn = (x - mean) * jax.lax.rsqrt(var + 1e-5)
    g = jnp.linspace(grid_min, grid_max, rbf_grid_size).astype(jnp.float32)
    denom = (grid_max - grid_min) / (rbf_grid_size - 1)
    rbf = jnp.exp(-jnp.square((xn[..., None] - g) / denom))  # (C,N,D,H,W,G)
    rbf = jnp.moveaxis(rbf, -1, 1).reshape(C * rbf_grid_size, *x.shape[1:])

    cout = branch_params[0]["base_w"].shape[0]
    at_blocks, wt_blocks = [], []
    out_sp = None
    for p, ks, st, pad in zip(branch_params, ksizes, strides, paddings):
        a = p["prelu"]
        base = jnp.where(x >= 0, x, a * x)                  # per-branch PReLU
        at_b, out_sp = im2col_t(base, ks, st, pad)
        at_s, _ = im2col_t(rbf, ks, st, pad)
        at_blocks += [at_b, at_s]
        wt_blocks += [p["base_w"].reshape(cout, -1),
                      p["spline_w"].reshape(cout, -1)]

    AT = jnp.concatenate(at_blocks, axis=0)                 # (K_total, M)
    WT = jnp.concatenate(wt_blocks, axis=1)                 # (Cout, K_total)
    out = pallas_matmul_t(WT, AT, relu=relu_out)            # (Cout, M)
    Do, Ho, Wo = out_sp
    return out.reshape(cout, N, Do, Ho, Wo)


# ----------------------------------------------------------------------------
# KAN linear head (efficient-kan KANLinear, base_activation=ReLU)
# ----------------------------------------------------------------------------
def _b_splines(x, grid, spline_order):
    # x: (B, in), grid: (in, gs + 2*so + 1)
    xg = x[..., None]
    bases = ((xg >= grid[:, :-1]) & (xg < grid[:, 1:])).astype(jnp.float32)
    for k in range(1, spline_order + 1):
        left = (xg - grid[:, :-(k + 1)]) / (grid[:, k:-1] - grid[:, :-(k + 1)]) * bases[..., :-1]
        right = (grid[:, k + 1:] - xg) / (grid[:, k + 1:] - grid[:, 1:-k]) * bases[..., 1:]
        bases = left + right
    return bases  # (B, in, gs + so)


def kan_linear(x, p, spline_order=3):
    B, in_f = x.shape
    out_f = p["base_w"].shape[0]
    xb = jnp.maximum(x, 0.0)                                  # base_activation = ReLU
    bs = _b_splines(x, p["grid"], spline_order)               # (B, in, gs+so)
    A = jnp.concatenate([xb, bs.reshape(B, -1)], axis=1)      # (B, in*(1+gs+so))
    scaled = p["spline_w"] * p["spline_scaler"][..., None]    # (out, in, gs+so)
    WT = jnp.concatenate([p["base_w"], scaled.reshape(out_f, -1)], axis=1)
    return pallas_matmul_t(WT, A.T, relu=False).T             # (B, out)


# ----------------------------------------------------------------------------
# Parameter initialization (deterministic, kaiming-uniform-ish)
# ----------------------------------------------------------------------------
def init_fastkan_params(key, cin, cout, ksize, grid_size=2):
    kb, ks = jax.random.split(key)
    kd, kh, kw = ksize
    fan_b = cin * kd * kh * kw
    fan_s = cin * grid_size * kd * kh * kw
    base_w = jax.random.uniform(kb, (cout, cin, kd, kh, kw), jnp.float32,
                                minval=-1.0, maxval=1.0) * jnp.sqrt(6.0 / fan_b)
    spline_w = jax.random.uniform(ks, (cout, cin * grid_size, kd, kh, kw), jnp.float32,
                                  minval=-1.0, maxval=1.0) * jnp.sqrt(6.0 / fan_s)
    return {"base_w": base_w, "spline_w": spline_w, "prelu": jnp.float32(0.25)}


def init_kan_fc_params(key, in_f, out_f, grid_size=5, spline_order=3,
                       grid_range=(-1.0, 1.0)):
    k1, k2, k3 = jax.random.split(key, 3)
    base_w = jax.random.uniform(k1, (out_f, in_f), jnp.float32,
                                minval=-1.0, maxval=1.0) * jnp.sqrt(6.0 / in_f)
    spline_w = jax.random.uniform(k2, (out_f, in_f, grid_size + spline_order),
                                  jnp.float32, minval=-1.0, maxval=1.0) * 0.1
    spline_scaler = jax.random.uniform(k3, (out_f, in_f), jnp.float32,
                                       minval=-1.0, maxval=1.0) * jnp.sqrt(6.0 / in_f)
    h = (grid_range[1] - grid_range[0]) / grid_size
    g = jnp.arange(-spline_order, grid_size + spline_order + 1, dtype=jnp.float32)
    grid = jnp.tile((g * h + grid_range[0])[None, :], (in_f, 1))  # (in, gs+2*so+1)
    return {"base_w": base_w, "spline_w": spline_w,
            "spline_scaler": spline_scaler, "grid": grid}


def init_params(key, input_channels, n_classes, patch_size=7):
    keys = jax.random.split(key, 11)
    params = {
        "conv1":   init_fastkan_params(keys[0], 1, 16, (11, 3, 3)),
        "conv2_1": init_fastkan_params(keys[1], 16, 16, (1, 1, 1)),
        "conv2_2": init_fastkan_params(keys[2], 16, 16, (3, 1, 1)),
        "conv2_3": init_fastkan_params(keys[3], 16, 16, (5, 1, 1)),
        "conv2_4": init_fastkan_params(keys[4], 16, 16, (11, 1, 1)),
        "conv3_1": init_fastkan_params(keys[5], 16, 16, (1, 1, 1)),
        "conv3_2": init_fastkan_params(keys[6], 16, 16, (3, 1, 1)),
        "conv3_3": init_fastkan_params(keys[7], 16, 16, (5, 1, 1)),
        "conv3_4": init_fastkan_params(keys[8], 16, 16, (11, 1, 1)),
        "conv4":   init_fastkan_params(keys[9], 16, 16, (3, 2, 2)),
    }
    # mirrors _get_final_flattened_size
    d1 = (input_channels - 11) // 3 + 1
    s1 = patch_size - 2
    d4, s4 = d1 - 2, s1 - 1
    features_size = 16 * d4 * s4 * s4
    params["kan_fc"] = init_kan_fc_params(keys[10], features_size, n_classes)
    params["_features_size"] = features_size
    return params


# ----------------------------------------------------------------------------
# Full forward pass
# ----------------------------------------------------------------------------
GROUP2_KS = [(1, 1, 1), (3, 1, 1), (5, 1, 1), (11, 1, 1)]
GROUP2_PAD = [(0, 0, 0), (1, 0, 0), (2, 0, 0), (5, 0, 0)]
UNIT_STRIDE = [(1, 1, 1)] * 4


def forward(x, params):
    # x: (N, 1, input_channels, patch, patch) NCDHW  ->  carry CNDHW internally
    x = jnp.transpose(x, (1, 0, 2, 3, 4))

    # conv1 + fused ReLU
    x = fastkan_conv_group(x, [params["conv1"]], [(11, 3, 3)], [(3, 1, 1)],
                           [(0, 0, 0)], relu_out=True)

    # group 2: four branches fused into one matmul, branch-sum + ReLU fused
    x = fastkan_conv_group(
        x,
        [params["conv2_1"], params["conv2_2"], params["conv2_3"], params["conv2_4"]],
        GROUP2_KS, UNIT_STRIDE, GROUP2_PAD, relu_out=True)

    # group 3: idem
    x = fastkan_conv_group(
        x,
        [params["conv3_1"], params["conv3_2"], params["conv3_3"], params["conv3_4"]],
        GROUP2_KS, UNIT_STRIDE, GROUP2_PAD, relu_out=True)

    # conv4 + fused ReLU
    x = fastkan_conv_group(x, [params["conv4"]], [(3, 2, 2)], [(1, 1, 1)],
                           [(0, 0, 0)], relu_out=True)

    # flatten in torch NCDHW order: (C, N, Do, Ho, Wo) -> (N, C*Do*Ho*Wo)
    N = x.shape[1]
    xf = jnp.transpose(x, (1, 0, 2, 3, 4)).reshape(N, -1)
    # dropout(p=0.6): identity in eval mode
    return kan_linear(xf, params["kan_fc"])


# ----------------------------------------------------------------------------
# Main
# ----------------------------------------------------------------------------
if __name__ == "__main__":
    INPUT_CHANNELS = 20   # spectral bands
    PATCH_SIZE = 7
    N_CLASSES = 5
    BATCH = 2

    key = jax.random.PRNGKey(0)
    kp, kx = jax.random.split(key)
    params = init_params(kp, INPUT_CHANNELS, N_CLASSES, PATCH_SIZE)
    x = jax.random.normal(kx, (BATCH, 1, INPUT_CHANNELS, PATCH_SIZE, PATCH_SIZE),
                          dtype=jnp.float32)

    fwd = jax.jit(forward)
    out = fwd(x, params)
    out = jax.block_until_ready(out)
    assert out.shape == (BATCH, N_CLASSES), out.shape
    assert jnp.all(jnp.isfinite(out))
    print("KERNEL_OK")
</pallas_src>

<mosaic_0001>
module attributes {stable_mosaic.version = 11 : i64} {
  func.func @_mm_t_kernel(%arg0: i32, %arg1: memref<16x384xbf16, #tpu.memory_space<vmem>>, %arg2: memref<384x200xbf16, #tpu.memory_space<vmem>>, %arg3: memref<16x200xf32, #tpu.memory_space<vmem>>) attributes {dimension_semantics = [#tpu.dimension_semantics<parallel>], iteration_bounds = array<i64: 1>, scalar_prefetch = 0 : i64, scratch_operands = 0 : i64, tpu.core_type = #tpu.core_type<tc>, window_params = [{pipeline_mode = #tpu.pipeline_mode<synchronous>, transform_indices = @transform_0, window_bounds = array<i64: 16, 384>}, {transform_indices = @transform_1, window_bounds = array<i64: 384, 200>}, {transform_indices = @transform_2, window_bounds = array<i64: 16, 200>}]} {
    %c0 = arith.constant 0 : index
    %c0_0 = arith.constant 0 : index
    %0 = vector.load %arg1[%c0, %c0_0] : memref<16x384xbf16, #tpu.memory_space<vmem>>, vector<16x384xbf16>
    %c0_1 = arith.constant 0 : index
    %c0_2 = arith.constant 0 : index
    %1 = vector.load %arg2[%c0_1, %c0_2] : memref<384x200xbf16, #tpu.memory_space<vmem>>, vector<384x200xbf16>
    %cst = arith.constant dense<0.000000e+00> : vector<16x200xf32>
    %2 = tpu.matmul %0, %1, %cst {dimension_numbers = #tpu.dot_dimension_numbers<[1], [0], [0], [1], [0, 0, 1, 1], [], []>} : vector<16x384xbf16>, vector<384x200xbf16>, vector<16x200xf32> -> vector<16x200xf32>
    %cst_3 = arith.constant 0.000000e+00 : f32
    %3 = vector.broadcast %cst_3 : f32 to vector<16x200xf32>
    %4 = arith.maximumf %2, %3 : vector<16x200xf32>
    %c0_4 = arith.constant 0 : index
    %c0_5 = arith.constant 0 : index
    %5 = vector.load %arg3[%c0_4, %c0_5] : memref<16x200xf32, #tpu.memory_space<vmem>>, vector<16x200xf32>
    tpu.vector_store %arg3[%c0_4, %c0_5], %4 {strides = array<i32>} : memref<16x200xf32, #tpu.memory_space<vmem>>, vector<16x200xf32>,
    return
  }
  func.func @transform_0(%arg0: i32) -> (i32, i32) {
    %c0_i32 = arith.constant 0 : i32
    %c0_i32_0 = arith.constant 0 : i32
    %c0_i32_1 = arith.constant 0 : i32
    return %c0_i32, %c0_i32_0 : i32, i32
  }
  func.func @transform_1(%arg0: i32) -> (i32, i32) {
    %c0_i32 = arith.constant 0 : i32
    %c0_i32_0 = arith.constant 0 : i32
    return %c0_i32, %arg0 : i32, i32
  }
  func.func @transform_2(%arg0: i32) -> (i32, i32) {
    %c0_i32 = arith.constant 0 : i32
    %c0_i32_0 = arith.constant 0 : i32
    return %c0_i32, %arg0 : i32, i32
  }
}

module attributes {stable_mosaic.version = 11 : i64} {
  func.func @_mm_t_kernel(%arg0: i32, %arg1: memref<16x1024xbf16, #tpu.memory_space<vmem>>, %arg2: memref<1024x200xbf16, #tpu.memory_space<vmem>>, %arg3: memref<16x200xf32, #tpu.memory_space<vmem>>) attributes {dimension_semantics = [#tpu.dimension_semantics<parallel>], iteration_bounds = array<i64: 1>, scalar_prefetch = 0 : i64, scratch_operands = 0 : i64, tpu.core_type = #tpu.core_type<tc>, window_params = [{pipeline_mode = #tpu.pipeline_mode<synchronous>, transform_indices = @transform_0, window_bounds = array<i64: 16, 1024>}, {transform_indices = @transform_1, window_bounds = array<i64: 1024, 200>}, {transform_indices = @transform_2, window_bounds = array<i64: 16, 200>}]} {
    %c0 = arith.constant 0 : index
    %c0_0 = arith.constant 0 : index
    %0 = vector.load %arg1[%c0, %c0_0] : memref<16x1024xbf16, #tpu.memory_space<vmem>>, vector<16x1024xbf16>
    %c0_1 = arith.constant 0 : index
    %c0_2 = arith.constant 0 : index
    %1 = vector.load %arg2[%c0_1, %c0_2] : memref<1024x200xbf16, #tpu.memory_space<vmem>>, vector<1024x200xbf16>
    %cst = arith.constant dense<0.000000e+00> : vector<16x200xf32>
    %2 = tpu.matmul %0, %1, %cst {dimension_numbers = #tpu.dot_dimension_numbers<[1], [0], [0], [1], [0, 0, 1, 1], [], []>} : vector<16x1024xbf16>, vector<1024x200xbf16>, vector<16x200xf32> -> vector<16x200xf32>
    %cst_3 = arith.constant 0.000000e+00 : f32
    %3 = vector.broadcast %cst_3 : f32 to vector<16x200xf32>
    %4 = arith.maximumf %2, %3 : vector<16x200xf32>
    %c0_4 = arith.constant 0 : index
    %c0_5 = arith.constant 0 : index
    %5 = vector.load %arg3[%c0_4, %c0_5] : memref<16x200xf32, #tpu.memory_space<vmem>>, vector<16x200xf32>
    tpu.vector_store %arg3[%c0_4, %c0_5], %4 {strides = array<i32>} : memref<16x200xf32, #tpu.memory_space<vmem>>, vector<16x200xf32>,
    return
  }
  func.func @transform_0(%arg0: i32) -> (i32, i32) {
    %c0_i32 = arith.constant 0 : i32
    %c0_i32_0 = arith.constant 0 : i32
    %c0_i32_1 = arith.constant 0 : i32
    return %c0_i32, %c0_i32_0 : i32, i32
  }
  func.func @transform_1(%arg0: i32) -> (i32, i32) {
    %c0_i32 = arith.constant 0 : i32
    %c0_i32_0 = arith.constant 0 : i32
    return %c0_i32, %arg0 : i32, i32
  }
  func.func @transform_2(%arg0: i32) -> (i32, i32) {
    %c0_i32 = arith.constant 0 : i32
    %c0_i32_0 = arith.constant 0 : i32
    return %c0_i32, %arg0 : i32, i32
  }
}

module attributes {stable_mosaic.version = 11 : i64} {
  func.func @_mm_t_kernel(%arg0: i32, %arg1: memref<16x640xbf16, #tpu.memory_space<vmem>>, %arg2: memref<640x64xbf16, #tpu.memory_space<vmem>>, %arg3: memref<16x64xf32, #tpu.memory_space<vmem>>) attributes {dimension_semantics = [#tpu.dimension_semantics<parallel>], iteration_bounds = array<i64: 1>, scalar_prefetch = 0 : i64, scratch_operands = 0 : i64, tpu.core_type = #tpu.core_type<tc>, window_params = [{pipeline_mode = #tpu.pipeline_mode<synchronous>, transform_indices = @transform_0, window_bounds = array<i64: 16, 640>}, {transform_indices = @transform_1, window_bounds = array<i64: 640, 64>}, {transform_indices = @transform_2, window_bounds = array<i64: 16, 64>}]} {
    %c0 = arith.constant 0 : index
    %c0_0 = arith.constant 0 : index
    %0 = vector.load %arg1[%c0, %c0_0] : memref<16x640xbf16, #tpu.memory_space<vmem>>, vector<16x640xbf16>
    %c0_1 = arith.constant 0 : index
    %c0_2 = arith.constant 0 : index
    %1 = vector.load %arg2[%c0_1, %c0_2] : memref<640x64xbf16, #tpu.memory_space<vmem>>, vector<640x64xbf16>
    %cst = arith.constant dense<0.000000e+00> : vector<16x64xf32>
    %2 = tpu.matmul %0, %1, %cst {dimension_numbers = #tpu.dot_dimension_numbers<[1], [0], [0], [1], [0, 0, 1, 1], [], []>} : vector<16x640xbf16>, vector<640x64xbf16>, vector<16x64xf32> -> vector<16x64xf32>
    %cst_3 = arith.constant 0.000000e+00 : f32
    %3 = vector.broadcast %cst_3 : f32 to vector<16x64xf32>
    %4 = arith.maximumf %2, %3 : vector<16x64xf32>
    %c0_4 = arith.constant 0 : index
    %c0_5 = arith.constant 0 : index
    %5 = vector.load %arg3[%c0_4, %c0_5] : memref<16x64xf32, #tpu.memory_space<vmem>>, vector<16x64xf32>
    tpu.vector_store %arg3[%c0_4, %c0_5], %4 {strides = array<i32>} : memref<16x64xf32, #tpu.memory_space<vmem>>, vector<16x64xf32>,
    return
  }
  func.func @transform_0(%arg0: i32) -> (i32, i32) {
    %c0_i32 = arith.constant 0 : i32
    %c0_i32_0 = arith.constant 0 : i32
    %c0_i32_1 = arith.constant 0 : i32
    return %c0_i32, %c0_i32_0 : i32, i32
  }
  func.func @transform_1(%arg0: i32) -> (i32, i32) {
    %c0_i32 = arith.constant 0 : i32
    %c0_i32_0 = arith.constant 0 : i32
    return %c0_i32, %arg0 : i32, i32
  }
  func.func @transform_2(%arg0: i32) -> (i32, i32) {
    %c0_i32 = arith.constant 0 : i32
    %c0_i32_0 = arith.constant 0 : i32
    return %c0_i32, %arg0 : i32, i32
  }
}

module attributes {stable_mosaic.version = 11 : i64} {
  func.func @_mm_t_kernel(%arg0: i32, %arg1: memref<5x4608xbf16, #tpu.memory_space<vmem>>, %arg2: memref<4608x2xbf16, #tpu.memory_space<vmem>>, %arg3: memref<5x2xf32, #tpu.memory_space<vmem>>) attributes {dimension_semantics = [#tpu.dimension_semantics<parallel>], iteration_bounds = array<i64: 1>, scalar_prefetch = 0 : i64, scratch_operands = 0 : i64, tpu.core_type = #tpu.core_type<tc>, window_params = [{pipeline_mode = #tpu.pipeline_mode<synchronous>, transform_indices = @transform_0, window_bounds = array<i64: 5, 4608>}, {transform_indices = @transform_1, window_bounds = array<i64: 4608, 2>}, {transform_indices = @transform_2, window_bounds = array<i64: 5, 2>}]} {
    %c0 = arith.constant 0 : index
    %c0_0 = arith.constant 0 : index
    %0 = vector.load %arg1[%c0, %c0_0] : memref<5x4608xbf16, #tpu.memory_space<vmem>>, vector<5x4608xbf16>
    %c0_1 = arith.constant 0 : index
    %c0_2 = arith.constant 0 : index
    %1 = vector.load %arg2[%c0_1, %c0_2] : memref<4608x2xbf16, #tpu.memory_space<vmem>>, vector<4608x2xbf16>
    %cst = arith.constant dense<0.000000e+00> : vector<5x2xf32>
    %2 = tpu.matmul %0, %1, %cst {dimension_numbers = #tpu.dot_dimension_numbers<[1], [0], [0], [1], [0, 0, 1, 1], [], []>} : vector<5x4608xbf16>, vector<4608x2xbf16>, vector<5x2xf32> -> vector<5x2xf32>
    %c0_3 = arith.constant 0 : index
    %c0_4 = arith.constant 0 : index
    %3 = vector.load %arg3[%c0_3, %c0_4] : memref<5x2xf32, #tpu.memory_space<vmem>>, vector<5x2xf32>
    tpu.vector_store %arg3[%c0_3, %c0_4], %2 {strides = array<i32>} : memref<5x2xf32, #tpu.memory_space<vmem>>, vector<5x2xf32>,
    return
  }
  func.func @transform_0(%arg0: i32) -> (i32, i32) {
    %c0_i32 = arith.constant 0 : i32
    %c0_i32_0 = arith.constant 0 : i32
    %c0_i32_1 = arith.constant 0 : i32
    return %c0_i32, %c0_i32_0 : i32, i32
  }
  func.func @transform_1(%arg0: i32) -> (i32, i32) {
    %c0_i32 = arith.constant 0 : i32
    %c0_i32_0 = arith.constant 0 : i32
    return %c0_i32, %arg0 : i32, i32
  }
  func.func @transform_2(%arg0: i32) -> (i32, i32) {
    %c0_i32 = arith.constant 0 : i32
    %c0_i32_0 = arith.constant 0 : i32
    return %c0_i32, %arg0 : i32, i32
  }
}

</mosaic_0001>

<bundles_post_ra>
// kernel: forward.5
= control target key start
LH: loop header
LB: loop body
LE: loop exit
PB: predicated region body
PF: predicated region fallthrough
CT: control target
= control target key end

     0   :  { %vm408_vm0 = vcmask 588800   ;;  %s1012_s1 = inlined_call_operand.vmem [shape: bf16[384,200], index: 1, kind: input, shape index: {}]   ;;  %s1013_s0 = inlined_call_operand.vmem [shape: bf16[16,384], index: 0, kind: input, shape index: {}]   ;;  %s1014_s2 = inlined_call_operand.vmem [shape: f32[16,200], index: 2, kind: output, shape index: {}]  }
   0x1   :  { %v486_v0 = vld [vmem:[%s1012_s1 + $0x70] sm:$0xf]  ;;  %v638_v1 = vld [vmem:[%s1012_s1 + $0x74] sm:$0xf0]  ;;  %v478_v9 = vld [vmem:[%s1012_s1 + $0x60] sm:$0xf] }
   0x2   :  { %v550_v2 = vld [vmem:[%s1012_s1 + $0xf0] sm:$0xf]  ;;  %v487_v3 = vor.u32 %v638_v1, %v486_v0  ;;  %v654_v4 = vld [vmem:[%s1012_s1 + $0xf4] sm:$0xf0]  ;;  %v636_v10 = vld [vmem:[%s1012_s1 + $0x64] sm:$0xf0] }
   0x3   :  { %v614_v5 = vld [vmem:[%s1012_s1 + $0x170] sm:$0xf]  ;;  %v670_v6 = vld [vmem:[%s1012_s1 + $0x174] sm:$0xf0]  ;;  %v551_v7 = vor.u32 %v654_v4, %v550_v2  ;;  %v542_v11 = vld [vmem:[%s1012_s1 + $0xe0] sm:$0xf]  ;;  %v479_v12 = vor.u32 %v636_v10, %v478_v9 }
   0x4   :  { %v615_v8 = vor.u32 %v670_v6, %v614_v5  ;;  %319 = vmatpush.bf16.msra.mxu0 %v487_v3  ;;  %v652_v13 = vld [vmem:[%s1012_s1 + $0xe4] sm:$0xf0]  ;;  %v606_v14 = vld [vmem:[%s1012_s1 + $0x160] sm:$0xf]  ;;  %v470_v18 = vld [vmem:[%s1012_s1 + $0x50] sm:$0xf] }
   0x5   :  { %v668_v15 = vld [vmem:[%s1012_s1 + $0x164] sm:$0xf0]  ;;  %333 = vmatpush.bf16.msra.mxu1 %v551_v7  ;;  %v543_v16 = vor.u32 %v652_v13, %v542_v11  ;;  %v634_v19 = vld [vmem:[%s1012_s1 + $0x54] sm:$0xf0]  ;;  %v534_v20 = vld [vmem:[%s1012_s1 + $0xd0] sm:$0xf] }
   0x6   :  { %347 = vmatpush.bf16.msra.mxu2 %v615_v8  ;;  %v607_v17 = vor.u32 %v668_v15, %v606_v14  ;;  %v650_v21 = vld [vmem:[%s1012_s1 + $0xd4] sm:$0xf0]  ;;  %v598_v22 = vld [vmem:[%s1012_s1 + $0x150] sm:$0xf]  ;;  %v471_v24 = vor.u32 %v634_v19, %v470_v18  ;;  %v462_v25 = vld [vmem:[%s1012_s1 + $0x40] sm:$0xf] }
   0x7   :  { %v666_v23 = vld [vmem:[%s1012_s1 + $0x154] sm:$0xf0]  ;;  %v632_v26 = vld [vmem:[%s1012_s1 + $0x44] sm:$0xf0]  ;;  %v535_v27 = vor.u32 %v650_v21, %v534_v20  ;;  %v526_v29 = vld [vmem:[%s1012_s1 + $0xc0] sm:$0xf] }
   0x8   :  { %320 = vmatpush.bf16.msra.mxu0 %v479_v12  ;;  %v599_v28 = vor.u32 %v666_v23, %v598_v22  ;;  %v637_v30 = vld [vmem:[%s1012_s1 + $0x74] sm:$0xf]  ;;  %v488_v31 = vld [vmem:[%s1012_s1 + $0x78] sm:$0xf0]  ;;  %v648_v32 = vld [vmem:[%s1012_s1 + $0xc4] sm:$0xf0]  ;;  %v463_v37 = vor.u32 %v632_v26, %v462_v25 }
   0x9   :  { %334 = vmatpush.bf16.msra.mxu1 %v543_v16  ;;  %v590_v33 = vld [vmem:[%s1012_s1 + $0x140] sm:$0xf]  ;;  %v664_v34 = vld [vmem:[%s1012_s1 + $0x144] sm:$0xf0]  ;;  %v491_v35 = vor.u32 %v637_v30, %v488_v31  ;;  %v635_v36 = vld [vmem:[%s1012_s1 + $0x64] sm:$0xf]  ;;  %v527_v41 = vor.u32 %v648_v32, %v526_v29 }
   0xa   :  { %348 = vmatpush.bf16.msra.mxu2 %v607_v17  ;;  %v454_v38 = vld [vmem:[%s1012_s1 + $0x30] sm:$0xf]  ;;  %v630_v39 = vld [vmem:[%s1012_s1 + $0x34] sm:$0xf0]  ;;  %v480_v40 = vld [vmem:[%s1012_s1 + $0x68] sm:$0xf0]  ;;  %v591_v42 = vor.u32 %v664_v34, %v590_v33 }
   0xb   :  { %361 = vmatpush.bf16.msra.mxu3 %v491_v35  ;;  %v518_v43 = vld [vmem:[%s1012_s1 + $0xb0] sm:$0xf]  ;;  %v646_v44 = vld [vmem:[%s1012_s1 + $0xb4] sm:$0xf0]  ;;  %v483_v46 = vor.u32 %v635_v36, %v480_v40  ;;  %v633_v48 = vld [vmem:[%s1012_s1 + $0x54] sm:$0xf]  ;;  %v455_v50 = vor.u32 %v630_v39, %v454_v38 }
   0xc   :  { %321 = vmatpush.bf16.msra.mxu0 %v471_v24  ;;  %v582_v45 = vld [vmem:[%s1012_s1 + $0x130] sm:$0xf]  ;;  %v662_v47 = vld [vmem:[%s1012_s1 + $0x134] sm:$0xf0]  ;;  %v472_v49 = vld [vmem:[%s1012_s1 + $0x58] sm:$0xf0]  ;;  %v519_v54 = vor.u32 %v646_v44, %v518_v43 }
   0xd   :  { %335 = vmatpush.bf16.msra.mxu1 %v535_v27  ;;  %v446_v51 = vld [vmem:[%s1012_s1 + $0x20] sm:$0xf]  ;;  %v628_v52 = vld [vmem:[%s1012_s1 + $0x24] sm:$0xf0]  ;;  %v475_v53 = vor.u32 %v633_v48, %v472_v49  ;;  %v583_v55 = vor.u32 %v662_v47, %v582_v45  ;;  %v631_v57 = vld [vmem:[%s1012_s1 + $0x44] sm:$0xf] }
   0xe   :  { %349 = vmatpush.bf16.msra.mxu2 %v599_v28  ;;  %v510_v56 = vld [vmem:[%s1012_s1 + $0xa0] sm:$0xf]  ;;  %v464_v58 = vld [vmem:[%s1012_s1 + $0x48] sm:$0xf0]  ;;  %v644_v59 = vld [vmem:[%s1012_s1 + $0xa4] sm:$0xf0]  ;;  %v447_v62 = vor.u32 %v628_v52, %v446_v51 }
   0xf   :  { %362 = vmatpush.bf16.msra.mxu3 %v483_v46  ;;  %v574_v60 = vld [vmem:[%s1012_s1 + $0x120] sm:$0xf]  ;;  %v660_v61 = vld [vmem:[%s1012_s1 + $0x124] sm:$0xf0]  ;;  %v438_v63 = vld [vmem:[%s1012_s1 + $0x10] sm:$0xf]  ;;  %v467_v1 = vor.u32 %v631_v57, %v464_v58  ;;  %v511_v2 = vor.u32 %v644_v59, %v510_v56 }
  0x10   :  { %322 = vmatpush.bf16.msra.mxu0 %v463_v37  ;;  %v626_v0 = vld [vmem:[%s1012_s1 + $0x14] sm:$0xf0]  ;;  %v575_v3 = vor.u32 %v660_v61, %v574_v60  ;;  %v502_v4 = vld [vmem:[%s1012_s1 + $0x90] sm:$0xf]  ;;  %v629_v5 = vld [vmem:[%s1012_s1 + $0x34] sm:$0xf] }
  0x11   :  { %336 = vmatpush.bf16.msra.mxu1 %v527_v41  ;;  %v456_v6 = vld [vmem:[%s1012_s1 + $0x38] sm:$0xf0]  ;;  %v642_v7 = vld [vmem:[%s1012_s1 + $0x94] sm:$0xf0]  ;;  %v566_v8 = vld [vmem:[%s1012_s1 + $0x110] sm:$0xf]  ;;  %v439_v10 = vor.u32 %v626_v0, %v438_v63 }
  0x12   :  { %350 = vmatpush.bf16.msra.mxu2 %v591_v42  ;;  %v658_v9 = vld [vmem:[%s1012_s1 + $0x114] sm:$0xf0]  ;;  %v430_v11 = vld [vmem:[%s1012_s1] sm:$0xf]  ;;  %v624_v12 = vld [vmem:[%s1012_s1 + $0x4] sm:$0xf0]  ;;  %v459_v14 = vor.u32 %v629_v5, %v456_v6  ;;  %v503_v15 = vor.u32 %v642_v7, %v502_v4 }
  0x13   :  { %363 = vmatpush.bf16.msra.mxu3 %v475_v53  ;;  %v494_v13 = vld [vmem:[%s1012_s1 + $0x80] sm:$0xf]  ;;  %v567_v16 = vor.u32 %v658_v9, %v566_v8  ;;  %v640_v17 = vld [vmem:[%s1012_s1 + $0x84] sm:$0xf0]  ;;  %v627_v18 = vld [vmem:[%s1012_s1 + $0x24] sm:$0xf]  ;;  %v431_v26 = vor.u32 %v624_v12, %v430_v11 }
  0x14   :  { %323 = vmatpush.bf16.msra.mxu0 %v455_v50  ;;  %v448_v19 = vld [vmem:[%s1012_s1 + $0x28] sm:$0xf0]  ;;  %v558_v20 = vld [vmem:[%s1012_s1 + $0x100] sm:$0xf]  ;;  %v656_v21 = vld [vmem:[%s1012_s1 + $0x104] sm:$0xf0]  ;;  %v495_v31 = vor.u32 %v640_v17, %v494_v13 }
  0x15   :  { %337 = vmatpush.bf16.msra.mxu1 %v519_v54  ;;  %v653_v22 = vld [vmem:[%s1012_s1 + $0xf4] sm:$0xf]  ;;  %v552_v23 = vld [vmem:[%s1012_s1 + $0xf8] sm:$0xf0]  ;;  %v426_v27 = vld [vmem:[%s1013_s0 + $0x8] sm:$0xf]  ;;  %v451_v28 = vor.u32 %v627_v18, %v448_v19  ;;  %v559_v32 = vor.u32 %v656_v21, %v558_v20 }
  0x16   :  { %351 = vmatpush.bf16.msra.mxu2 %v583_v55  ;;  %v669_v24 = vld [vmem:[%s1012_s1 + $0x174] sm:$0xf]  ;;  %v616_v25 = vld [vmem:[%s1012_s1 + $0x178] sm:$0xf0]  ;;  %v418_v29 = vld [vmem:[%s1013_s0] sm:$0xf]  ;;  %v555_v36 = vor.u32 %v653_v22, %v552_v23 }
  0x17   :  { %364 = vmatpush.bf16.msra.mxu3 %v467_v1  ;;  %v621_v30 = vld [vmem:[%s1013_s0 + $0x8] sm:$0xf0]  ;;  %v622_v33 = vld [vmem:[%s1013_s0 + $0x10] sm:$0xf0]  ;;  %v620_v34 = vld [vmem:[%s1013_s0 + $0x4] sm:$0xf]  ;;  %v619_v37 = vor.u32 %v669_v24, %v616_v25 }
  0x18   :  { %324 = vmatpush.bf16.msra.mxu0 %v447_v62  ;;  %v420_v35 = vld [vmem:[%s1013_s0 + $0xc] sm:$0xf0]  ;;  %v651_v38 = vld [vmem:[%s1012_s1 + $0xe4] sm:$0xf]  ;;  %v625_v39 = vld [vmem:[%s1012_s1 + $0x14] sm:$0xf]  ;;  %v419_v44 = vor.u32 %v621_v30, %v418_v29  ;;  %v914_v45 = vor.u32 %v622_v33, %v426_v27 }
  0x19   :  { %338 = vmatpush.bf16.msra.mxu1 %v511_v2  ;;  %v440_v40 = vld [vmem:[%s1012_s1 + $0x18] sm:$0xf0]  ;;  %v544_v41 = vld [vmem:[%s1012_s1 + $0xe8] sm:$0xf0]  ;;  %v667_v42 = vld [vmem:[%s1012_s1 + $0x164] sm:$0xf]  ;;  %v916_v46 = vor.u32 %v620_v34, %v420_v35 }
  0x1a   :  { %352 = vmatpush.bf16.msra.mxu2 %v575_v3  ;;  %v608_v43 = vld [vmem:[%s1012_s1 + $0x168] sm:$0xf0]  ;;  %v443_v47 = vor.u32 %v625_v39, %v440_v40  ;;  %v547_v48 = vor.u32 %v651_v38, %v544_v41  ;;  %v649_v50 = vld [vmem:[%s1012_s1 + $0xd4] sm:$0xf]  ;;  %v623_v51 = vld [vmem:[%s1012_s1 + $0x4] sm:$0xf] }
  0x1b   :  { %365 = vmatpush.bf16.msra.mxu3 %v459_v14  ;;  %v611_v49 = vor.u32 %v667_v42, %v608_v43  ;;  %v432_v52 = vld [vmem:[%s1012_s1 + $0x8] sm:$0xf0]  ;;  %v536_v53 = vld [vmem:[%s1012_s1 + $0xd8] sm:$0xf0]  ;;  %v665_v54 = vld [vmem:[%s1012_s1 + $0x154] sm:$0xf] }
  0x1c   :  { %325 = vmatpush.bf16.msra.mxu0 %v439_v10  ;;  %v600_v55 = vld [vmem:[%s1012_s1 + $0x158] sm:$0xf0]  ;;  %v435_v56 = vor.u32 %v623_v51, %v432_v52  ;;  %v539_v57 = vor.u32 %v649_v50, %v536_v53  ;;  %v647_v59 = vld [vmem:[%s1012_s1 + $0xc4] sm:$0xf]  ;;  %v528_v60 = vld [vmem:[%s1012_s1 + $0xc8] sm:$0xf0] }
  0x1d   :  { %339 = vmatpush.bf16.msra.mxu1 %v503_v15  ;;  %v603_v58 = vor.u32 %v665_v54, %v600_v55  ;;  %v663_v61 = vld [vmem:[%s1012_s1 + $0x144] sm:$0xf]  ;;  %v592_v62 = vld [vmem:[%s1012_s1 + $0x148] sm:$0xf0]  ;;  %v531_v63 = vor.u32 %v647_v59, %v528_v60  ;;  %v645_v1 = vld [vmem:[%s1012_s1 + $0xb4] sm:$0xf] }
  0x1e   :  { %353 = vmatpush.bf16.msra.mxu2 %v567_v16  ;;  %v595_v0 = vor.u32 %v663_v61, %v592_v62  ;;  %v520_v2 = vld [vmem:[%s1012_s1 + $0xb8] sm:$0xf0]  ;;  %v661_v3 = vld [vmem:[%s1012_s1 + $0x134] sm:$0xf]  ;;  %v643_v7 = vld [vmem:[%s1012_s1 + $0xa4] sm:$0xf] }
  0x1f   :  { %366 = vmatpush.bf16.msra.mxu3 %v451_v28  ;;  %v584_v4 = vld [vmem:[%s1012_s1 + $0x138] sm:$0xf0]  ;;  %v523_v5 = vor.u32 %v645_v1, %v520_v2  ;;  %v512_v8 = vld [vmem:[%s1012_s1 + $0xa8] sm:$0xf0]  ;;  %v659_v9 = vld [vmem:[%s1012_s1 + $0x124] sm:$0xf] }
  0x20   :  { %326 = vmatpush.bf16.msra.mxu0 %v431_v26  ;;  %v587_v6 = vor.u32 %v661_v3, %v584_v4  ;;  %v576_v10 = vld [vmem:[%s1012_s1 + $0x128] sm:$0xf0]  ;;  %v515_v11 = vor.u32 %v643_v7, %v512_v8  ;;  %v641_v13 = vld [vmem:[%s1012_s1 + $0x94] sm:$0xf]  ;;  %v504_v14 = vld [vmem:[%s1012_s1 + $0x98] sm:$0xf0] }
  0x21   :  { %340 = vmatpush.bf16.msra.mxu1 %v495_v31  ;;  %v579_v12 = vor.u32 %v659_v9, %v576_v10  ;;  %v657_v15 = vld [vmem:[%s1012_s1 + $0x114] sm:$0xf]  ;;  %v568_v16 = vld [vmem:[%s1012_s1 + $0x118] sm:$0xf0]  ;;  %v507_v17 = vor.u32 %v641_v13, %v504_v14  ;;  %v639_v19 = vld [vmem:[%s1012_s1 + $0x84] sm:$0xf] }
  0x22   :  { %354 = vmatpush.bf16.msra.mxu2 %v559_v32  ;;  %v571_v18 = vor.u32 %v657_v15, %v568_v16  ;;  %v496_v20 = vld [vmem:[%s1012_s1 + $0x88] sm:$0xf0]  ;;  %v655_v21 = vld [vmem:[%s1012_s1 + $0x104] sm:$0xf] }
  0x23   :  { %327 = vmatmul.bf16.vlgmr.msra.gmra.mxu0 %v419_v44  ;;  %367 = vmatpush.bf16.msra.mxu3 %v443_v47  ;;  %v560_v22 = vld [vmem:[%s1012_s1 + $0x108] sm:$0xf0]  ;;  %v499_v23 = vor.u32 %v639_v19, %v496_v20 }
  0x24   :  { %375 = vmatpush.bf16.msrb.mxu0 %v555_v36  ;;  %341 = vmatmul.bf16.vlgmr.msra.gmra.mxu1 %v916_v46  ;;  %v563_v24 = vor.u32 %v655_v21, %v560_v22 }
  0x25   :  { %389 = vmatpush.bf16.msrb.mxu1 %v619_v37  ;;  %355 = vmatmul.bf16.vlgmr.msra.gmra.mxu2 %v914_v45 }
  0x27   :  { %368 = vmatpush.bf16.msra.mxu3 %v435_v56 }
  0x28   :  { %376 = vmatpush.bf16.msrb.mxu0 %v547_v48 }
  0x29   :  { %390 = vmatpush.bf16.msrb.mxu1 %v611_v49 }
  0x2a   :  { %369 = vmatmul.bf16.vlgmr.msra.gmra.mxu3 %v419_v44 }
  0x2c   :  { %377 = vmatpush.bf16.msrb.mxu0 %v539_v57 }
  0x2d   :  { %391 = vmatpush.bf16.msrb.mxu1 %v603_v58 }
  0x30   :  { %378 = vmatpush.bf16.msrb.mxu0 %v531_v63 }
  0x31   :  { %392 = vmatpush.bf16.msrb.mxu1 %v595_v0 }
  0x34   :  { %379 = vmatpush.bf16.msrb.mxu0 %v523_v5 }
  0x35   :  { %393 = vmatpush.bf16.msrb.mxu1 %v587_v6 }
  0x38   :  { %380 = vmatpush.bf16.msrb.mxu0 %v515_v11 }
  0x39   :  { %394 = vmatpush.bf16.msrb.mxu1 %v579_v12 }
  0x3c   :  { %381 = vmatpush.bf16.msrb.mxu0 %v507_v17 }
  0x3d   :  { %395 = vmatpush.bf16.msrb.mxu1 %v571_v18 }
  0x40   :  { %382 = vmatpush.bf16.msrb.mxu0 %v499_v23 }
  0x41   :  { %396 = vmatpush.bf16.msrb.mxu1 %v563_v24 }
  0x43   :  { %383 = vmatmul.bf16.vlgmr.msrb.gmra.mxu0 %v916_v46 }
  0x44   :  { %397 = vmatmul.bf16.vlgmr.msrb.gmra.mxu1 %v914_v45 }
  0xa0   :  { %v328_v25 = vpop.f32.mrf.mxu0 }
  0xa1   :  { %v342_v26 = vpop.f32.mrf.mxu1 }
  0xa2   :  { %v343_v27 = vadd.f32 %v342_v26, %v328_v25 }
  0xa8   :  { %v356_v28 = vpop.f32.mrf.mxu2  ;;  %v330_v30 = vpop.f32.mrf.mxu0 }
  0xa9   :  { %v357_v29 = vadd.f32 %v356_v28, %v343_v27  ;;  %v344_v31 = vpop.f32.mrf.mxu1 }
  0xaa   :  { %v345_v33 = vadd.f32 %v344_v31, %v330_v30 }
  0xab   :  { %v403_v32 = vmax.f32 %v357_v29, 0.0 }
  0xad   :  { %407 = vst [vmem:[%s1014_s2] sm:$0xff] %v403_v32  ;;  %v370_v37 = vpop.f32.mrf.mxu3 }
  0xb0   :  { %v358_v34 = vpop.f32.mrf.mxu2 }
  0xb1   :  { %v359_v35 = vadd.f32 %v358_v34, %v345_v33 }
  0xb3   :  { %v405_v36 = vmax.f32 %v359_v35, 0.0 }
  0xb5   :  { %410 = vst [vmem:[%s1014_s2 + $0x10] sm:$0xff] %v405_v36  ;;  %v372_v43 = vpop.f32.mrf.mxu3 }
  0xc0   :  { %v384_v38 = vpop.f32.mrf.mxu0 }
  0xc1   :  { %v398_v39 = vpop.f32.mrf.mxu1  ;;  %v385_v40 = vadd.f32 %v384_v38, %v370_v37 }
  0xc3   :  { %v399_v41 = vadd.f32 %v398_v39, %v385_v40 }
  0xc5   :  { %v404_v42 = vmax.f32 %v399_v41, 0.0 }
  0xc7   :  { %409 = vst.msk [vmem:[%s1014_s2 + $0x8] sm:$0xff] %vm408_vm0, %v404_v42 }
  0xc8   :  { %v386_v44 = vpop.f32.mrf.mxu0 }
  0xc9   :  { %v387_v45 = vadd.f32 %v386_v44, %v372_v43  ;;  %v400_v46 = vpop.f32.mrf.mxu1 }
  0xcb   :  { %v401_v47 = vadd.f32 %v400_v46, %v387_v45 }
  0xcd   :  { %v406_v48 = vmax.f32 %v401_v47, 0.0 }
  0xcf   :  { %411 = vst.msk [vmem:[%s1014_s2 + $0x18] sm:$0xff] %vm408_vm0, %v406_v48 }

// kernel: forward.6
= control target key start
LH: loop header
LB: loop body
LE: loop exit
PB: predicated region body
PF: predicated region fallthrough
CT: control target
= control target key end

     0   :  { %vm1056_vm0 = vcmask 588800   ;;  %s2619_s1 = inlined_call_operand.vmem [shape: bf16[1024,200], index: 1, kind: input, shape index: {}]   ;;  %s2620_s0 = inlined_call_operand.vmem [shape: bf16[16,1024], index: 0, kind: input, shape index: {}]   ;;  %s2621_s2 = inlined_call_operand.vmem [shape: f32[16,200], index: 2, kind: output, shape index: {}]  }
   0x1   :  { %v1154_v0 = vld [vmem:[%s2619_s1 + $0x70] sm:$0xf]  ;;  %v1631_v1 = vld [vmem:[%s2619_s1 + $0x74] sm:$0xf0]  ;;  %v1146_v11 = vld [vmem:[%s2619_s1 + $0x60] sm:$0xf] }
   0x2   :  { %v1218_v2 = vld [vmem:[%s2619_s1 + $0xf0] sm:$0xf]  ;;  %v1155_v3 = vor.u32 %v1631_v1, %v1154_v0  ;;  %v1647_v4 = vld [vmem:[%s2619_s1 + $0xf4] sm:$0xf0]  ;;  %v1629_v13 = vld [vmem:[%s2619_s1 + $0x64] sm:$0xf0] }
   0x3   :  { %v1282_v5 = vld [vmem:[%s2619_s1 + $0x170] sm:$0xf]  ;;  %v1663_v6 = vld [vmem:[%s2619_s1 + $0x174] sm:$0xf0]  ;;  %v1219_v7 = vor.u32 %v1647_v4, %v1218_v2  ;;  %v1210_v14 = vld [vmem:[%s2619_s1 + $0xe0] sm:$0xf]  ;;  %v1147_v16 = vor.u32 %v1629_v13, %v1146_v11 }
   0x4   :  { %v1283_v8 = vor.u32 %v1663_v6, %v1282_v5  ;;  %v1346_v9 = vld [vmem:[%s2619_s1 + $0x1f0] sm:$0xf]  ;;  %v1679_v10 = vld [vmem:[%s2619_s1 + $0x1f4] sm:$0xf0]  ;;  %827 = vmatpush.bf16.msra.mxu0 %v1155_v3  ;;  %v1645_v15 = vld [vmem:[%s2619_s1 + $0xe4] sm:$0xf0] }
   0x5   :  { %v1347_v12 = vor.u32 %v1679_v10, %v1346_v9  ;;  %841 = vmatpush.bf16.msra.mxu1 %v1219_v7  ;;  %v1211_v17 = vor.u32 %v1645_v15, %v1210_v14  ;;  %v1274_v18 = vld [vmem:[%s2619_s1 + $0x160] sm:$0xf]  ;;  %v1661_v19 = vld [vmem:[%s2619_s1 + $0x164] sm:$0xf0]  ;;  %v1138_v23 = vld [vmem:[%s2619_s1 + $0x50] sm:$0xf] }
   0x6   :  { %855 = vmatpush.bf16.msra.mxu2 %v1283_v8  ;;  %v1338_v20 = vld [vmem:[%s2619_s1 + $0x1e0] sm:$0xf]  ;;  %v1275_v21 = vor.u32 %v1661_v19, %v1274_v18  ;;  %v1677_v22 = vld [vmem:[%s2619_s1 + $0x1e4] sm:$0xf0]  ;;  %v1627_v24 = vld [vmem:[%s2619_s1 + $0x54] sm:$0xf0] }
   0x7   :  { %869 = vmatpush.bf16.msra.mxu3 %v1347_v12  ;;  %v1339_v25 = vor.u32 %v1677_v22, %v1338_v20  ;;  %v1202_v26 = vld [vmem:[%s2619_s1 + $0xd0] sm:$0xf]  ;;  %v1643_v27 = vld [vmem:[%s2619_s1 + $0xd4] sm:$0xf0]  ;;  %v1139_v29 = vor.u32 %v1627_v24, %v1138_v23  ;;  %v1130_v35 = vld [vmem:[%s2619_s1 + $0x40] sm:$0xf] }
   0x8   :  { %v1266_v28 = vld [vmem:[%s2619_s1 + $0x150] sm:$0xf]  ;;  %828 = vmatpush.bf16.msra.mxu0 %v1147_v16  ;;  %v1659_v30 = vld [vmem:[%s2619_s1 + $0x154] sm:$0xf0]  ;;  %v1203_v33 = vor.u32 %v1643_v27, %v1202_v26  ;;  %v1625_v36 = vld [vmem:[%s2619_s1 + $0x44] sm:$0xf0] }
   0x9   :  { %v1330_v31 = vld [vmem:[%s2619_s1 + $0x1d0] sm:$0xf]  ;;  %v1675_v32 = vld [vmem:[%s2619_s1 + $0x1d4] sm:$0xf0]  ;;  %842 = vmatpush.bf16.msra.mxu1 %v1211_v17  ;;  %v1267_v34 = vor.u32 %v1659_v30, %v1266_v28  ;;  %v1194_v37 = vld [vmem:[%s2619_s1 + $0xc0] sm:$0xf]  ;;  %v1131_v44 = vor.u32 %v1625_v36, %v1130_v35 }
   0xa   :  { %856 = vmatpush.bf16.msra.mxu2 %v1275_v21  ;;  %v1331_v38 = vor.u32 %v1675_v32, %v1330_v31  ;;  %v1641_v39 = vld [vmem:[%s2619_s1 + $0xc4] sm:$0xf0]  ;;  %v1258_v40 = vld [vmem:[%s2619_s1 + $0x140] sm:$0xf]  ;;  %v1122_v47 = vld [vmem:[%s2619_s1 + $0x30] sm:$0xf] }
   0xb   :  { %870 = vmatpush.bf16.msra.mxu3 %v1339_v25  ;;  %v1657_v41 = vld [vmem:[%s2619_s1 + $0x144] sm:$0xf0]  ;;  %v1322_v42 = vld [vmem:[%s2619_s1 + $0x1c0] sm:$0xf]  ;;  %v1195_v45 = vor.u32 %v1641_v39, %v1194_v37  ;;  %v1623_v48 = vld [vmem:[%s2619_s1 + $0x34] sm:$0xf0] }
   0xc   :  { %v1673_v43 = vld [vmem:[%s2619_s1 + $0x1c4] sm:$0xf0]  ;;  %829 = vmatpush.bf16.msra.mxu0 %v1139_v29  ;;  %v1259_v46 = vor.u32 %v1657_v41, %v1258_v40  ;;  %v1186_v49 = vld [vmem:[%s2619_s1 + $0xb0] sm:$0xf]  ;;  %v1639_v51 = vld [vmem:[%s2619_s1 + $0xb4] sm:$0xf0]  ;;  %v1123_v56 = vor.u32 %v1623_v48, %v1122_v47 }
   0xd   :  { %843 = vmatpush.bf16.msra.mxu1 %v1203_v33  ;;  %v1323_v50 = vor.u32 %v1673_v43, %v1322_v42  ;;  %v1250_v52 = vld [vmem:[%s2619_s1 + $0x130] sm:$0xf]  ;;  %v1655_v53 = vld [vmem:[%s2619_s1 + $0x134] sm:$0xf0]  ;;  %v1187_v57 = vor.u32 %v1639_v51, %v1186_v49  ;;  %v1114_v59 = vld [vmem:[%s2619_s1 + $0x20] sm:$0xf] }
   0xe   :  { %857 = vmatpush.bf16.msra.mxu2 %v1267_v34  ;;  %v1314_v54 = vld [vmem:[%s2619_s1 + $0x1b0] sm:$0xf]  ;;  %v1671_v55 = vld [vmem:[%s2619_s1 + $0x1b4] sm:$0xf0]  ;;  %v1251_v58 = vor.u32 %v1655_v53, %v1250_v52  ;;  %v1621_v60 = vld [vmem:[%s2619_s1 + $0x24] sm:$0xf0] }
   0xf   :  { %871 = vmatpush.bf16.msra.mxu3 %v1331_v38  ;;  %v1178_v61 = vld [vmem:[%s2619_s1 + $0xa0] sm:$0xf]  ;;  %v1315_v62 = vor.u32 %v1671_v55, %v1314_v54  ;;  %v1637_v63 = vld [vmem:[%s2619_s1 + $0xa4] sm:$0xf0]  ;;  %v1115_v4 = vor.u32 %v1621_v60, %v1114_v59  ;;  %v1106_v7 = vld [vmem:[%s2619_s1 + $0x10] sm:$0xf] }
  0x10   :  { %830 = vmatpush.bf16.msra.mxu0 %v1131_v44  ;;  %v1242_v0 = vld [vmem:[%s2619_s1 + $0x120] sm:$0xf]  ;;  %v1653_v1 = vld [vmem:[%s2619_s1 + $0x124] sm:$0xf0]  ;;  %v1179_v5 = vor.u32 %v1637_v63, %v1178_v61  ;;  %v1619_v8 = vld [vmem:[%s2619_s1 + $0x14] sm:$0xf0] }
  0x11   :  { %844 = vmatpush.bf16.msra.mxu1 %v1195_v45  ;;  %v1306_v2 = vld [vmem:[%s2619_s1 + $0x1a0] sm:$0xf]  ;;  %v1669_v3 = vld [vmem:[%s2619_s1 + $0x1a4] sm:$0xf0]  ;;  %v1243_v6 = vor.u32 %v1653_v1, %v1242_v0  ;;  %v1170_v9 = vld [vmem:[%s2619_s1 + $0x90] sm:$0xf]  ;;  %v1107_v16 = vor.u32 %v1619_v8, %v1106_v7 }
  0x12   :  { %858 = vmatpush.bf16.msra.mxu2 %v1259_v46  ;;  %v1307_v10 = vor.u32 %v1669_v3, %v1306_v2  ;;  %v1635_v11 = vld [vmem:[%s2619_s1 + $0x94] sm:$0xf0]  ;;  %v1234_v12 = vld [vmem:[%s2619_s1 + $0x110] sm:$0xf]  ;;  %v1098_v17 = vld [vmem:[%s2619_s1] sm:$0xf] }
  0x13   :  { %872 = vmatpush.bf16.msra.mxu3 %v1323_v50  ;;  %v1651_v13 = vld [vmem:[%s2619_s1 + $0x114] sm:$0xf0]  ;;  %v1298_v14 = vld [vmem:[%s2619_s1 + $0x190] sm:$0xf]  ;;  %v1617_v18 = vld [vmem:[%s2619_s1 + $0x4] sm:$0xf0]  ;;  %v1171_v19 = vor.u32 %v1635_v11, %v1170_v9 }
  0x14   :  { %831 = vmatpush.bf16.msra.mxu0 %v1123_v56  ;;  %v1667_v15 = vld [vmem:[%s2619_s1 + $0x194] sm:$0xf0]  ;;  %v1235_v20 = vor.u32 %v1651_v13, %v1234_v12  ;;  %v1162_v21 = vld [vmem:[%s2619_s1 + $0x80] sm:$0xf]  ;;  %v1633_v22 = vld [vmem:[%s2619_s1 + $0x84] sm:$0xf0]  ;;  %v1099_v31 = vor.u32 %v1617_v18, %v1098_v17 }
  0x15   :  { %845 = vmatpush.bf16.msra.mxu1 %v1187_v57  ;;  %v1226_v23 = vld [vmem:[%s2619_s1 + $0x100] sm:$0xf]  ;;  %v1299_v24 = vor.u32 %v1667_v15, %v1298_v14  ;;  %v1649_v25 = vld [vmem:[%s2619_s1 + $0x104] sm:$0xf0]  ;;  %v1410_v28 = vld [vmem:[%s2619_s1 + $0x270] sm:$0xf]  ;;  %v1163_v35 = vor.u32 %v1633_v22, %v1162_v21 }
  0x16   :  { %859 = vmatpush.bf16.msra.mxu2 %v1251_v58  ;;  %v1290_v26 = vld [vmem:[%s2619_s1 + $0x180] sm:$0xf]  ;;  %v1665_v27 = vld [vmem:[%s2619_s1 + $0x184] sm:$0xf0]  ;;  %v1695_v29 = vld [vmem:[%s2619_s1 + $0x274] sm:$0xf0]  ;;  %v1227_v36 = vor.u32 %v1649_v25, %v1226_v23 }
  0x17   :  { %873 = vmatpush.bf16.msra.mxu3 %v1315_v62  ;;  %v1474_v30 = vld [vmem:[%s2619_s1 + $0x2f0] sm:$0xf]  ;;  %v1711_v32 = vld [vmem:[%s2619_s1 + $0x2f4] sm:$0xf0]  ;;  %v1291_v39 = vor.u32 %v1665_v27, %v1290_v26  ;;  %v1411_v40 = vor.u32 %v1695_v29, %v1410_v28  ;;  %v1402_v41 = vld [vmem:[%s2619_s1 + $0x260] sm:$0xf] }
  0x18   :  { %832 = vmatpush.bf16.msra.mxu0 %v1115_v4  ;;  %v1538_v33 = vld [vmem:[%s2619_s1 + $0x370] sm:$0xf]  ;;  %v1727_v34 = vld [vmem:[%s2619_s1 + $0x374] sm:$0xf0]  ;;  %v1693_v42 = vld [vmem:[%s2619_s1 + $0x264] sm:$0xf0]  ;;  %v1475_v43 = vor.u32 %v1711_v32, %v1474_v30 }
  0x19   :  { %846 = vmatpush.bf16.msra.mxu1 %v1179_v5  ;;  %v1602_v37 = vld [vmem:[%s2619_s1 + $0x3f0] sm:$0xf]  ;;  %v1743_v38 = vld [vmem:[%s2619_s1 + $0x3f4] sm:$0xf0]  ;;  %v1539_v44 = vor.u32 %v1727_v34, %v1538_v33  ;;  %v1466_v45 = vld [vmem:[%s2619_s1 + $0x2e0] sm:$0xf]  ;;  %v1403_v55 = vor.u32 %v1693_v42, %v1402_v41 }
  0x1a   :  { %860 = vmatpush.bf16.msra.mxu2 %v1243_v6  ;;  %v1709_v46 = vld [vmem:[%s2619_s1 + $0x2e4] sm:$0xf0]  ;;  %v1530_v47 = vld [vmem:[%s2619_s1 + $0x360] sm:$0xf]  ;;  %v1603_v48 = vor.u32 %v1743_v38, %v1602_v37  ;;  %v1394_v56 = vld [vmem:[%s2619_s1 + $0x250] sm:$0xf] }
  0x1b   :  { %874 = vmatpush.bf16.msra.mxu3 %v1307_v10  ;;  %v1725_v49 = vld [vmem:[%s2619_s1 + $0x364] sm:$0xf0]  ;;  %v1594_v50 = vld [vmem:[%s2619_s1 + $0x3e0] sm:$0xf]  ;;  %v1691_v57 = vld [vmem:[%s2619_s1 + $0x254] sm:$0xf0]  ;;  %v1467_v60 = vor.u32 %v1709_v46, %v1466_v45 }
  0x1c   :  { %833 = vmatpush.bf16.msra.mxu0 %v1107_v16  ;;  %v1741_v51 = vld [vmem:[%s2619_s1 + $0x3e4] sm:$0xf0]  ;;  %v1066_v52 = vld [vmem:[%s2620_s0] sm:$0xf]  ;;  %v1531_v61 = vor.u32 %v1725_v49, %v1530_v47  ;;  %v1458_v62 = vld [vmem:[%s2619_s1 + $0x2d0] sm:$0xf]  ;;  %v1395_v9 = vor.u32 %v1691_v57, %v1394_v56 }
  0x1d   :  { %847 = vmatpush.bf16.msra.mxu1 %v1171_v19  ;;  %v1612_v53 = vld [vmem:[%s2620_s0 + $0x1c] sm:$0xf0]  ;;  %v1074_v54 = vld [vmem:[%s2620_s0 + $0x8] sm:$0xf]  ;;  %v1707_v63 = vld [vmem:[%s2619_s1 + $0x2d4] sm:$0xf0]  ;;  %v1595_v2 = vor.u32 %v1741_v51, %v1594_v50 }
  0x1e   :  { %861 = vmatpush.bf16.msra.mxu2 %v1235_v20  ;;  %v2014_v58 = vor.u32 %v1612_v53, %v1066_v52  ;;  %v1613_v59 = vld [vmem:[%s2620_s0 + $0x24] sm:$0xf0]  ;;  %v1522_v0 = vld [vmem:[%s2619_s1 + $0x350] sm:$0xf]  ;;  %v1723_v3 = vld [vmem:[%s2619_s1 + $0x354] sm:$0xf0]  ;;  %v1459_v12 = vor.u32 %v1707_v63, %v1458_v62 }
  0x1f   :  { %875 = vmatpush.bf16.msra.mxu3 %v1299_v24  ;;  %v2028_v1 = vor.u32 %v1613_v59, %v1074_v54  ;;  %v1586_v4 = vld [vmem:[%s2619_s1 + $0x3d0] sm:$0xf]  ;;  %v1739_v5 = vld [vmem:[%s2619_s1 + $0x3d4] sm:$0xf0]  ;;  %v1608_v6 = vld [vmem:[%s2620_s0 + $0x4] sm:$0xf]  ;;  %v1523_v13 = vor.u32 %v1723_v3, %v1522_v0 }
  0x20   :  { %834 = vmatpush.bf16.msra.mxu0 %v1099_v31  ;;  %v1068_v7 = vld [vmem:[%s2620_s0 + $0x20] sm:$0xf0]  ;;  %v1609_v8 = vld [vmem:[%s2620_s0 + $0xc] sm:$0xf]  ;;  %v1386_v14 = vld [vmem:[%s2619_s1 + $0x240] sm:$0xf]  ;;  %v1587_v18 = vor.u32 %v1739_v5, %v1586_v4 }
  0x21   :  { %848 = vmatpush.bf16.msra.mxu1 %v1163_v35  ;;  %v2050_v10 = vor.u32 %v1608_v6, %v1068_v7  ;;  %v1076_v11 = vld [vmem:[%s2620_s0 + $0x28] sm:$0xf0]  ;;  %v1689_v15 = vld [vmem:[%s2619_s1 + $0x244] sm:$0xf0]  ;;  %v1450_v16 = vld [vmem:[%s2619_s1 + $0x2c0] sm:$0xf] }
  0x22   :  { %862 = vmatpush.bf16.msra.mxu2 %v1227_v36  ;;  %v2064_v17 = vor.u32 %v1609_v8, %v1076_v11  ;;  %v1705_v19 = vld [vmem:[%s2619_s1 + $0x2c4] sm:$0xf0]  ;;  %v1514_v20 = vld [vmem:[%s2619_s1 + $0x340] sm:$0xf]  ;;  %v1387_v24 = vor.u32 %v1689_v15, %v1386_v14  ;;  %v1378_v27 = vld [vmem:[%s2619_s1 + $0x230] sm:$0xf] }
  0x23   :  { %876 = vmatpush.bf16.msra.mxu3 %v1291_v39  ;;  %835 = vmatmul.bf16.vlgmr.msra.gmra.mxu0 %v2014_v58  ;;  %v1721_v21 = vld [vmem:[%s2619_s1 + $0x344] sm:$0xf0]  ;;  %v1578_v22 = vld [vmem:[%s2619_s1 + $0x3c0] sm:$0xf]  ;;  %v1451_v25 = vor.u32 %v1705_v19, %v1450_v16  ;;  %v1687_v28 = vld [vmem:[%s2619_s1 + $0x234] sm:$0xf0] }
  0x24   :  { %883 = vmatpush.bf16.msrb.mxu0 %v1411_v40  ;;  %849 = vmatmul.bf16.vlgmr.msra.gmra.mxu1 %v2050_v10  ;;  %v1737_v23 = vld [vmem:[%s2619_s1 + $0x3c4] sm:$0xf0]  ;;  %v1515_v26 = vor.u32 %v1721_v21, %v1514_v20  ;;  %v1442_v29 = vld [vmem:[%s2619_s1 + $0x2b0] sm:$0xf]  ;;  %v1703_v31 = vld [vmem:[%s2619_s1 + $0x2b4] sm:$0xf0]  ;;  %v1379_v36 = vor.u32 %v1687_v28, %v1378_v27 }
  0x25   :  { %897 = vmatpush.bf16.msrb.mxu1 %v1475_v43  ;;  %863 = vmatmul.bf16.vlgmr.msra.gmra.mxu2 %v2028_v1  ;;  %v1579_v30 = vor.u32 %v1737_v23, %v1578_v22  ;;  %v1506_v32 = vld [vmem:[%s2619_s1 + $0x330] sm:$0xf]  ;;  %v1719_v33 = vld [vmem:[%s2619_s1 + $0x334] sm:$0xf0]  ;;  %v1443_v37 = vor.u32 %v1703_v31, %v1442_v29  ;;  %v1370_v39 = vld [vmem:[%s2619_s1 + $0x220] sm:$0xf] }
  0x26   :  { %911 = vmatpush.bf16.msrb.mxu2 %v1539_v44  ;;  %877 = vmatmul.bf16.vlgmr.msra.gmra.mxu3 %v2064_v17  ;;  %v1570_v34 = vld [vmem:[%s2619_s1 + $0x3b0] sm:$0xf]  ;;  %v1735_v35 = vld [vmem:[%s2619_s1 + $0x3b4] sm:$0xf0]  ;;  %v1507_v38 = vor.u32 %v1719_v33, %v1506_v32  ;;  %v1685_v40 = vld [vmem:[%s2619_s1 + $0x224] sm:$0xf0] }
  0x27   :  { %925 = vmatpush.bf16.msrb.mxu3 %v1603_v48  ;;  %v1434_v41 = vld [vmem:[%s2619_s1 + $0x2a0] sm:$0xf]  ;;  %v1571_v42 = vor.u32 %v1735_v35, %v1570_v34  ;;  %v1701_v43 = vld [vmem:[%s2619_s1 + $0x2a4] sm:$0xf0]  ;;  %v1371_v48 = vor.u32 %v1685_v40, %v1370_v39  ;;  %v1362_v49 = vld [vmem:[%s2619_s1 + $0x210] sm:$0xf] }
  0x28   :  { %884 = vmatpush.bf16.msrb.mxu0 %v1403_v55  ;;  %v1498_v44 = vld [vmem:[%s2619_s1 + $0x320] sm:$0xf]  ;;  %v1717_v45 = vld [vmem:[%s2619_s1 + $0x324] sm:$0xf0]  ;;  %v1435_v50 = vor.u32 %v1701_v43, %v1434_v41  ;;  %v1683_v52 = vld [vmem:[%s2619_s1 + $0x214] sm:$0xf0] }
  0x29   :  { %898 = vmatpush.bf16.msrb.mxu1 %v1467_v60  ;;  %v1562_v46 = vld [vmem:[%s2619_s1 + $0x3a0] sm:$0xf]  ;;  %v1733_v47 = vld [vmem:[%s2619_s1 + $0x3a4] sm:$0xf0]  ;;  %v1499_v51 = vor.u32 %v1717_v45, %v1498_v44  ;;  %v1426_v53 = vld [vmem:[%s2619_s1 + $0x290] sm:$0xf]  ;;  %v1363_v63 = vor.u32 %v1683_v52, %v1362_v49 }
  0x2a   :  { %912 = vmatpush.bf16.msrb.mxu2 %v1531_v61  ;;  %v1699_v54 = vld [vmem:[%s2619_s1 + $0x294] sm:$0xf0]  ;;  %v1563_v55 = vor.u32 %v1733_v47, %v1562_v46  ;;  %v1490_v56 = vld [vmem:[%s2619_s1 + $0x310] sm:$0xf]  ;;  %v1354_v61 = vld [vmem:[%s2619_s1 + $0x200] sm:$0xf] }
  0x2b   :  { %926 = vmatpush.bf16.msrb.mxu3 %v1595_v2  ;;  %v1715_v57 = vld [vmem:[%s2619_s1 + $0x314] sm:$0xf0]  ;;  %v1554_v59 = vld [vmem:[%s2619_s1 + $0x390] sm:$0xf]  ;;  %v1681_v62 = vld [vmem:[%s2619_s1 + $0x204] sm:$0xf0]  ;;  %v1427_v5 = vor.u32 %v1699_v54, %v1426_v53 }
  0x2c   :  { %885 = vmatpush.bf16.msrb.mxu0 %v1395_v9  ;;  %v1731_v60 = vld [vmem:[%s2619_s1 + $0x394] sm:$0xf0]  ;;  %v1418_v0 = vld [vmem:[%s2619_s1 + $0x280] sm:$0xf]  ;;  %v1697_v2 = vld [vmem:[%s2619_s1 + $0x284] sm:$0xf0]  ;;  %v1491_v6 = vor.u32 %v1715_v57, %v1490_v56  ;;  %v1355_v19 = vor.u32 %v1681_v62, %v1354_v61 }
  0x2d   :  { %899 = vmatpush.bf16.msrb.mxu1 %v1459_v12  ;;  %v1482_v3 = vld [vmem:[%s2619_s1 + $0x300] sm:$0xf]  ;;  %v1713_v4 = vld [vmem:[%s2619_s1 + $0x304] sm:$0xf0]  ;;  %v1630_v9 = vld [vmem:[%s2619_s1 + $0x74] sm:$0xf]  ;;  %v1555_v11 = vor.u32 %v1731_v60, %v1554_v59  ;;  %v1419_v23 = vor.u32 %v1697_v2, %v1418_v0 }
  0x2e   :  { %913 = vmatpush.bf16.msrb.mxu2 %v1523_v13  ;;  %v1546_v7 = vld [vmem:[%s2619_s1 + $0x380] sm:$0xf]  ;;  %v1729_v8 = vld [vmem:[%s2619_s1 + $0x384] sm:$0xf0]  ;;  %v1156_v12 = vld [vmem:[%s2619_s1 + $0x78] sm:$0xf0] }
  0x2f   :  { %927 = vmatpush.bf16.msrb.mxu3 %v1587_v18  ;;  %v1646_v13 = vld [vmem:[%s2619_s1 + $0xf4] sm:$0xf]  ;;  %v1220_v14 = vld [vmem:[%s2619_s1 + $0xf8] sm:$0xf0]  ;;  %v1082_v21 = vld [vmem:[%s2620_s0 + $0x10] sm:$0xf]  ;;  %v1547_v28 = vor.u32 %v1729_v8, %v1546_v7  ;;  %v1159_v29 = vor.u32 %v1630_v9, %v1156_v12 }
  0x30   :  { %886 = vmatpush.bf16.msrb.mxu0 %v1387_v24  ;;  %v1662_v15 = vld [vmem:[%s2619_s1 + $0x174] sm:$0xf]  ;;  %v1284_v16 = vld [vmem:[%s2619_s1 + $0x178] sm:$0xf0]  ;;  %v1614_v22 = vld [vmem:[%s2620_s0 + $0x2c] sm:$0xf0]  ;;  %v1483_v24 = vor.u32 %v1713_v4, %v1482_v3  ;;  %v1223_v33 = vor.u32 %v1646_v13, %v1220_v14 }
  0x31   :  { %900 = vmatpush.bf16.msrb.mxu1 %v1451_v25  ;;  %v1678_v18 = vld [vmem:[%s2619_s1 + $0x1f4] sm:$0xf]  ;;  %v1348_v20 = vld [vmem:[%s2619_s1 + $0x1f8] sm:$0xf0]  ;;  %v1090_v25 = vld [vmem:[%s2620_s0 + $0x18] sm:$0xf]  ;;  %v1287_v34 = vor.u32 %v1662_v15, %v1284_v16  ;;  %v2236_v39 = vor.u32 %v1614_v22, %v1082_v21 }
  0x32   :  { %914 = vmatpush.bf16.msrb.mxu2 %v1515_v26  ;;  %v1615_v26 = vld [vmem:[%s2620_s0 + $0x34] sm:$0xf0]  ;;  %v1610_v27 = vld [vmem:[%s2620_s0 + $0x14] sm:$0xf]  ;;  %v1611_v31 = vld [vmem:[%s2620_s0 + $0x1c] sm:$0xf] }
  0x33   :  { %928 = vmatpush.bf16.msrb.mxu3 %v1579_v30  ;;  %v1084_v30 = vld [vmem:[%s2620_s0 + $0x30] sm:$0xf0]  ;;  %v1092_v32 = vld [vmem:[%s2620_s0 + $0x38] sm:$0xf0]  ;;  %v1628_v35 = vld [vmem:[%s2619_s1 + $0x64] sm:$0xf]  ;;  %v2247_v43 = vor.u32 %v1615_v26, %v1090_v25 }
  0x34   :  { %887 = vmatpush.bf16.msrb.mxu0 %v1379_v36  ;;  %v1148_v36 = vld [vmem:[%s2619_s1 + $0x68] sm:$0xf0]  ;;  %v1660_v41 = vld [vmem:[%s2619_s1 + $0x164] sm:$0xf]  ;;  %v2249_v44 = vor.u32 %v1610_v27, %v1084_v30  ;;  %v2257_v47 = vor.u32 %v1611_v31, %v1092_v32  ;;  %v1140_v52 = vld [vmem:[%s2619_s1 + $0x58] sm:$0xf0] }
  0x35   :  { %901 = vmatpush.bf16.msrb.mxu1 %v1443_v37  ;;  %v1644_v37 = vld [vmem:[%s2619_s1 + $0xe4] sm:$0xf]  ;;  %v1212_v40 = vld [vmem:[%s2619_s1 + $0xe8] sm:$0xf0]  ;;  %v1642_v53 = vld [vmem:[%s2619_s1 + $0xd4] sm:$0xf] }
  0x36   :  { %915 = vmatpush.bf16.msrb.mxu2 %v1507_v38  ;;  %v1351_v38 = vor.u32 %v1678_v18, %v1348_v20  ;;  %v1676_v45 = vld [vmem:[%s2619_s1 + $0x1e4] sm:$0xf]  ;;  %v1340_v46 = vld [vmem:[%s2619_s1 + $0x1e8] sm:$0xf0]  ;;  %v1215_v49 = vor.u32 %v1644_v37, %v1212_v40  ;;  %v1658_v56 = vld [vmem:[%s2619_s1 + $0x154] sm:$0xf] }
  0x37   :  { %929 = vmatpush.bf16.msrb.mxu3 %v1571_v42  ;;  %v1276_v42 = vld [vmem:[%s2619_s1 + $0x168] sm:$0xf0]  ;;  %v1343_v54 = vor.u32 %v1676_v45, %v1340_v46  ;;  %v1268_v57 = vld [vmem:[%s2619_s1 + $0x158] sm:$0xf0]  ;;  %v1674_v59 = vld [vmem:[%s2619_s1 + $0x1d4] sm:$0xf] }
  0x38   :  { %888 = vmatpush.bf16.msrb.mxu0 %v1371_v48  ;;  %v1151_v48 = vor.u32 %v1628_v35, %v1148_v36  ;;  %v1332_v60 = vld [vmem:[%s2619_s1 + $0x1d8] sm:$0xf0]  ;;  %v1624_v0 = vld [vmem:[%s2619_s1 + $0x44] sm:$0xf]  ;;  %v1132_v2 = vld [vmem:[%s2619_s1 + $0x48] sm:$0xf0] }
  0x39   :  { %902 = vmatpush.bf16.msrb.mxu1 %v1435_v50  ;;  %v1279_v50 = vor.u32 %v1660_v41, %v1276_v42  ;;  %v1640_v3 = vld [vmem:[%s2619_s1 + $0xc4] sm:$0xf]  ;;  %v1335_v4 = vor.u32 %v1674_v59, %v1332_v60  ;;  %v1260_v7 = vld [vmem:[%s2619_s1 + $0x148] sm:$0xf0]  ;;  %v1622_v14 = vld [vmem:[%s2619_s1 + $0x34] sm:$0xf] }
  0x3a   :  { %916 = vmatpush.bf16.msrb.mxu2 %v1499_v51  ;;  %v1626_v51 = vld [vmem:[%s2619_s1 + $0x54] sm:$0xf]  ;;  %v1672_v8 = vld [vmem:[%s2619_s1 + $0x1c4] sm:$0xf]  ;;  %v1324_v9 = vld [vmem:[%s2619_s1 + $0x1c8] sm:$0xf0] }
  0x3b   :  { %930 = vmatpush.bf16.msrb.mxu3 %v1563_v55  ;;  %v1204_v55 = vld [vmem:[%s2619_s1 + $0xd8] sm:$0xf0]  ;;  %v1143_v61 = vor.u32 %v1626_v51, %v1140_v52  ;;  %v1638_v16 = vld [vmem:[%s2619_s1 + $0xb4] sm:$0xf]  ;;  %v1327_v18 = vor.u32 %v1672_v8, %v1324_v9  ;;  %v1620_v27 = vld [vmem:[%s2619_s1 + $0x24] sm:$0xf] }
  0x3c   :  { %889 = vmatpush.bf16.msrb.mxu0 %v1363_v63  ;;  %v1207_v62 = vor.u32 %v1642_v53, %v1204_v55  ;;  %v1271_v63 = vor.u32 %v1658_v56, %v1268_v57  ;;  %v1124_v15 = vld [vmem:[%s2619_s1 + $0x38] sm:$0xf0]  ;;  %v1654_v20 = vld [vmem:[%s2619_s1 + $0x134] sm:$0xf]  ;;  %v1180_v31 = vld [vmem:[%s2619_s1 + $0xa8] sm:$0xf0] }
  0x3d   :  { %903 = vmatpush.bf16.msrb.mxu1 %v1427_v5  ;;  %v1196_v5 = vld [vmem:[%s2619_s1 + $0xc8] sm:$0xf0]  ;;  %v1252_v21 = vld [vmem:[%s2619_s1 + $0x138] sm:$0xf0]  ;;  %v1670_v22 = vld [vmem:[%s2619_s1 + $0x1b4] sm:$0xf] }
  0x3e   :  { %917 = vmatpush.bf16.msrb.mxu2 %v1491_v6  ;;  %v1656_v6 = vld [vmem:[%s2619_s1 + $0x144] sm:$0xf]  ;;  %v1199_v12 = vor.u32 %v1640_v3, %v1196_v5  ;;  %v1255_v26 = vor.u32 %v1654_v20, %v1252_v21  ;;  %v1308_v35 = vld [vmem:[%s2619_s1 + $0x1a8] sm:$0xf0]  ;;  %v1618_v40 = vld [vmem:[%s2619_s1 + $0x14] sm:$0xf] }
  0x3f   :  { %931 = vmatpush.bf16.msrb.mxu3 %v1555_v11  ;;  %v1135_v11 = vor.u32 %v1624_v0, %v1132_v2  ;;  %v1263_v13 = vor.u32 %v1656_v6, %v1260_v7  ;;  %v1652_v32 = vld [vmem:[%s2619_s1 + $0x124] sm:$0xf]  ;;  %v1108_v41 = vld [vmem:[%s2619_s1 + $0x18] sm:$0xf0]  ;;  %v1634_v42 = vld [vmem:[%s2619_s1 + $0x94] sm:$0xf] }
  0x40   :  { %890 = vmatpush.bf16.msrb.mxu0 %v1355_v19  ;;  %v1188_v19 = vld [vmem:[%s2619_s1 + $0xb8] sm:$0xf0]  ;;  %v1111_v52 = vor.u32 %v1618_v40, %v1108_v41  ;;  %v1616_v53 = vld [vmem:[%s2619_s1 + $0x4] sm:$0xf]  ;;  %v1164_v59 = vld [vmem:[%s2619_s1 + $0x88] sm:$0xf0] }
  0x41   :  { %904 = vmatpush.bf16.msrb.mxu1 %v1419_v23  ;;  %v1316_v23 = vld [vmem:[%s2619_s1 + $0x1b8] sm:$0xf0]  ;;  %v1191_v25 = vor.u32 %v1638_v16, %v1188_v19  ;;  %v1632_v57 = vld [vmem:[%s2619_s1 + $0x84] sm:$0xf]  ;;  %v1292_v0 = vld [vmem:[%s2619_s1 + $0x188] sm:$0xf0] }
  0x42   :  { %918 = vmatpush.bf16.msrb.mxu2 %v1483_v24  ;;  %v1127_v24 = vor.u32 %v1622_v14, %v1124_v15  ;;  %v1319_v30 = vor.u32 %v1670_v22, %v1316_v23  ;;  %v1172_v46 = vld [vmem:[%s2619_s1 + $0x98] sm:$0xf0]  ;;  %v1648_v60 = vld [vmem:[%s2619_s1 + $0x104] sm:$0xf]  ;;  %v1694_v2 = vld [vmem:[%s2619_s1 + $0x274] sm:$0xf]  ;;  %v1167_v9 = vor.u32 %v1632_v57, %v1164_v59 }
  0x43   :  { %932 = vmatpush.bf16.msrb.mxu3 %v1547_v28  ;;  %891 = vmatmul.bf16.vlgmr.msrb.gmra.mxu0 %v2236_v39  ;;  %v1116_v28 = vld [vmem:[%s2619_s1 + $0x28] sm:$0xf0]  ;;  %v1300_v51 = vld [vmem:[%s2619_s1 + $0x198] sm:$0xf0]  ;;  %v1175_v55 = vor.u32 %v1634_v42, %v1172_v46  ;;  %v1726_v7 = vld [vmem:[%s2619_s1 + $0x374] sm:$0xf] }
  0x44   :  { %939 = vmatpush.bf16.msra.mxu0 %v1159_v29  ;;  %905 = vmatmul.bf16.vlgmr.msrb.gmra.mxu1 %v2249_v44  ;;  %v1636_v29 = vld [vmem:[%s2619_s1 + $0xa4] sm:$0xf]  ;;  %v1119_v36 = vor.u32 %v1620_v27, %v1116_v28  ;;  %v1412_v3 = vld [vmem:[%s2619_s1 + $0x278] sm:$0xf0]  ;;  %v1404_v20 = vld [vmem:[%s2619_s1 + $0x268] sm:$0xf0] }
  0x45   :  { %953 = vmatpush.bf16.msra.mxu1 %v1223_v33  ;;  %919 = vmatmul.bf16.vlgmr.msrb.gmra.mxu2 %v2247_v43  ;;  %v1244_v33 = vld [vmem:[%s2619_s1 + $0x128] sm:$0xf0]  ;;  %v1183_v37 = vor.u32 %v1636_v29, %v1180_v31  ;;  %v1476_v6 = vld [vmem:[%s2619_s1 + $0x2f8] sm:$0xf0]  ;;  %v1415_v15 = vor.u32 %v1694_v2, %v1412_v3  ;;  %v1692_v19 = vld [vmem:[%s2619_s1 + $0x264] sm:$0xf] }
  0x46   :  { %967 = vmatpush.bf16.msra.mxu2 %v1287_v34  ;;  %933 = vmatmul.bf16.vlgmr.msrb.gmra.mxu3 %v2257_v47  ;;  %v1668_v34 = vld [vmem:[%s2619_s1 + $0x1a4] sm:$0xf]  ;;  %v1540_v8 = vld [vmem:[%s2619_s1 + $0x378] sm:$0xf0]  ;;  %v1468_v23 = vld [vmem:[%s2619_s1 + $0x2e8] sm:$0xf0]  ;;  %v1407_v28 = vor.u32 %v1692_v19, %v1404_v20 }
  0x47   :  { %981 = vmatpush.bf16.msra.mxu3 %v1351_v38  ;;  %v1247_v38 = vor.u32 %v1652_v32, %v1244_v33  ;;  %v1311_v45 = vor.u32 %v1668_v34, %v1308_v35  ;;  %v1708_v21 = vld [vmem:[%s2619_s1 + $0x2e4] sm:$0xf]  ;;  %v1596_v27 = vld [vmem:[%s2619_s1 + $0x3e8] sm:$0xf0]  ;;  %v1690_v31 = vld [vmem:[%s2619_s1 + $0x254] sm:$0xf] }
  0x48   :  { %940 = vmatpush.bf16.msra.mxu0 %v1151_v48  ;;  %v1650_v48 = vld [vmem:[%s2619_s1 + $0x114] sm:$0xf]  ;;  %v1471_v29 = vor.u32 %v1708_v21, %v1468_v23  ;;  %v1396_v32 = vld [vmem:[%s2619_s1 + $0x258] sm:$0xf0] }
  0x49   :  { %954 = vmatpush.bf16.msra.mxu1 %v1215_v49  ;;  %v1236_v49 = vld [vmem:[%s2619_s1 + $0x118] sm:$0xf0]  ;;  %v1706_v33 = vld [vmem:[%s2619_s1 + $0x2d4] sm:$0xf]  ;;  %v1399_v40 = vor.u32 %v1690_v31, %v1396_v32  ;;  %v1680_v31 = vld [vmem:[%s2619_s1 + $0x204] sm:$0xf] }
  0x4a   :  { %968 = vmatpush.bf16.msra.mxu2 %v1279_v50  ;;  %v1666_v50 = vld [vmem:[%s2619_s1 + $0x194] sm:$0xf]  ;;  %v1239_v56 = vor.u32 %v1650_v48, %v1236_v49  ;;  %v1460_v35 = vld [vmem:[%s2619_s1 + $0x2d8] sm:$0xf0]  ;;  %v1720_v48 = vld [vmem:[%s2619_s1 + $0x344] sm:$0xf] }
  0x4b   :  { %982 = vmatpush.bf16.msra.mxu3 %v1343_v54  ;;  %v1100_v54 = vld [vmem:[%s2619_s1 + $0x8] sm:$0xf0]  ;;  %v1463_v41 = vor.u32 %v1706_v33, %v1460_v35  ;;  %v1702_v57 = vld [vmem:[%s2619_s1 + $0x2b4] sm:$0xf]  ;;  %v1364_v20 = vld [vmem:[%s2619_s1 + $0x218] sm:$0xf0] }
  0x4c   :  { %941 = vmatpush.bf16.msra.mxu0 %v1143_v61  ;;  %v1303_v61 = vor.u32 %v1666_v50, %v1300_v51  ;;  %v1103_v5 = vor.u32 %v1616_v53, %v1100_v54  ;;  %v1516_v49 = vld [vmem:[%s2619_s1 + $0x348] sm:$0xf0]  ;;  %v1736_v50 = vld [vmem:[%s2619_s1 + $0x3c4] sm:$0xf]  ;;  %v1682_v19 = vld [vmem:[%s2619_s1 + $0x214] sm:$0xf] }
  0x4d   :  { %955 = vmatpush.bf16.msra.mxu1 %v1207_v62  ;;  %v1228_v62 = vld [vmem:[%s2619_s1 + $0x108] sm:$0xf0]  ;;  %v1519_v54 = vor.u32 %v1720_v48, %v1516_v49  ;;  %v1698_v21 = vld [vmem:[%s2619_s1 + $0x294] sm:$0xf]  ;;  %v1428_v23 = vld [vmem:[%s2619_s1 + $0x298] sm:$0xf0] }
  0x4e   :  { %969 = vmatpush.bf16.msra.mxu2 %v1271_v63  ;;  %v1664_v63 = vld [vmem:[%s2619_s1 + $0x184] sm:$0xf]  ;;  %v1580_v51 = vld [vmem:[%s2619_s1 + $0x3c8] sm:$0xf0] }
  0x4f   :  { %983 = vmatpush.bf16.msra.mxu3 %v1335_v4  ;;  %v1710_v4 = vld [vmem:[%s2619_s1 + $0x2f4] sm:$0xf]  ;;  %v1295_v14 = vor.u32 %v1664_v63, %v1292_v0  ;;  %v1583_v59 = vor.u32 %v1736_v50, %v1580_v51  ;;  %v1572_v0 = vld [vmem:[%s2619_s1 + $0x3b8] sm:$0xf0]  ;;  %v1356_v32 = vld [vmem:[%s2619_s1 + $0x208] sm:$0xf0] }
  0x50   :  { %942 = vmatpush.bf16.msra.mxu0 %v1135_v11  ;;  %v1231_v11 = vor.u32 %v1648_v60, %v1228_v62  ;;  %v1479_v16 = vor.u32 %v1710_v4, %v1476_v6  ;;  %v1444_v60 = vld [vmem:[%s2619_s1 + $0x2b8] sm:$0xf0]  ;;  %v1734_v63 = vld [vmem:[%s2619_s1 + $0x3b4] sm:$0xf]  ;;  %v1372_v6 = vld [vmem:[%s2619_s1 + $0x228] sm:$0xf0] }
  0x51   :  { %956 = vmatpush.bf16.msra.mxu1 %v1199_v12  ;;  %v1742_v12 = vld [vmem:[%s2619_s1 + $0x3f4] sm:$0xf]  ;;  %v1508_v62 = vld [vmem:[%s2619_s1 + $0x338] sm:$0xf0]  ;;  %v1447_v3 = vor.u32 %v1702_v57, %v1444_v60  ;;  %v1696_v33 = vld [vmem:[%s2619_s1 + $0x284] sm:$0xf] }
  0x52   :  { %970 = vmatpush.bf16.msra.mxu2 %v1263_v13  ;;  %v1604_v13 = vld [vmem:[%s2619_s1 + $0x3f8] sm:$0xf0]  ;;  %v1420_v35 = vld [vmem:[%s2619_s1 + $0x288] sm:$0xf0] }
  0x53   :  { %984 = vmatpush.bf16.msra.mxu3 %v1327_v18  ;;  %v1543_v18 = vor.u32 %v1726_v7, %v1540_v8  ;;  %v1607_v22 = vor.u32 %v1742_v12, %v1604_v13  ;;  %v1700_v7 = vld [vmem:[%s2619_s1 + $0x2a4] sm:$0xf]  ;;  %v1575_v8 = vor.u32 %v1734_v63, %v1572_v0  ;;  %v1500_v12 = vld [vmem:[%s2619_s1 + $0x328] sm:$0xf0] }
  0x54   :  { %943 = vmatpush.bf16.msra.mxu0 %v1127_v24  ;;  %v1724_v24 = vld [vmem:[%s2619_s1 + $0x364] sm:$0xf] }
  0x55   :  { %957 = vmatpush.bf16.msra.mxu1 %v1191_v25  ;;  %v1532_v25 = vld [vmem:[%s2619_s1 + $0x368] sm:$0xf0]  ;;  %v1732_v13 = vld [vmem:[%s2619_s1 + $0x3a4] sm:$0xf] }
  0x56   :  { %971 = vmatpush.bf16.msra.mxu2 %v1255_v26  ;;  %v1740_v26 = vld [vmem:[%s2619_s1 + $0x3e4] sm:$0xf] }
  0x57   :  { %985 = vmatpush.bf16.msra.mxu3 %v1319_v30  ;;  %v1535_v30 = vor.u32 %v1724_v24, %v1532_v25  ;;  %v1599_v34 = vor.u32 %v1740_v26, %v1596_v27  ;;  %v1714_v24 = vld [vmem:[%s2619_s1 + $0x314] sm:$0xf]  ;;  %v1492_v25 = vld [vmem:[%s2619_s1 + $0x318] sm:$0xf0] }
  0x58   :  { %944 = vmatpush.bf16.msra.mxu0 %v1119_v36  ;;  %v1722_v36 = vld [vmem:[%s2619_s1 + $0x354] sm:$0xf]  ;;  %v1556_v27 = vld [vmem:[%s2619_s1 + $0x398] sm:$0xf0] }
  0x59   :  { %958 = vmatpush.bf16.msra.mxu1 %v1183_v37  ;;  %v1524_v37 = vld [vmem:[%s2619_s1 + $0x358] sm:$0xf0]  ;;  %v1730_v26 = vld [vmem:[%s2619_s1 + $0x394] sm:$0xf] }
  0x5a   :  { %972 = vmatpush.bf16.msra.mxu2 %v1247_v38  ;;  %v1738_v38 = vld [vmem:[%s2619_s1 + $0x3d4] sm:$0xf]  ;;  %v1527_v42 = vor.u32 %v1722_v36, %v1524_v37  ;;  %v1712_v36 = vld [vmem:[%s2619_s1 + $0x304] sm:$0xf]  ;;  %v1484_v37 = vld [vmem:[%s2619_s1 + $0x308] sm:$0xf0] }
  0x5b   :  { %986 = vmatpush.bf16.msra.mxu3 %v1311_v45  ;;  %v1388_v45 = vld [vmem:[%s2619_s1 + $0x248] sm:$0xf0] }
  0x5c   :  { %945 = vmatpush.bf16.msra.mxu0 %v1111_v52 }
  0x5d   :  { %959 = vmatpush.bf16.msra.mxu1 %v1175_v55  ;;  %v1686_v55 = vld [vmem:[%s2619_s1 + $0x234] sm:$0xf] }
  0x5e   :  { %973 = vmatpush.bf16.msra.mxu2 %v1239_v56  ;;  %v1380_v56 = vld [vmem:[%s2619_s1 + $0x238] sm:$0xf0] }
  0x5f   :  { %987 = vmatpush.bf16.msra.mxu3 %v1303_v61  ;;  %v1718_v61 = vld [vmem:[%s2619_s1 + $0x334] sm:$0xf]  ;;  %v1383_v2 = vor.u32 %v1686_v55, %v1380_v56 }
  0x60   :  { %946 = vmatpush.bf16.msra.mxu0 %v1103_v5  ;;  %v1511_v4 = vor.u32 %v1718_v61, %v1508_v62  ;;  %v1684_v5 = vld [vmem:[%s2619_s1 + $0x224] sm:$0xf] }
  0x61   :  { %960 = vmatpush.bf16.msra.mxu1 %v1167_v9  ;;  %v1436_v9 = vld [vmem:[%s2619_s1 + $0x2a8] sm:$0xf0] }
  0x62   :  { %974 = vmatpush.bf16.msra.mxu2 %v1231_v11  ;;  %v1716_v11 = vld [vmem:[%s2619_s1 + $0x324] sm:$0xf] }
  0x63   :  { %988 = vmatpush.bf16.msra.mxu3 %v1295_v14  ;;  %947 = vmatmul.bf16.vlgmr.msra.gmra.mxu0 %v2014_v58  ;;  %v1704_v58 = vld [vmem:[%s2619_s1 + $0x2c4] sm:$0xf]  ;;  %v1564_v14 = vld [vmem:[%s2619_s1 + $0x3a8] sm:$0xf0] }
  0x64   :  { %995 = vmatpush.bf16.msrb.mxu0 %v1415_v15  ;;  %961 = vmatmul.bf16.vlgmr.msra.gmra.mxu1 %v2050_v10  ;;  %v1452_v10 = vld [vmem:[%s2619_s1 + $0x2c8] sm:$0xf0]  ;;  %v1375_v15 = vor.u32 %v1684_v5, %v1372_v6 }
  0x65   :  { %1009 = vmatpush.bf16.msrb.mxu1 %v1479_v16  ;;  %975 = vmatmul.bf16.vlgmr.msra.gmra.mxu2 %v2028_v1  ;;  %v1588_v1 = vld [vmem:[%s2619_s1 + $0x3d8] sm:$0xf0]  ;;  %v1455_v53 = vor.u32 %v1704_v58, %v1452_v10  ;;  %v1439_v16 = vor.u32 %v1700_v7, %v1436_v9 }
  0x66   :  { %1023 = vmatpush.bf16.msrb.mxu2 %v1543_v18  ;;  %989 = vmatmul.bf16.vlgmr.msra.gmra.mxu3 %v2064_v17  ;;  %v1688_v17 = vld [vmem:[%s2619_s1 + $0x244] sm:$0xf]  ;;  %v1591_v46 = vor.u32 %v1738_v38, %v1588_v1  ;;  %v1503_v18 = vor.u32 %v1716_v11, %v1500_v12  ;;  %v1548_v1 = vld [vmem:[%s2619_s1 + $0x388] sm:$0xf0] }
  0x67   :  { %1037 = vmatpush.bf16.msrb.mxu3 %v1607_v22  ;;  %v1391_v52 = vor.u32 %v1688_v17, %v1388_v45  ;;  %v1567_v22 = vor.u32 %v1732_v13, %v1564_v14  ;;  %v1728_v38 = vld [vmem:[%s2619_s1 + $0x384] sm:$0xf] }
  0x68   :  { %996 = vmatpush.bf16.msrb.mxu0 %v1407_v28  ;;  %v1367_v28 = vor.u32 %v1682_v19, %v1364_v20  ;;  %v1551_v17 = vor.u32 %v1728_v38, %v1548_v1 }
  0x69   :  { %1010 = vmatpush.bf16.msrb.mxu1 %v1471_v29  ;;  %v1431_v29 = vor.u32 %v1698_v21, %v1428_v23 }
  0x6a   :  { %1024 = vmatpush.bf16.msrb.mxu2 %v1535_v30  ;;  %v1495_v30 = vor.u32 %v1714_v24, %v1492_v25 }
  0x6b   :  { %1038 = vmatpush.bf16.msrb.mxu3 %v1599_v34  ;;  %v1559_v34 = vor.u32 %v1730_v26, %v1556_v27 }
  0x6c   :  { %997 = vmatpush.bf16.msrb.mxu0 %v1399_v40  ;;  %v1359_v40 = vor.u32 %v1680_v31, %v1356_v32 }
  0x6d   :  { %1011 = vmatpush.bf16.msrb.mxu1 %v1463_v41  ;;  %v1423_v41 = vor.u32 %v1696_v33, %v1420_v35 }
  0x6e   :  { %1025 = vmatpush.bf16.msrb.mxu2 %v1527_v42  ;;  %v1487_v42 = vor.u32 %v1712_v36, %v1484_v37 }
  0x6f   :  { %1039 = vmatpush.bf16.msrb.mxu3 %v1591_v46 }
  0x70   :  { %998 = vmatpush.bf16.msrb.mxu0 %v1391_v52 }
  0x71   :  { %1012 = vmatpush.bf16.msrb.mxu1 %v1455_v53 }
  0x72   :  { %1026 = vmatpush.bf16.msrb.mxu2 %v1519_v54 }
  0x73   :  { %1040 = vmatpush.bf16.msrb.mxu3 %v1583_v59 }
  0x74   :  { %999 = vmatpush.bf16.msrb.mxu0 %v1383_v2 }
  0x75   :  { %1013 = vmatpush.bf16.msrb.mxu1 %v1447_v3 }
  0x76   :  { %1027 = vmatpush.bf16.msrb.mxu2 %v1511_v4 }
  0x77   :  { %1041 = vmatpush.bf16.msrb.mxu3 %v1575_v8 }
  0x78   :  { %1000 = vmatpush.bf16.msrb.mxu0 %v1375_v15 }
  0x79   :  { %1014 = vmatpush.bf16.msrb.mxu1 %v1439_v16 }
  0x7a   :  { %1028 = vmatpush.bf16.msrb.mxu2 %v1503_v18 }
  0x7b   :  { %1042 = vmatpush.bf16.msrb.mxu3 %v1567_v22 }
  0x7c   :  { %1001 = vmatpush.bf16.msrb.mxu0 %v1367_v28 }
  0x7d   :  { %1015 = vmatpush.bf16.msrb.mxu1 %v1431_v29 }
  0x7e   :  { %1029 = vmatpush.bf16.msrb.mxu2 %v1495_v30 }
  0x7f   :  { %1043 = vmatpush.bf16.msrb.mxu3 %v1559_v34 }
  0x80   :  { %1002 = vmatpush.bf16.msrb.mxu0 %v1359_v40 }
  0x81   :  { %1016 = vmatpush.bf16.msrb.mxu1 %v1423_v41 }
  0x82   :  { %1030 = vmatpush.bf16.msrb.mxu2 %v1487_v42 }
  0x83   :  { %1044 = vmatpush.bf16.msrb.mxu3 %v1551_v17  ;;  %1003 = vmatmul.bf16.vlgmr.msrb.gmra.mxu0 %v2236_v39 }
  0x84   :  { %1017 = vmatmul.bf16.vlgmr.msrb.gmra.mxu1 %v2249_v44 }
  0x85   :  { %1031 = vmatmul.bf16.vlgmr.msrb.gmra.mxu2 %v2247_v43 }
  0x86   :  { %1045 = vmatmul.bf16.vlgmr.msrb.gmra.mxu3 %v2257_v47 }
  0xa0   :  { %v836_v45 = vpop.f32.mrf.mxu0 }
  0xa1   :  { %v850_v58 = vpop.f32.mrf.mxu1 }
  0xa2   :  { %v851_v48 = vadd.f32 %v850_v58, %v836_v45 }
  0xa8   :  { %v864_v46 = vpop.f32.mrf.mxu2  ;;  %v838_v49 = vpop.f32.mrf.mxu0 }
  0xa9   :  { %v878_v10 = vpop.f32.mrf.mxu3  ;;  %v852_v50 = vpop.f32.mrf.mxu1  ;;  %v865_v51 = vadd.f32 %v864_v46, %v851_v48 }
  0xaa   :  { %v853_v55 = vadd.f32 %v852_v50, %v838_v49 }
  0xab   :  { %v879_v52 = vadd.f32 %v878_v10, %v865_v51 }
  0xb0   :  { %v866_v53 = vpop.f32.mrf.mxu2 }
  0xb1   :  { %v880_v54 = vpop.f32.mrf.mxu3  ;;  %v867_v44 = vadd.f32 %v866_v53, %v853_v55 }
  0xb3   :  { %v881_v60 = vadd.f32 %v880_v54, %v867_v44 }
  0xc0   :  { %v892_v56 = vpop.f32.mrf.mxu0 }
  0xc1   :  { %v893_v39 = vadd.f32 %v892_v56, %v879_v52  ;;  %v906_v57 = vpop.f32.mrf.mxu1 }
  0xc3   :  { %v907_v59 = vadd.f32 %v906_v57, %v893_v39 }
  0xc8   :  { %v920_v43 = vpop.f32.mrf.mxu2  ;;  %v894_v61 = vpop.f32.mrf.mxu0 }
  0xc9   :  { %v921_v47 = vadd.f32 %v920_v43, %v907_v59  ;;  %v934_v62 = vpop.f32.mrf.mxu3  ;;  %v895_v63 = vadd.f32 %v894_v61, %v881_v60  ;;  %v908_v2 = vpop.f32.mrf.mxu1 }
  0xcb   :  { %v935_v0 = vadd.f32 %v934_v62, %v921_v47  ;;  %v909_v4 = vadd.f32 %v908_v2, %v895_v63 }
  0xcd   :  { %v1051_v3 = vmax.f32 %v935_v0, 0.0 }
  0xcf   :  { %1055 = vst [vmem:[%s2621_s2] sm:$0xff] %v1051_v3 }
  0xd0   :  { %v922_v5 = vpop.f32.mrf.mxu2 }
  0xd1   :  { %v923_v6 = vadd.f32 %v922_v5, %v909_v4  ;;  %v936_v7 = vpop.f32.mrf.mxu3 }
  0xd3   :  { %v937_v8 = vadd.f32 %v936_v7, %v923_v6 }
  0xd5   :  { %v1053_v9 = vmax.f32 %v937_v8, 0.0 }
  0xd7   :  { %1058 = vst [vmem:[%s2621_s2 + $0x10] sm:$0xff] %v1053_v9 }
  0xe0   :  { %v948_v11 = vpop.f32.mrf.mxu0 }
  0xe1   :  { %v962_v12 = vpop.f32.mrf.mxu1 }
  0xe2   :  { %v963_v15 = vadd.f32 %v962_v12, %v948_v11 }
  0xe8   :  { %v976_v13 = vpop.f32.mrf.mxu2  ;;  %v950_v16 = vpop.f32.mrf.mxu0 }
  0xe9   :  { %v990_v14 = vpop.f32.mrf.mxu3  ;;  %v964_v18 = vpop.f32.mrf.mxu1  ;;  %v977_v19 = vadd.f32 %v976_v13, %v963_v15 }
  0xea   :  { %v965_v22 = vadd.f32 %v964_v18, %v950_v16 }
  0xeb   :  { %v991_v21 = vadd.f32 %v990_v14, %v977_v19 }
  0xf0   :  { %v978_v20 = vpop.f32.mrf.mxu2 }
  0xf1   :  { %v992_v23 = vpop.f32.mrf.mxu3  ;;  %v979_v27 = vadd.f32 %v978_v20, %v965_v22 }
  0xf3   :  { %v993_v30 = vadd.f32 %v992_v23, %v979_v27 }
 0x100   :  { %v1004_v24 = vpop.f32.mrf.mxu0 }
 0x101   :  { %v1005_v25 = vadd.f32 %v1004_v24, %v991_v21  ;;  %v1018_v26 = vpop.f32.mrf.mxu1 }
 0x103   :  { %v1019_v28 = vadd.f32 %v1018_v26, %v1005_v25 }
 0x108   :  { %v1032_v29 = vpop.f32.mrf.mxu2  ;;  %v1006_v33 = vpop.f32.mrf.mxu0 }
 0x109   :  { %v1033_v31 = vadd.f32 %v1032_v29, %v1019_v28  ;;  %v1046_v32 = vpop.f32.mrf.mxu3  ;;  %v1007_v35 = vadd.f32 %v1006_v33, %v993_v30  ;;  %v1020_v37 = vpop.f32.mrf.mxu1 }
 0x10b   :  { %v1047_v34 = vadd.f32 %v1046_v32, %v1033_v31  ;;  %v1021_v38 = vadd.f32 %v1020_v37, %v1007_v35 }
 0x10d   :  { %v1052_v36 = vmax.f32 %v1047_v34, 0.0 }
 0x10f   :  { %1057 = vst.msk [vmem:[%s2621_s2 + $0x8] sm:$0xff] %vm1056_vm0, %v1052_v36 }
 0x110   :  { %v1034_v1 = vpop.f32.mrf.mxu2 }
 0x111   :  { %v1035_v40 = vadd.f32 %v1034_v1, %v1021_v38  ;;  %v1048_v41 = vpop.f32.mrf.mxu3 }
 0x113   :  { %v1049_v42 = vadd.f32 %v1048_v41, %v1035_v40 }
 0x115   :  { %v1054_v17 = vmax.f32 %v1049_v42, 0.0 }
 0x117   :  { %1059 = vst.msk [vmem:[%s2621_s2 + $0x18] sm:$0xff] %vm1056_vm0, %v1054_v17 }

// kernel: forward.8
= control target key start
LH: loop header
LB: loop body
LE: loop exit
PB: predicated region body
PF: predicated region fallthrough
CT: control target
= control target key end

     0   :  { %vm435_vm0 = vcmask 523264   ;;  %s838_s1 = inlined_call_operand.vmem [shape: bf16[640,64], index: 1, kind: input, shape index: {}]   ;;  %s839_s0 = inlined_call_operand.vmem [shape: bf16[16,640], index: 0, kind: input, shape index: {}]   ;;  %s840_s2 = inlined_call_operand.vmem [shape: f32[16,64], index: 2, kind: output, shape index: {}]  }
   0x1   :  { %v634_v0 = vld [vmem:[%s838_s1 + $0x38] sm:$0xff]  ;;  %v633_v4 = vld [vmem:[%s838_s1 + $0x30] sm:$0xff]  ;;  %v632_v8 = vld [vmem:[%s838_s1 + $0x28] sm:$0xff] }
   0x2   :  { %v650_v1 = vld [vmem:[%s838_s1 + $0xb8] sm:$0xff]  ;;  %363 = vmatpush.bf16.msra.mxu0 %v634_v0  ;;  %v649_v5 = vld [vmem:[%s838_s1 + $0xb0] sm:$0xff]  ;;  %v648_v9 = vld [vmem:[%s838_s1 + $0xa8] sm:$0xff] }
   0x3   :  { %v658_v2 = vld [vmem:[%s838_s1 + $0xf8] sm:$0xff]  ;;  %391 = vmatpush.bf16.msra.mxu2 %v650_v1  ;;  %v657_v6 = vld [vmem:[%s838_s1 + $0xf0] sm:$0xff]  ;;  %v656_v10 = vld [vmem:[%s838_s1 + $0xe8] sm:$0xff] }
   0x4   :  { %v642_v3 = vld [vmem:[%s838_s1 + $0x78] sm:$0xff]  ;;  %405 = vmatpush.bf16.msra.mxu3 %v658_v2  ;;  %v641_v7 = vld [vmem:[%s838_s1 + $0x70] sm:$0xff]  ;;  %v640_v11 = vld [vmem:[%s838_s1 + $0x68] sm:$0xff] }
   0x5   :  { %377 = vmatpush.bf16.msra.mxu1 %v642_v3  ;;  %v631_v12 = vld [vmem:[%s838_s1 + $0x20] sm:$0xff]  ;;  %v630_v16 = vld [vmem:[%s838_s1 + $0x18] sm:$0xff]  ;;  %v629_v20 = vld [vmem:[%s838_s1 + $0x10] sm:$0xff] }
   0x6   :  { %364 = vmatpush.bf16.msra.mxu0 %v633_v4  ;;  %v647_v13 = vld [vmem:[%s838_s1 + $0xa0] sm:$0xff]  ;;  %v646_v17 = vld [vmem:[%s838_s1 + $0x98] sm:$0xff]  ;;  %v645_v21 = vld [vmem:[%s838_s1 + $0x90] sm:$0xff] }
   0x7   :  { %392 = vmatpush.bf16.msra.mxu2 %v649_v5  ;;  %v655_v14 = vld [vmem:[%s838_s1 + $0xe0] sm:$0xff]  ;;  %v654_v18 = vld [vmem:[%s838_s1 + $0xd8] sm:$0xff]  ;;  %v653_v22 = vld [vmem:[%s838_s1 + $0xd0] sm:$0xff] }
   0x8   :  { %406 = vmatpush.bf16.msra.mxu3 %v657_v6  ;;  %v639_v15 = vld [vmem:[%s838_s1 + $0x60] sm:$0xff]  ;;  %v638_v19 = vld [vmem:[%s838_s1 + $0x58] sm:$0xff]  ;;  %v637_v23 = vld [vmem:[%s838_s1 + $0x50] sm:$0xff] }
   0x9   :  { %378 = vmatpush.bf16.msra.mxu1 %v641_v7  ;;  %v628_v24 = vld [vmem:[%s838_s1 + $0x8] sm:$0xff]  ;;  %v627_v28 = vld [vmem:[%s838_s1] sm:$0xff]  ;;  %v666_v30 = vld [vmem:[%s838_s1 + $0x138] sm:$0xff] }
   0xa   :  { %365 = vmatpush.bf16.msra.mxu0 %v632_v8  ;;  %v644_v25 = vld [vmem:[%s838_s1 + $0x88] sm:$0xff]  ;;  %v643_v29 = vld [vmem:[%s838_s1 + $0x80] sm:$0xff]  ;;  %v625_v32 = vld [vmem:[%s839_s0 + $0x18] sm:$0xf0] }
   0xb   :  { %393 = vmatpush.bf16.msra.mxu2 %v648_v9  ;;  %v652_v26 = vld [vmem:[%s838_s1 + $0xc8] sm:$0xff]  ;;  %v444_v33 = vld [vmem:[%s839_s0] sm:$0xf]  ;;  %v624_v34 = vld [vmem:[%s839_s0 + $0x10] sm:$0xf0] }
   0xc   :  { %407 = vmatpush.bf16.msra.mxu3 %v656_v10  ;;  %v636_v27 = vld [vmem:[%s838_s1 + $0x48] sm:$0xff]  ;;  %v651_v35 = vld [vmem:[%s838_s1 + $0xc0] sm:$0xff]  ;;  %v446_v40 = vld [vmem:[%s839_s0 + $0x14] sm:$0xf0]  ;;  %v445_v42 = vor.u32 %v624_v34, %v444_v33 }
   0xd   :  { %379 = vmatpush.bf16.msra.mxu1 %v640_v11  ;;  %v452_v31 = vld [vmem:[%s839_s0 + $0x8] sm:$0xf]  ;;  %v623_v36 = vld [vmem:[%s839_s0 + $0xc] sm:$0xf]  ;;  %v454_v37 = vld [vmem:[%s839_s0 + $0x1c] sm:$0xf0] }
   0xe   :  { %366 = vmatpush.bf16.msra.mxu0 %v631_v12  ;;  %v635_v38 = vld [vmem:[%s838_s1 + $0x40] sm:$0xff]  ;;  %v453_v41 = vor.u32 %v625_v32, %v452_v31  ;;  %v457_v43 = vor.u32 %v623_v36, %v454_v37  ;;  %v665_v44 = vld [vmem:[%s838_s1 + $0x130] sm:$0xff]  ;;  %v664_v46 = vld [vmem:[%s838_s1 + $0x128] sm:$0xff] }
   0xf   :  { %394 = vmatpush.bf16.msra.mxu2 %v647_v13  ;;  %v622_v39 = vld [vmem:[%s839_s0 + $0x4] sm:$0xf]  ;;  %v662_v48 = vld [vmem:[%s838_s1 + $0x118] sm:$0xff]  ;;  %v661_v49 = vld [vmem:[%s838_s1 + $0x110] sm:$0xff] }
  0x10   :  { %408 = vmatpush.bf16.msra.mxu3 %v655_v14  ;;  %v449_v45 = vor.u32 %v622_v39, %v446_v40  ;;  %v663_v47 = vld [vmem:[%s838_s1 + $0x120] sm:$0xff]  ;;  %v660_v50 = vld [vmem:[%s838_s1 + $0x108] sm:$0xff]  ;;  %v460_v52 = vld [vmem:[%s839_s0 + $0x10] sm:$0xf] }
  0x11   :  { %380 = vmatpush.bf16.msra.mxu1 %v639_v15  ;;  %v659_v51 = vld [vmem:[%s838_s1 + $0x100] sm:$0xff] }
  0x12   :  { %367 = vmatpush.bf16.msra.mxu0 %v630_v16  ;;  %v626_v53 = vld [vmem:[%s839_s0 + $0x20] sm:$0xf0] }
  0x13   :  { %395 = vmatpush.bf16.msra.mxu2 %v646_v17  ;;  %v461_v54 = vor.u32 %v626_v53, %v460_v52 }
  0x14   :  { %409 = vmatpush.bf16.msra.mxu3 %v654_v18 }
  0x15   :  { %381 = vmatpush.bf16.msra.mxu1 %v638_v19 }
  0x16   :  { %368 = vmatpush.bf16.msra.mxu0 %v629_v20 }
  0x17   :  { %396 = vmatpush.bf16.msra.mxu2 %v645_v21 }
  0x18   :  { %410 = vmatpush.bf16.msra.mxu3 %v653_v22 }
  0x19   :  { %382 = vmatpush.bf16.msra.mxu1 %v637_v23 }
  0x1a   :  { %369 = vmatpush.bf16.msra.mxu0 %v628_v24 }
  0x1b   :  { %397 = vmatpush.bf16.msra.mxu2 %v644_v25 }
  0x1c   :  { %411 = vmatpush.bf16.msra.mxu3 %v652_v26 }
  0x1d   :  { %383 = vmatpush.bf16.msra.mxu1 %v636_v27 }
  0x1e   :  { %370 = vmatpush.bf16.msra.mxu0 %v627_v28 }
  0x1f   :  { %398 = vmatpush.bf16.msra.mxu2 %v643_v29 }
  0x20   :  { %412 = vmatpush.bf16.msra.mxu3 %v651_v35 }
  0x21   :  { %384 = vmatpush.bf16.msra.mxu1 %v635_v38  ;;  %371 = vmatmul.bf16.vlgmr.msra.gmra.mxu0 %v445_v42 }
  0x22   :  { %419 = vmatpush.bf16.msrb.mxu0 %v666_v30  ;;  %399 = vmatmul.bf16.vlgmr.msra.gmra.mxu2 %v453_v41 }
  0x23   :  { %413 = vmatmul.bf16.vlgmr.msra.gmra.mxu3 %v457_v43 }
  0x24   :  { %385 = vmatmul.bf16.vlgmr.msra.gmra.mxu1 %v449_v45 }
  0x26   :  { %420 = vmatpush.bf16.msrb.mxu0 %v665_v44 }
  0x2a   :  { %421 = vmatpush.bf16.msrb.mxu0 %v664_v46 }
  0x2e   :  { %422 = vmatpush.bf16.msrb.mxu0 %v663_v47 }
  0x32   :  { %423 = vmatpush.bf16.msrb.mxu0 %v662_v48 }
  0x36   :  { %424 = vmatpush.bf16.msrb.mxu0 %v661_v49 }
  0x3a   :  { %425 = vmatpush.bf16.msrb.mxu0 %v660_v50 }
  0x3e   :  { %426 = vmatpush.bf16.msrb.mxu0 %v659_v51 }
  0x41   :  { %427 = vmatmul.bf16.vlgmr.msrb.gmra.mxu0 %v461_v54 }
  0x9e   :  { %v372_v55 = vpop.f32.mrf.mxu0 }
  0xa1   :  { %v386_v56 = vpop.f32.mrf.mxu1 }
  0xa2   :  { %v387_v58 = vadd.f32 %v386_v56, %v372_v55 }
  0xa5   :  { %v400_v57 = vpop.f32.mrf.mxu2 }
  0xa6   :  { %v374_v59 = vpop.f32.mrf.mxu0  ;;  %v414_v60 = vpop.f32.mrf.mxu3  ;;  %v401_v61 = vadd.f32 %v400_v57, %v387_v58 }
  0xa8   :  { %v415_v63 = vadd.f32 %v414_v60, %v401_v61 }
  0xa9   :  { %v388_v62 = vpop.f32.mrf.mxu1 }
  0xaa   :  { %v389_v0 = vadd.f32 %v388_v62, %v374_v59 }
  0xad   :  { %v402_v1 = vpop.f32.mrf.mxu2 }
  0xae   :  { %v403_v4 = vadd.f32 %v402_v1, %v389_v0  ;;  %v416_v6 = vpop.f32.mrf.mxu3 }
  0xb0   :  { %v417_v7 = vadd.f32 %v416_v6, %v403_v4 }
  0xbe   :  { %v428_v2 = vpop.f32.mrf.mxu0 }
  0xbf   :  { %v429_v3 = vadd.f32 %v428_v2, %v415_v63 }
  0xc1   :  { %v433_v5 = vmax.f32 %v429_v3, 0.0 }
  0xc3   :  { %436 = vst.msk [vmem:[%s840_s2] sm:$0xff] %vm435_vm0, %v433_v5 }
  0xc6   :  { %v430_v8 = vpop.f32.mrf.mxu0 }
  0xc7   :  { %v431_v9 = vadd.f32 %v430_v8, %v417_v7 }
  0xc9   :  { %v434_v10 = vmax.f32 %v431_v9, 0.0 }
  0xcb   :  { %437 = vst.msk [vmem:[%s840_s2 + $0x8] sm:$0xff] %vm435_vm0, %v434_v10 }

// kernel: forward.9
= control target key start
LH: loop header
LB: loop body
LE: loop exit
PB: predicated region body
PF: predicated region fallthrough
CT: control target
= control target key end

     0   :  { %vm2927_vm0 = vcmask 12288   ;;  %s5318_s1 = inlined_call_operand.vmem [shape: bf16[4608,2], index: 1, kind: input, shape index: {}]   ;;  %s5319_s0 = inlined_call_operand.vmem [shape: bf16[5,4608], index: 0, kind: input, shape index: {}]   ;;  %s5320_s2 = inlined_call_operand.vmem [shape: f32[5,2], index: 2, kind: output, shape index: {}]  }
   0x1   :  { %v4092_v0 = vld [vmem:[%s5318_s1 + $0x38] sm:$0xff]  ;;  %v4091_v4 = vld [vmem:[%s5318_s1 + $0x30] sm:$0xff]  ;;  %v4090_v8 = vld [vmem:[%s5318_s1 + $0x28] sm:$0xff] }
   0x2   :  { %v4100_v1 = vld [vmem:[%s5318_s1 + $0x78] sm:$0xff]  ;;  %2459 = vmatpush.bf16.msra.mxu0 %v4092_v0  ;;  %v4099_v5 = vld [vmem:[%s5318_s1 + $0x70] sm:$0xff]  ;;  %v4098_v9 = vld [vmem:[%s5318_s1 + $0x68] sm:$0xff] }
   0x3   :  { %v4108_v2 = vld [vmem:[%s5318_s1 + $0xb8] sm:$0xff]  ;;  %2472 = vmatpush.bf16.msra.mxu1 %v4100_v1  ;;  %v4107_v6 = vld [vmem:[%s5318_s1 + $0xb0] sm:$0xff]  ;;  %v4106_v10 = vld [vmem:[%s5318_s1 + $0xa8] sm:$0xff] }
   0x4   :  { %v4116_v3 = vld [vmem:[%s5318_s1 + $0xf8] sm:$0xff]  ;;  %2485 = vmatpush.bf16.msra.mxu2 %v4108_v2  ;;  %v4115_v7 = vld [vmem:[%s5318_s1 + $0xf0] sm:$0xff]  ;;  %v4114_v11 = vld [vmem:[%s5318_s1 + $0xe8] sm:$0xff] }
   0x5   :  { %2498 = vmatpush.bf16.msra.mxu3 %v4116_v3  ;;  %v4089_v12 = vld [vmem:[%s5318_s1 + $0x20] sm:$0xff]  ;;  %v4088_v16 = vld [vmem:[%s5318_s1 + $0x18] sm:$0xff]  ;;  %v4087_v20 = vld [vmem:[%s5318_s1 + $0x10] sm:$0xff] }
   0x6   :  { %2460 = vmatpush.bf16.msra.mxu0 %v4091_v4  ;;  %v4097_v13 = vld [vmem:[%s5318_s1 + $0x60] sm:$0xff]  ;;  %v4096_v17 = vld [vmem:[%s5318_s1 + $0x58] sm:$0xff]  ;;  %v4095_v21 = vld [vmem:[%s5318_s1 + $0x50] sm:$0xff] }
   0x7   :  { %2473 = vmatpush.bf16.msra.mxu1 %v4099_v5  ;;  %v4105_v14 = vld [vmem:[%s5318_s1 + $0xa0] sm:$0xff]  ;;  %v4104_v18 = vld [vmem:[%s5318_s1 + $0x98] sm:$0xff]  ;;  %v4103_v22 = vld [vmem:[%s5318_s1 + $0x90] sm:$0xff] }
   0x8   :  { %2486 = vmatpush.bf16.msra.mxu2 %v4107_v6  ;;  %v4113_v15 = vld [vmem:[%s5318_s1 + $0xe0] sm:$0xff]  ;;  %v4112_v19 = vld [vmem:[%s5318_s1 + $0xd8] sm:$0xff]  ;;  %v4111_v23 = vld [vmem:[%s5318_s1 + $0xd0] sm:$0xff] }
   0x9   :  { %2499 = vmatpush.bf16.msra.mxu3 %v4115_v7  ;;  %v4086_v24 = vld [vmem:[%s5318_s1 + $0x8] sm:$0xff]  ;;  %v11_v29 = vld [vmem:[%s5319_s0] sm:$0x77]  ;;  %v4124_v38 = vld [vmem:[%s5318_s1 + $0x138] sm:$0xff] }
   0xa   :  { %2461 = vmatpush.bf16.msra.mxu0 %v4090_v8  ;;  %v4094_v25 = vld [vmem:[%s5318_s1 + $0x48] sm:$0xff]  ;;  %v4085_v30 = vld [vmem:[%s5318_s1] sm:$0xff]  ;;  %v623_v33 = vunpack.c.l.b16 %v11_v29  ;;  %v624_v37 = vunpack.c.h.b16 %v11_v29  ;;  %v4132_v39 = vld [vmem:[%s5318_s1 + $0x178] sm:$0xff] }
   0xb   :  { %2474 = vmatpush.bf16.msra.mxu1 %v4098_v9  ;;  %v4102_v26 = vld [vmem:[%s5318_s1 + $0x88] sm:$0xff]  ;;  %v4093_v31 = vld [vmem:[%s5318_s1 + $0x40] sm:$0xff]  ;;  %v4140_v40 = vld [vmem:[%s5318_s1 + $0x1b8] sm:$0xff] }
   0xc   :  { %2487 = vmatpush.bf16.msra.mxu2 %v4106_v10  ;;  %v4110_v27 = vld [vmem:[%s5318_s1 + $0xc8] sm:$0xff]  ;;  %v4101_v34 = vld [vmem:[%s5318_s1 + $0x80] sm:$0xff]  ;;  %v4148_v41 = vld [vmem:[%s5318_s1 + $0x1f8] sm:$0xff]  ;;  %v659_v43 = vpack.c.b16 %v623_v33, %v623_v33  ;;  %v660_v45 = vpack.c.b16 %v624_v37, %v624_v37 }
   0xd   :  { %2500 = vmatpush.bf16.msra.mxu3 %v4114_v11  ;;  %v12_v28 = vld [vmem:[%s5319_s0 + $0x8] sm:$0x77]  ;;  %v4109_v35 = vld [vmem:[%s5318_s1 + $0xc0] sm:$0xff]  ;;  %v4123_v46 = vld [vmem:[%s5318_s1 + $0x130] sm:$0xff] }
   0xe   :  { %2462 = vmatpush.bf16.msra.mxu0 %v4089_v12  ;;  %v625_v32 = vunpack.c.l.b16 %v12_v28  ;;  %v626_v36 = vunpack.c.h.b16 %v12_v28  ;;  %v4131_v47 = vld [vmem:[%s5318_s1 + $0x170] sm:$0xff]  ;;  %v4122_v50 = vld [vmem:[%s5318_s1 + $0x128] sm:$0xff]  ;;  %v4121_v54 = vld [vmem:[%s5318_s1 + $0x120] sm:$0xff] }
   0xf   :  { %2475 = vmatpush.bf16.msra.mxu1 %v4097_v13  ;;  %v4139_v48 = vld [vmem:[%s5318_s1 + $0x1b0] sm:$0xff]  ;;  %v4130_v51 = vld [vmem:[%s5318_s1 + $0x168] sm:$0xff]  ;;  %v4129_v55 = vld [vmem:[%s5318_s1 + $0x160] sm:$0xff] }
  0x10   :  { %2488 = vmatpush.bf16.msra.mxu2 %v4105_v14  ;;  %v661_v42 = vpack.c.b16 %v625_v32, %v625_v32  ;;  %v662_v44 = vpack.c.b16 %v626_v36, %v626_v36  ;;  %v4147_v49 = vld [vmem:[%s5318_s1 + $0x1f0] sm:$0xff]  ;;  %v4138_v52 = vld [vmem:[%s5318_s1 + $0x1a8] sm:$0xff]  ;;  %v4137_v56 = vld [vmem:[%s5318_s1 + $0x1a0] sm:$0xff] }
  0x11   :  { %2501 = vmatpush.bf16.msra.mxu3 %v4113_v15  ;;  %v4146_v53 = vld [vmem:[%s5318_s1 + $0x1e8] sm:$0xff]  ;;  %v4145_v57 = vld [vmem:[%s5318_s1 + $0x1e0] sm:$0xff]  ;;  %v4120_v58 = vld [vmem:[%s5318_s1 + $0x118] sm:$0xff] }
  0x12   :  { %2463 = vmatpush.bf16.msra.mxu0 %v4088_v16  ;;  %v4128_v59 = vld [vmem:[%s5318_s1 + $0x158] sm:$0xff]  ;;  %v4119_v62 = vld [vmem:[%s5318_s1 + $0x110] sm:$0xff]  ;;  %v4118_v2 = vld [vmem:[%s5318_s1 + $0x108] sm:$0xff] }
  0x13   :  { %2476 = vmatpush.bf16.msra.mxu1 %v4096_v17  ;;  %v4136_v60 = vld [vmem:[%s5318_s1 + $0x198] sm:$0xff]  ;;  %v4127_v63 = vld [vmem:[%s5318_s1 + $0x150] sm:$0xff]  ;;  %v4126_v3 = vld [vmem:[%s5318_s1 + $0x148] sm:$0xff] }
  0x14   :  { %2489 = vmatpush.bf16.msra.mxu2 %v4104_v18  ;;  %v4144_v61 = vld [vmem:[%s5318_s1 + $0x1d8] sm:$0xff]  ;;  %v4135_v0 = vld [vmem:[%s5318_s1 + $0x190] sm:$0xff]  ;;  %v4134_v4 = vld [vmem:[%s5318_s1 + $0x188] sm:$0xff] }
  0x15   :  { %2502 = vmatpush.bf16.msra.mxu3 %v4112_v19  ;;  %v4143_v1 = vld [vmem:[%s5318_s1 + $0x1d0] sm:$0xff]  ;;  %v4142_v5 = vld [vmem:[%s5318_s1 + $0x1c8] sm:$0xff]  ;;  %v14_v6 = vld [vmem:[%s5319_s0 + $0x18] sm:$0x77] }
  0x16   :  { %2464 = vmatpush.bf16.msra.mxu0 %v4087_v20  ;;  %v13_v7 = vld [vmem:[%s5319_s0 + $0x10] sm:$0x77]  ;;  %v4117_v8 = vld [vmem:[%s5318_s1 + $0x100] sm:$0xff]  ;;  %v629_v10 = vunpack.c.l.b16 %v14_v6  ;;  %v630_v14 = vunpack.c.h.b16 %v14_v6  ;;  %v4156_v16 = vld [vmem:[%s5318_s1 + $0x238] sm:$0xff] }
  0x17   :  { %2477 = vmatpush.bf16.msra.mxu1 %v4095_v21  ;;  %v4125_v9 = vld [vmem:[%s5318_s1 + $0x140] sm:$0xff]  ;;  %v627_v11 = vunpack.c.l.b16 %v13_v7  ;;  %v628_v15 = vunpack.c.h.b16 %v13_v7  ;;  %v4164_v17 = vld [vmem:[%s5318_s1 + $0x278] sm:$0xff]  ;;  %v4154_v28 = vld [vmem:[%s5318_s1 + $0x228] sm:$0xff] }
  0x18   :  { %2490 = vmatpush.bf16.msra.mxu2 %v4103_v22  ;;  %v4133_v12 = vld [vmem:[%s5318_s1 + $0x180] sm:$0xff]  ;;  %v4172_v18 = vld [vmem:[%s5318_s1 + $0x2b8] sm:$0xff]  ;;  %v665_v20 = vpack.c.b16 %v629_v10, %v629_v10  ;;  %v666_v22 = vpack.c.b16 %v630_v14, %v630_v14  ;;  %v4162_v29 = vld [vmem:[%s5318_s1 + $0x268] sm:$0xff] }
  0x19   :  { %2503 = vmatpush.bf16.msra.mxu3 %v4111_v23  ;;  %v4141_v13 = vld [vmem:[%s5318_s1 + $0x1c0] sm:$0xff]  ;;  %v4180_v19 = vld [vmem:[%s5318_s1 + $0x2f8] sm:$0xff]  ;;  %v663_v21 = vpack.c.b16 %v627_v11, %v627_v11  ;;  %v664_v23 = vpack.c.b16 %v628_v15, %v628_v15  ;;  %v4186_v6 = vld [vmem:[%s5318_s1 + $0x328] sm:$0xff] }
  0x1a   :  { %2465 = vmatpush.bf16.msra.mxu0 %v4086_v24  ;;  %v4155_v24 = vld [vmem:[%s5318_s1 + $0x230] sm:$0xff]  ;;  %v4153_v32 = vld [vmem:[%s5318_s1 + $0x220] sm:$0xff]  ;;  %v4152_v36 = vld [vmem:[%s5318_s1 + $0x218] sm:$0xff] }
  0x1b   :  { %2478 = vmatpush.bf16.msra.mxu1 %v4094_v25  ;;  %v4163_v25 = vld [vmem:[%s5318_s1 + $0x270] sm:$0xff]  ;;  %v4161_v33 = vld [vmem:[%s5318_s1 + $0x260] sm:$0xff]  ;;  %v4160_v37 = vld [vmem:[%s5318_s1 + $0x258] sm:$0xff] }
  0x1c   :  { %2491 = vmatpush.bf16.msra.mxu2 %v4102_v26  ;;  %v4171_v26 = vld [vmem:[%s5318_s1 + $0x2b0] sm:$0xff]  ;;  %v4194_v7 = vld [vmem:[%s5318_s1 + $0x368] sm:$0xff]  ;;  %v4185_v10 = vld [vmem:[%s5318_s1 + $0x320] sm:$0xff] }
  0x1d   :  { %2504 = vmatpush.bf16.msra.mxu3 %v4110_v27  ;;  %v4179_v27 = vld [vmem:[%s5318_s1 + $0x2f0] sm:$0xff]  ;;  %v4193_v11 = vld [vmem:[%s5318_s1 + $0x360] sm:$0xff]  ;;  %v4184_v14 = vld [vmem:[%s5318_s1 + $0x318] sm:$0xff] }
  0x1e   :  { %2466 = vmatpush.bf16.msra.mxu0 %v4085_v30  ;;  %v4170_v30 = vld [vmem:[%s5318_s1 + $0x2a8] sm:$0xff]  ;;  %v4192_v15 = vld [vmem:[%s5318_s1 + $0x358] sm:$0xff] }
  0x1f   :  { %2479 = vmatpush.bf16.msra.mxu1 %v4093_v31  ;;  %v4178_v31 = vld [vmem:[%s5318_s1 + $0x2e8] sm:$0xff] }
  0x20   :  { %2492 = vmatpush.bf16.msra.mxu2 %v4101_v34  ;;  %v4169_v34 = vld [vmem:[%s5318_s1 + $0x2a0] sm:$0xff] }
  0x21   :  { %2505 = vmatpush.bf16.msra.mxu3 %v4109_v35  ;;  %2467 = vmatmul.bf16.vlgmr.msra.gmra.mxu0 %v659_v43  ;;  %v4177_v35 = vld [vmem:[%s5318_s1 + $0x2e0] sm:$0xff]  ;;  %v4175_v43 = vld [vmem:[%s5318_s1 + $0x2d0] sm:$0xff] }
  0x22   :  { %2511 = vmatpush.bf16.msrb.mxu0 %v4124_v38  ;;  %2480 = vmatmul.bf16.vlgmr.msra.gmra.mxu1 %v660_v45  ;;  %v4168_v38 = vld [vmem:[%s5318_s1 + $0x298] sm:$0xff]  ;;  %v4158_v45 = vld [vmem:[%s5318_s1 + $0x248] sm:$0xff] }
  0x23   :  { %2524 = vmatpush.bf16.msrb.mxu1 %v4132_v39  ;;  %2493 = vmatmul.bf16.vlgmr.msra.gmra.mxu2 %v661_v42  ;;  %v4176_v39 = vld [vmem:[%s5318_s1 + $0x2d8] sm:$0xff]  ;;  %v4167_v42 = vld [vmem:[%s5318_s1 + $0x290] sm:$0xff] }
  0x24   :  { %2537 = vmatpush.bf16.msrb.mxu2 %v4140_v40  ;;  %2506 = vmatmul.bf16.vlgmr.msra.gmra.mxu3 %v662_v44  ;;  %v4151_v40 = vld [vmem:[%s5318_s1 + $0x210] sm:$0xff]  ;;  %v4150_v44 = vld [vmem:[%s5318_s1 + $0x208] sm:$0xff] }
  0x25   :  { %2550 = vmatpush.bf16.msrb.mxu3 %v4148_v41  ;;  %v4159_v41 = vld [vmem:[%s5318_s1 + $0x250] sm:$0xff] }
  0x26   :  { %2512 = vmatpush.bf16.msrb.mxu0 %v4123_v46  ;;  %v4166_v46 = vld [vmem:[%s5318_s1 + $0x288] sm:$0xff] }
  0x27   :  { %2525 = vmatpush.bf16.msrb.mxu1 %v4131_v47  ;;  %v4174_v47 = vld [vmem:[%s5318_s1 + $0x2c8] sm:$0xff] }
  0x28   :  { %2538 = vmatpush.bf16.msrb.mxu2 %v4139_v48  ;;  %v15_v48 = vld [vmem:[%s5319_s0 + $0x20] sm:$0x77] }
  0x29   :  { %2551 = vmatpush.bf16.msrb.mxu3 %v4147_v49  ;;  %v16_v49 = vld [vmem:[%s5319_s0 + $0x28] sm:$0x77] }
  0x2a   :  { %2513 = vmatpush.bf16.msrb.mxu0 %v4122_v50  ;;  %v4149_v50 = vld [vmem:[%s5318_s1 + $0x200] sm:$0xff] }
  0x2b   :  { %2526 = vmatpush.bf16.msrb.mxu1 %v4130_v51  ;;  %v4157_v51 = vld [vmem:[%s5318_s1 + $0x240] sm:$0xff] }
  0x2c   :  { %2539 = vmatpush.bf16.msrb.mxu2 %v4138_v52  ;;  %v631_v52 = vunpack.c.l.b16 %v15_v48 }
  0x2d   :  { %2552 = vmatpush.bf16.msrb.mxu3 %v4146_v53  ;;  %v633_v53 = vunpack.c.l.b16 %v16_v49 }
  0x2e   :  { %2514 = vmatpush.bf16.msrb.mxu0 %v4121_v54  ;;  %v4165_v54 = vld [vmem:[%s5318_s1 + $0x280] sm:$0xff] }
  0x2f   :  { %2527 = vmatpush.bf16.msrb.mxu1 %v4129_v55  ;;  %v4173_v55 = vld [vmem:[%s5318_s1 + $0x2c0] sm:$0xff] }
  0x30   :  { %2540 = vmatpush.bf16.msrb.mxu2 %v4137_v56  ;;  %v632_v56 = vunpack.c.h.b16 %v15_v48  ;;  %v4218_v48 = vld [vmem:[%s5318_s1 + $0x428] sm:$0xff] }
  0x31   :  { %2553 = vmatpush.bf16.msrb.mxu3 %v4145_v57  ;;  %v634_v57 = vunpack.c.h.b16 %v16_v49  ;;  %v4226_v49 = vld [vmem:[%s5318_s1 + $0x468] sm:$0xff] }
  0x32   :  { %2515 = vmatpush.bf16.msrb.mxu0 %v4120_v58  ;;  %v4188_v58 = vld [vmem:[%s5318_s1 + $0x338] sm:$0xff] }
  0x33   :  { %2528 = vmatpush.bf16.msrb.mxu1 %v4128_v59  ;;  %v4196_v59 = vld [vmem:[%s5318_s1 + $0x378] sm:$0xff] }
  0x34   :  { %2541 = vmatpush.bf16.msrb.mxu2 %v4136_v60  ;;  %v4204_v60 = vld [vmem:[%s5318_s1 + $0x3b8] sm:$0xff] }
  0x35   :  { %2554 = vmatpush.bf16.msrb.mxu3 %v4144_v61  ;;  %v4212_v61 = vld [vmem:[%s5318_s1 + $0x3f8] sm:$0xff] }
  0x36   :  { %2516 = vmatpush.bf16.msrb.mxu0 %v4119_v62  ;;  %v667_v62 = vpack.c.b16 %v631_v52, %v631_v52  ;;  %v4217_v52 = vld [vmem:[%s5318_s1 + $0x420] sm:$0xff] }
  0x37   :  { %2529 = vmatpush.bf16.msrb.mxu1 %v4127_v63  ;;  %v669_v63 = vpack.c.b16 %v633_v53, %v633_v53  ;;  %v4225_v53 = vld [vmem:[%s5318_s1 + $0x460] sm:$0xff] }
  0x38   :  { %2542 = vmatpush.bf16.msrb.mxu2 %v4135_v0  ;;  %v668_v0 = vpack.c.b16 %v632_v56, %v632_v56  ;;  %v4216_v56 = vld [vmem:[%s5318_s1 + $0x418] sm:$0xff] }
  0x39   :  { %2555 = vmatpush.bf16.msrb.mxu3 %v4143_v1  ;;  %v670_v1 = vpack.c.b16 %v634_v57, %v634_v57  ;;  %v4224_v57 = vld [vmem:[%s5318_s1 + $0x458] sm:$0xff] }
  0x3a   :  { %2517 = vmatpush.bf16.msrb.mxu0 %v4118_v2  ;;  %v4187_v2 = vld [vmem:[%s5318_s1 + $0x330] sm:$0xff] }
  0x3b   :  { %2530 = vmatpush.bf16.msrb.mxu1 %v4126_v3  ;;  %v4195_v3 = vld [vmem:[%s5318_s1 + $0x370] sm:$0xff] }
  0x3c   :  { %2543 = vmatpush.bf16.msrb.mxu2 %v4134_v4  ;;  %v4203_v4 = vld [vmem:[%s5318_s1 + $0x3b0] sm:$0xff] }
  0x3d   :  { %2556 = vmatpush.bf16.msrb.mxu3 %v4142_v5  ;;  %v4211_v5 = vld [vmem:[%s5318_s1 + $0x3f0] sm:$0xff] }
  0x3e   :  { %2518 = vmatpush.bf16.msrb.mxu0 %v4117_v8  ;;  %v4202_v8 = vld [vmem:[%s5318_s1 + $0x3a8] sm:$0xff] }
  0x3f   :  { %2531 = vmatpush.bf16.msrb.mxu1 %v4125_v9  ;;  %v4210_v9 = vld [vmem:[%s5318_s1 + $0x3e8] sm:$0xff] }
  0x40   :  { %2544 = vmatpush.bf16.msrb.mxu2 %v4133_v12  ;;  %v4201_v12 = vld [vmem:[%s5318_s1 + $0x3a0] sm:$0xff] }
  0x41   :  { %2557 = vmatpush.bf16.msrb.mxu3 %v4141_v13  ;;  %2519 = vmatmul.bf16.vlgmr.msrb.gmra.mxu0 %v663_v21  ;;  %v4209_v13 = vld [vmem:[%s5318_s1 + $0x3e0] sm:$0xff]  ;;  %v4207_v21 = vld [vmem:[%s5318_s1 + $0x3d0] sm:$0xff] }
  0x42   :  { %2563 = vmatpush.bf16.msra.mxu0 %v4156_v16  ;;  %2532 = vmatmul.bf16.vlgmr.msrb.gmra.mxu1 %v664_v23  ;;  %v4200_v16 = vld [vmem:[%s5318_s1 + $0x398] sm:$0xff]  ;;  %v4190_v23 = vld [vmem:[%s5318_s1 + $0x348] sm:$0xff] }
  0x43   :  { %2576 = vmatpush.bf16.msra.mxu1 %v4164_v17  ;;  %2545 = vmatmul.bf16.vlgmr.msrb.gmra.mxu2 %v665_v20  ;;  %v4208_v17 = vld [vmem:[%s5318_s1 + $0x3d8] sm:$0xff]  ;;  %v4199_v20 = vld [vmem:[%s5318_s1 + $0x390] sm:$0xff] }
  0x44   :  { %2589 = vmatpush.bf16.msra.mxu2 %v4172_v18  ;;  %2558 = vmatmul.bf16.vlgmr.msrb.gmra.mxu3 %v666_v22  ;;  %v4183_v18 = vld [vmem:[%s5318_s1 + $0x310] sm:$0xff]  ;;  %v4182_v22 = vld [vmem:[%s5318_s1 + $0x308] sm:$0xff] }
  0x45   :  { %2602 = vmatpush.bf16.msra.mxu3 %v4180_v19  ;;  %v4191_v19 = vld [vmem:[%s5318_s1 + $0x350] sm:$0xff] }
  0x46   :  { %2564 = vmatpush.bf16.msra.mxu0 %v4155_v24  ;;  %v4198_v24 = vld [vmem:[%s5318_s1 + $0x388] sm:$0xff] }
  0x47   :  { %2577 = vmatpush.bf16.msra.mxu1 %v4163_v25  ;;  %v4206_v25 = vld [vmem:[%s5318_s1 + $0x3c8] sm:$0xff] }
  0x48   :  { %2590 = vmatpush.bf16.msra.mxu2 %v4171_v26  ;;  %v17_v26 = vld [vmem:[%s5319_s0 + $0x30] sm:$0x77] }
  0x49   :  { %2603 = vmatpush.bf16.msra.mxu3 %v4179_v27  ;;  %v18_v27 = vld [vmem:[%s5319_s0 + $0x38] sm:$0x77] }
  0x4a   :  { %2565 = vmatpush.bf16.msra.mxu0 %v4154_v28  ;;  %v4181_v28 = vld [vmem:[%s5318_s1 + $0x300] sm:$0xff] }
  0x4b   :  { %2578 = vmatpush.bf16.msra.mxu1 %v4162_v29  ;;  %v4189_v29 = vld [vmem:[%s5318_s1 + $0x340] sm:$0xff] }
  0x4c   :  { %2591 = vmatpush.bf16.msra.mxu2 %v4170_v30  ;;  %v635_v30 = vunpack.c.l.b16 %v17_v26 }
  0x4d   :  { %2604 = vmatpush.bf16.msra.mxu3 %v4178_v31  ;;  %v637_v31 = vunpack.c.l.b16 %v18_v27 }
  0x4e   :  { %2566 = vmatpush.bf16.msra.mxu0 %v4153_v32  ;;  %v4197_v32 = vld [vmem:[%s5318_s1 + $0x380] sm:$0xff] }
  0x4f   :  { %2579 = vmatpush.bf16.msra.mxu1 %v4161_v33  ;;  %v4205_v33 = vld [vmem:[%s5318_s1 + $0x3c0] sm:$0xff] }
  0x50   :  { %2592 = vmatpush.bf16.msra.mxu2 %v4169_v34  ;;  %v636_v34 = vunpack.c.h.b16 %v17_v26  ;;  %v4250_v26 = vld [vmem:[%s5318_s1 + $0x528] sm:$0xff] }
  0x51   :  { %2605 = vmatpush.bf16.msra.mxu3 %v4177_v35  ;;  %v638_v35 = vunpack.c.h.b16 %v18_v27  ;;  %v4258_v27 = vld [vmem:[%s5318_s1 + $0x568] sm:$0xff] }
  0x52   :  { %2567 = vmatpush.bf16.msra.mxu0 %v4152_v36  ;;  %v4220_v36 = vld [vmem:[%s5318_s1 + $0x438] sm:$0xff] }
  0x53   :  { %2580 = vmatpush.bf16.msra.mxu1 %v4160_v37  ;;  %v4228_v37 = vld [vmem:[%s5318_s1 + $0x478] sm:$0xff] }
  0x54   :  { %2593 = vmatpush.bf16.msra.mxu2 %v4168_v38  ;;  %v4236_v38 = vld [vmem:[%s5318_s1 + $0x4b8] sm:$0xff] }
  0x55   :  { %2606 = vmatpush.bf16.msra.mxu3 %v4176_v39  ;;  %v4244_v39 = vld [vmem:[%s5318_s1 + $0x4f8] sm:$0xff] }
  0x56   :  { %2568 = vmatpush.bf16.msra.mxu0 %v4151_v40  ;;  %v671_v40 = vpack.c.b16 %v635_v30, %v635_v30 }
  0x57   :  { %2581 = vmatpush.bf16.msra.mxu1 %v4159_v41  ;;  %v673_v41 = vpack.c.b16 %v637_v31, %v637_v31  ;;  %v4249_v31 = vld [vmem:[%s5318_s1 + $0x520] sm:$0xff] }
  0x58   :  { %2594 = vmatpush.bf16.msra.mxu2 %v4167_v42  ;;  %v672_v42 = vpack.c.b16 %v636_v34, %v636_v34  ;;  %v4265_v34 = vld [vmem:[%s5318_s1 + $0x5a0] sm:$0xff] }
  0x59   :  { %2607 = vmatpush.bf16.msra.mxu3 %v4175_v43  ;;  %v674_v43 = vpack.c.b16 %v638_v35, %v638_v35  ;;  %v4273_v35 = vld [vmem:[%s5318_s1 + $0x5e0] sm:$0xff] }
  0x5a   :  { %2569 = vmatpush.bf16.msra.mxu0 %v4150_v44  ;;  %v4219_v44 = vld [vmem:[%s5318_s1 + $0x430] sm:$0xff] }
  0x5b   :  { %2582 = vmatpush.bf16.msra.mxu1 %v4158_v45  ;;  %v4227_v45 = vld [vmem:[%s5318_s1 + $0x470] sm:$0xff] }
  0x5c   :  { %2595 = vmatpush.bf16.msra.mxu2 %v4166_v46  ;;  %v4235_v46 = vld [vmem:[%s5318_s1 + $0x4b0] sm:$0xff] }
  0x5d   :  { %2608 = vmatpush.bf16.msra.mxu3 %v4174_v47  ;;  %v4243_v47 = vld [vmem:[%s5318_s1 + $0x4f0] sm:$0xff] }
  0x5e   :  { %2570 = vmatpush.bf16.msra.mxu0 %v4149_v50  ;;  %v4234_v50 = vld [vmem:[%s5318_s1 + $0x4a8] sm:$0xff] }
  0x5f   :  { %2583 = vmatpush.bf16.msra.mxu1 %v4157_v51  ;;  %v4242_v51 = vld [vmem:[%s5318_s1 + $0x4e8] sm:$0xff] }
  0x60   :  { %2596 = vmatpush.bf16.msra.mxu2 %v4165_v54  ;;  %v4233_v54 = vld [vmem:[%s5318_s1 + $0x4a0] sm:$0xff] }
  0x61   :  { %2609 = vmatpush.bf16.msra.mxu3 %v4173_v55  ;;  %2571 = vmatmul.bf16.vlgmr.msra.gmra.mxu0 %v667_v62  ;;  %v4241_v55 = vld [vmem:[%s5318_s1 + $0x4e0] sm:$0xff]  ;;  %v4231_v62 = vld [vmem:[%s5318_s1 + $0x490] sm:$0xff] }
  0x62   :  { %2615 = vmatpush.bf16.msrb.mxu0 %v4188_v58  ;;  %2584 = vmatmul.bf16.vlgmr.msra.gmra.mxu1 %v668_v0  ;;  %v4232_v58 = vld [vmem:[%s5318_s1 + $0x498] sm:$0xff]  ;;  %v4214_v0 = vld [vmem:[%s5318_s1 + $0x408] sm:$0xff] }
  0x63   :  { %2628 = vmatpush.bf16.msrb.mxu1 %v4196_v59  ;;  %2597 = vmatmul.bf16.vlgmr.msra.gmra.mxu2 %v669_v63  ;;  %v4240_v59 = vld [vmem:[%s5318_s1 + $0x4d8] sm:$0xff]  ;;  %v4239_v63 = vld [vmem:[%s5318_s1 + $0x4d0] sm:$0xff] }
  0x64   :  { %2641 = vmatpush.bf16.msrb.mxu2 %v4204_v60  ;;  %2610 = vmatmul.bf16.vlgmr.msra.gmra.mxu3 %v670_v1  ;;  %v4215_v60 = vld [vmem:[%s5318_s1 + $0x410] sm:$0xff]  ;;  %v4222_v1 = vld [vmem:[%s5318_s1 + $0x448] sm:$0xff] }
  0x65   :  { %2654 = vmatpush.bf16.msrb.mxu3 %v4212_v61  ;;  %v4223_v61 = vld [vmem:[%s5318_s1 + $0x450] sm:$0xff] }
  0x66   :  { %2616 = vmatpush.bf16.msrb.mxu0 %v4187_v2  ;;  %v4230_v2 = vld [vmem:[%s5318_s1 + $0x488] sm:$0xff] }
  0x67   :  { %2629 = vmatpush.bf16.msrb.mxu1 %v4195_v3  ;;  %v4238_v3 = vld [vmem:[%s5318_s1 + $0x4c8] sm:$0xff] }
  0x68   :  { %2642 = vmatpush.bf16.msrb.mxu2 %v4203_v4  ;;  %v19_v4 = vld [vmem:[%s5319_s0 + $0x40] sm:$0x77] }
  0x69   :  { %2655 = vmatpush.bf16.msrb.mxu3 %v4211_v5  ;;  %v20_v5 = vld [vmem:[%s5319_s0 + $0x48] sm:$0x77] }
  0x6a   :  { %2617 = vmatpush.bf16.msrb.mxu0 %v4186_v6  ;;  %v4213_v6 = vld [vmem:[%s5318_s1 + $0x400] sm:$0xff] }
  0x6b   :  { %2630 = vmatpush.bf16.msrb.mxu1 %v4194_v7  ;;  %v4221_v7 = vld [vmem:[%s5318_s1 + $0x440] sm:$0xff] }
  0x6c   :  { %2643 = vmatpush.bf16.msrb.mxu2 %v4202_v8  ;;  %v639_v8 = vunpack.c.l.b16 %v19_v4 }
  0x6d   :  { %2656 = vmatpush.bf16.msrb.mxu3 %v4210_v9  ;;  %v641_v9 = vunpack.c.l.b16 %v20_v5 }
  0x6e   :  { %2618 = vmatpush.bf16.msrb.mxu0 %v4185_v10  ;;  %v4229_v10 = vld [vmem:[%s5318_s1 + $0x480] sm:$0xff] }
  0x6f   :  { %2631 = vmatpush.bf16.msrb.mxu1 %v4193_v11  ;;  %v4237_v11 = vld [vmem:[%s5318_s1 + $0x4c0] sm:$0xff] }
  0x70   :  { %2644 = vmatpush.bf16.msrb.mxu2 %v4201_v12  ;;  %v640_v12 = vunpack.c.h.b16 %v19_v4  ;;  %v4292_v4 = vld [vmem:[%s5318_s1 + $0x678] sm:$0xff] }
  0x71   :  { %2657 = vmatpush.bf16.msrb.mxu3 %v4209_v13  ;;  %v642_v13 = vunpack.c.h.b16 %v20_v5  ;;  %v4300_v5 = vld [vmem:[%s5318_s1 + $0x6b8] sm:$0xff] }
  0x72   :  { %2619 = vmatpush.bf16.msrb.mxu0 %v4184_v14  ;;  %v4252_v14 = vld [vmem:[%s5318_s1 + $0x538] sm:$0xff] }
  0x73   :  { %2632 = vmatpush.bf16.msrb.mxu1 %v4192_v15  ;;  %v4260_v15 = vld [vmem:[%s5318_s1 + $0x578] sm:$0xff] }
  0x74   :  { %2645 = vmatpush.bf16.msrb.mxu2 %v4200_v16  ;;  %v4268_v16 = vld [vmem:[%s5318_s1 + $0x5b8] sm:$0xff] }
  0x75   :  { %2658 = vmatpush.bf16.msrb.mxu3 %v4208_v17  ;;  %v4276_v17 = vld [vmem:[%s5318_s1 + $0x5f8] sm:$0xff] }
  0x76   :  { %2620 = vmatpush.bf16.msrb.mxu0 %v4183_v18  ;;  %v675_v18 = vpack.c.b16 %v639_v8, %v639_v8 }
  0x77   :  { %2633 = vmatpush.bf16.msrb.mxu1 %v4191_v19  ;;  %v677_v19 = vpack.c.b16 %v641_v9, %v641_v9 }
  0x78   :  { %2646 = vmatpush.bf16.msrb.mxu2 %v4199_v20  ;;  %v676_v20 = vpack.c.b16 %v640_v12, %v640_v12  ;;  %v4291_v12 = vld [vmem:[%s5318_s1 + $0x670] sm:$0xff] }
  0x79   :  { %2659 = vmatpush.bf16.msrb.mxu3 %v4207_v21  ;;  %v678_v21 = vpack.c.b16 %v642_v13, %v642_v13  ;;  %v4299_v13 = vld [vmem:[%s5318_s1 + $0x6b0] sm:$0xff] }
  0x7a   :  { %2621 = vmatpush.bf16.msrb.mxu0 %v4182_v22  ;;  %v4251_v22 = vld [vmem:[%s5318_s1 + $0x530] sm:$0xff] }
  0x7b   :  { %2634 = vmatpush.bf16.msrb.mxu1 %v4190_v23  ;;  %v4259_v23 = vld [vmem:[%s5318_s1 + $0x570] sm:$0xff] }
  0x7c   :  { %2647 = vmatpush.bf16.msrb.mxu2 %v4198_v24  ;;  %v4267_v24 = vld [vmem:[%s5318_s1 + $0x5b0] sm:$0xff] }
  0x7d   :  { %2660 = vmatpush.bf16.msrb.mxu3 %v4206_v25  ;;  %v4275_v25 = vld [vmem:[%s5318_s1 + $0x5f0] sm:$0xff] }
  0x7e   :  { %2622 = vmatpush.bf16.msrb.mxu0 %v4181_v28  ;;  %v4266_v28 = vld [vmem:[%s5318_s1 + $0x5a8] sm:$0xff] }
  0x7f   :  { %2635 = vmatpush.bf16.msrb.mxu1 %v4189_v29  ;;  %v4274_v29 = vld [vmem:[%s5318_s1 + $0x5e8] sm:$0xff] }
  0x80   :  { %2648 = vmatpush.bf16.msrb.mxu2 %v4197_v32  ;;  %v4257_v32 = vld [vmem:[%s5318_s1 + $0x560] sm:$0xff] }
  0x81   :  { %2661 = vmatpush.bf16.msrb.mxu3 %v4205_v33  ;;  %2623 = vmatmul.bf16.vlgmr.msrb.gmra.mxu0 %v671_v40  ;;  %v4272_v40 = vld [vmem:[%s5318_s1 + $0x5d8] sm:$0xff] }
  0x82   :  { %2667 = vmatpush.bf16.msra.mxu0 %v4220_v36  ;;  %2636 = vmatmul.bf16.vlgmr.msrb.gmra.mxu1 %v672_v42 }
  0x83   :  { %2680 = vmatpush.bf16.msra.mxu1 %v4228_v37  ;;  %2649 = vmatmul.bf16.vlgmr.msrb.gmra.mxu2 %v673_v41  ;;  %v4248_v37 = vld [vmem:[%s5318_s1 + $0x518] sm:$0xff] }
  0x84   :  { %2693 = vmatpush.bf16.msra.mxu2 %v4236_v38  ;;  %2662 = vmatmul.bf16.vlgmr.msrb.gmra.mxu3 %v674_v43  ;;  %v4256_v38 = vld [vmem:[%s5318_s1 + $0x558] sm:$0xff] }
  0x85   :  { %2706 = vmatpush.bf16.msra.mxu3 %v4244_v39  ;;  %v4264_v39 = vld [vmem:[%s5318_s1 + $0x598] sm:$0xff] }
  0x86   :  { %2668 = vmatpush.bf16.msra.mxu0 %v4219_v44 }
  0x87   :  { %2681 = vmatpush.bf16.msra.mxu1 %v4227_v45  ;;  %v4247_v45 = vld [vmem:[%s5318_s1 + $0x510] sm:$0xff] }
  0x88   :  { %2694 = vmatpush.bf16.msra.mxu2 %v4235_v46  ;;  %v4255_v46 = vld [vmem:[%s5318_s1 + $0x550] sm:$0xff] }
  0x89   :  { %2707 = vmatpush.bf16.msra.mxu3 %v4243_v47 }
  0x8a   :  { %2669 = vmatpush.bf16.msra.mxu0 %v4218_v48 }
  0x8b   :  { %2682 = vmatpush.bf16.msra.mxu1 %v4226_v49  ;;  %v4263_v49 = vld [vmem:[%s5318_s1 + $0x590] sm:$0xff] }
  0x8c   :  { %2695 = vmatpush.bf16.msra.mxu2 %v4234_v50  ;;  %v4271_v50 = vld [vmem:[%s5318_s1 + $0x5d0] sm:$0xff] }
  0x8d   :  { %2708 = vmatpush.bf16.msra.mxu3 %v4242_v51  ;;  %v4246_v51 = vld [vmem:[%s5318_s1 + $0x508] sm:$0xff] }
  0x8e   :  { %2670 = vmatpush.bf16.msra.mxu0 %v4217_v52  ;;  %v4254_v52 = vld [vmem:[%s5318_s1 + $0x548] sm:$0xff] }
  0x8f   :  { %2683 = vmatpush.bf16.msra.mxu1 %v4225_v53  ;;  %v4262_v53 = vld [vmem:[%s5318_s1 + $0x588] sm:$0xff] }
  0x90   :  { %2696 = vmatpush.bf16.msra.mxu2 %v4233_v54  ;;  %v4270_v54 = vld [vmem:[%s5318_s1 + $0x5c8] sm:$0xff] }
  0x91   :  { %2709 = vmatpush.bf16.msra.mxu3 %v4241_v55  ;;  %v21_v55 = vld [vmem:[%s5319_s0 + $0x50] sm:$0x77] }
  0x92   :  { %2671 = vmatpush.bf16.msra.mxu0 %v4216_v56  ;;  %v22_v56 = vld [vmem:[%s5319_s0 + $0x58] sm:$0x77] }
  0x93   :  { %2684 = vmatpush.bf16.msra.mxu1 %v4224_v57 }
  0x94   :  { %2697 = vmatpush.bf16.msra.mxu2 %v4232_v58 }
  0x95   :  { %2710 = vmatpush.bf16.msra.mxu3 %v4240_v59  ;;  %v4245_v59 = vld [vmem:[%s5318_s1 + $0x500] sm:$0xff] }
  0x96   :  { %2672 = vmatpush.bf16.msra.mxu0 %v4215_v60  ;;  %v4253_v60 = vld [vmem:[%s5318_s1 + $0x540] sm:$0xff] }
  0x97   :  { %2685 = vmatpush.bf16.msra.mxu1 %v4223_v61  ;;  %v643_v61 = vunpack.c.l.b16 %v21_v55 }
  0x98   :  { %2698 = vmatpush.bf16.msra.mxu2 %v4231_v62  ;;  %v645_v62 = vunpack.c.l.b16 %v22_v56 }
  0x99   :  { %2711 = vmatpush.bf16.msra.mxu3 %v4239_v63  ;;  %v4261_v63 = vld [vmem:[%s5318_s1 + $0x580] sm:$0xff] }
  0x9a   :  { %2673 = vmatpush.bf16.msra.mxu0 %v4214_v0  ;;  %v4269_v0 = vld [vmem:[%s5318_s1 + $0x5c0] sm:$0xff]  ;;  %v681_v8 = vpack.c.b16 %v645_v62, %v645_v62 }
  0x9b   :  { %2686 = vmatpush.bf16.msra.mxu1 %v4222_v1  ;;  %v644_v1 = vunpack.c.h.b16 %v21_v55 }
  0x9c   :  { %2699 = vmatpush.bf16.msra.mxu2 %v4230_v2  ;;  %v646_v2 = vunpack.c.h.b16 %v22_v56 }
  0x9d   :  { %2712 = vmatpush.bf16.msra.mxu3 %v4238_v3  ;;  %v4284_v3 = vld [vmem:[%s5318_s1 + $0x638] sm:$0xff]  ;;  %v680_v9 = vpack.c.b16 %v644_v1, %v644_v1  ;;  %v4315_v1 = vld [vmem:[%s5318_s1 + $0x730] sm:$0xff] }
  0x9e   :  { %2674 = vmatpush.bf16.msra.mxu0 %v4213_v6  ;;  %v2468_v30 = vpop.f32.mrf.mxu0  ;;  %v4308_v6 = vld [vmem:[%s5318_s1 + $0x6f8] sm:$0xff] }
  0x9f   :  { %2687 = vmatpush.bf16.msra.mxu1 %v4221_v7  ;;  %v2481_v33 = vpop.f32.mrf.mxu1  ;;  %v679_v7 = vpack.c.b16 %v643_v61, %v643_v61 }
  0xa0   :  { %2700 = vmatpush.bf16.msra.mxu2 %v4229_v10  ;;  %v2482_v36 = vadd.f32 %v2481_v33, %v2468_v30  ;;  %v682_v10 = vpack.c.b16 %v646_v2, %v646_v2  ;;  %v4304_v30 = vld [vmem:[%s5318_s1 + $0x6d8] sm:$0xff]  ;;  %v4323_v2 = vld [vmem:[%s5318_s1 + $0x770] sm:$0xff] }
  0xa1   :  { %2713 = vmatpush.bf16.msra.mxu3 %v4237_v11  ;;  %2675 = vmatmul.bf16.vlgmr.msra.gmra.mxu0 %v675_v18  ;;  %v4283_v11 = vld [vmem:[%s5318_s1 + $0x630] sm:$0xff]  ;;  %v4306_v18 = vld [vmem:[%s5318_s1 + $0x6e8] sm:$0xff] }
  0xa2   :  { %2719 = vmatpush.bf16.msrb.mxu0 %v4252_v14  ;;  %2688 = vmatmul.bf16.vlgmr.msra.gmra.mxu1 %v676_v20  ;;  %v4307_v14 = vld [vmem:[%s5318_s1 + $0x6f0] sm:$0xff]  ;;  %v4281_v20 = vld [vmem:[%s5318_s1 + $0x620] sm:$0xff] }
  0xa3   :  { %2732 = vmatpush.bf16.msrb.mxu1 %v4260_v15  ;;  %2701 = vmatmul.bf16.vlgmr.msra.gmra.mxu2 %v677_v19  ;;  %v4282_v15 = vld [vmem:[%s5318_s1 + $0x628] sm:$0xff] }
  0xa4   :  { %2745 = vmatpush.bf16.msrb.mxu2 %v4268_v16  ;;  %2714 = vmatmul.bf16.vlgmr.msra.gmra.mxu3 %v678_v21  ;;  %v4290_v16 = vld [vmem:[%s5318_s1 + $0x668] sm:$0xff]  ;;  %v4289_v21 = vld [vmem:[%s5318_s1 + $0x660] sm:$0xff] }
  0xa5   :  { %2758 = vmatpush.bf16.msrb.mxu3 %v4276_v17  ;;  %v4298_v17 = vld [vmem:[%s5318_s1 + $0x6a8] sm:$0xff] }
  0xa6   :  { %2720 = vmatpush.bf16.msrb.mxu0 %v4251_v22  ;;  %v2494_v41 = vpop.f32.mrf.mxu2  ;;  %v2470_v44 = vpop.f32.mrf.mxu0 }
  0xa7   :  { %2733 = vmatpush.bf16.msrb.mxu1 %v4259_v23  ;;  %v2495_v42 = vadd.f32 %v2494_v41, %v2482_v36  ;;  %v2507_v43 = vpop.f32.mrf.mxu3  ;;  %v2483_v48 = vpop.f32.mrf.mxu1  ;;  %v4287_v36 = vld [vmem:[%s5318_s1 + $0x650] sm:$0xff]  ;;  %v4278_v41 = vld [vmem:[%s5318_s1 + $0x608] sm:$0xff] }
  0xa8   :  { %2746 = vmatpush.bf16.msrb.mxu2 %v4267_v24  ;;  %v4297_v24 = vld [vmem:[%s5318_s1 + $0x6a0] sm:$0xff]  ;;  %v4302_v44 = vld [vmem:[%s5318_s1 + $0x6c8] sm:$0xff] }
  0xa9   :  { %2759 = vmatpush.bf16.msrb.mxu3 %v4275_v25  ;;  %v4964_v47 = vadd.f32 %v2507_v43, %v2495_v42  ;;  %v4305_v25 = vld [vmem:[%s5318_s1 + $0x6e0] sm:$0xff]  ;;  %v4286_v42 = vld [vmem:[%s5318_s1 + $0x648] sm:$0xff] }
  0xaa   :  { %2721 = vmatpush.bf16.msrb.mxu0 %v4250_v26  ;;  %v4294_v43 = vld [vmem:[%s5318_s1 + $0x688] sm:$0xff] }
  0xab   :  { %2734 = vmatpush.bf16.msrb.mxu1 %v4258_v27  ;;  %v4280_v27 = vld [vmem:[%s5318_s1 + $0x618] sm:$0xff] }
  0xac   :  { %2747 = vmatpush.bf16.msrb.mxu2 %v4266_v28  ;;  %v4288_v28 = vld [vmem:[%s5318_s1 + $0x658] sm:$0xff] }
  0xad   :  { %2760 = vmatpush.bf16.msrb.mxu3 %v4274_v29  ;;  %v4296_v29 = vld [vmem:[%s5318_s1 + $0x698] sm:$0xff] }
  0xae   :  { %2722 = vmatpush.bf16.msrb.mxu0 %v4249_v31  ;;  %v2496_v57 = vpop.f32.mrf.mxu2 }
  0xaf   :  { %2735 = vmatpush.bf16.msrb.mxu1 %v4257_v32  ;;  %v2509_v58 = vpop.f32.mrf.mxu3  ;;  %v4316_v57 = vld [vmem:[%s5318_s1 + $0x738] sm:$0xff] }
  0xb0   :  { %2748 = vmatpush.bf16.msrb.mxu2 %v4265_v34  ;;  %v4324_v58 = vld [vmem:[%s5318_s1 + $0x778] sm:$0xff] }
  0xb1   :  { %2761 = vmatpush.bf16.msrb.mxu3 %v4273_v35  ;;  %v4279_v35 = vld [vmem:[%s5318_s1 + $0x610] sm:$0xff] }
  0xb2   :  { %2723 = vmatpush.bf16.msrb.mxu0 %v4248_v37 }
  0xb3   :  { %2736 = vmatpush.bf16.msrb.mxu1 %v4256_v38 }
  0xb4   :  { %2749 = vmatpush.bf16.msrb.mxu2 %v4264_v39  ;;  %v4295_v39 = vld [vmem:[%s5318_s1 + $0x690] sm:$0xff] }
  0xb5   :  { %2762 = vmatpush.bf16.msrb.mxu3 %v4272_v40  ;;  %v4303_v40 = vld [vmem:[%s5318_s1 + $0x6d0] sm:$0xff] }
  0xb6   :  { %2724 = vmatpush.bf16.msrb.mxu0 %v4247_v45  ;;  %v23_v45 = vld [vmem:[%s5319_s0 + $0x60] sm:$0x77] }
  0xb7   :  { %2737 = vmatpush.bf16.msrb.mxu1 %v4255_v46  ;;  %v24_v46 = vld [vmem:[%s5319_s0 + $0x68] sm:$0x77]  ;;  %v648_v55 = vunpack.c.h.b16 %v23_v45 }
  0xb8   :  { %2750 = vmatpush.bf16.msrb.mxu2 %v4263_v49  ;;  %v4277_v49 = vld [vmem:[%s5318_s1 + $0x600] sm:$0xff]  ;;  %v650_v56 = vunpack.c.h.b16 %v24_v46 }
  0xb9   :  { %2763 = vmatpush.bf16.msrb.mxu3 %v4271_v50  ;;  %v4285_v50 = vld [vmem:[%s5318_s1 + $0x640] sm:$0xff] }
  0xba   :  { %2725 = vmatpush.bf16.msrb.mxu0 %v4246_v51  ;;  %v647_v51 = vunpack.c.l.b16 %v23_v45 }
  0xbb   :  { %2738 = vmatpush.bf16.msrb.mxu1 %v4254_v52  ;;  %v649_v52 = vunpack.c.l.b16 %v24_v46 }
  0xbc   :  { %2751 = vmatpush.bf16.msrb.mxu2 %v4262_v53  ;;  %v4293_v53 = vld [vmem:[%s5318_s1 + $0x680] sm:$0xff]  ;;  %v683_v61 = vpack.c.b16 %v647_v51, %v647_v51 }
  0xbd   :  { %2764 = vmatpush.bf16.msrb.mxu3 %v4270_v54  ;;  %v4301_v54 = vld [vmem:[%s5318_s1 + $0x6c0] sm:$0xff]  ;;  %v685_v62 = vpack.c.b16 %v649_v52, %v649_v52 }
  0xbe   :  { %2726 = vmatpush.bf16.msrb.mxu0 %v4245_v59  ;;  %v2520_v19 = vpop.f32.mrf.mxu0  ;;  %v4332_v59 = vld [vmem:[%s5318_s1 + $0x7b8] sm:$0xff] }
  0xbf   :  { %2739 = vmatpush.bf16.msrb.mxu1 %v4253_v60  ;;  %v2521_v22 = vadd.f32 %v2520_v19, %v4964_v47  ;;  %v2533_v23 = vpop.f32.mrf.mxu1  ;;  %v4340_v60 = vld [vmem:[%s5318_s1 + $0x7f8] sm:$0xff] }
  0xc0   :  { %2752 = vmatpush.bf16.msrb.mxu2 %v4261_v63  ;;  %v684_v63 = vpack.c.b16 %v648_v55, %v648_v55  ;;  %v4328_v19 = vld [vmem:[%s5318_s1 + $0x798] sm:$0xff]  ;;  %v4347_v55 = vld [vmem:[%s5318_s1 + $0x830] sm:$0xff] }
  0xc1   :  { %2765 = vmatpush.bf16.msrb.mxu3 %v4269_v0  ;;  %2727 = vmatmul.bf16.vlgmr.msrb.gmra.mxu0 %v679_v7  ;;  %v2534_v26 = vadd.f32 %v2533_v23, %v2521_v22  ;;  %v686_v0 = vpack.c.b16 %v650_v56, %v650_v56  ;;  %v4330_v7 = vld [vmem:[%s5318_s1 + $0x7a8] sm:$0xff]  ;;  %v4355_v56 = vld [vmem:[%s5318_s1 + $0x870] sm:$0xff] }
  0xc2   :  { %2771 = vmatpush.bf16.msra.mxu0 %v4284_v3  ;;  %2740 = vmatmul.bf16.vlgmr.msrb.gmra.mxu1 %v680_v9  ;;  %v4331_v3 = vld [vmem:[%s5318_s1 + $0x7b0] sm:$0xff] }
  0xc3   :  { %2784 = vmatpush.bf16.msra.mxu1 %v4292_v4  ;;  %2753 = vmatmul.bf16.vlgmr.msrb.gmra.mxu2 %v681_v8  ;;  %v4339_v4 = vld [vmem:[%s5318_s1 + $0x7f0] sm:$0xff]  ;;  %v4338_v8 = vld [vmem:[%s5318_s1 + $0x7e8] sm:$0xff] }
  0xc4   :  { %2797 = vmatpush.bf16.msra.mxu2 %v4300_v5  ;;  %2766 = vmatmul.bf16.vlgmr.msrb.gmra.mxu3 %v682_v10  ;;  %v4314_v5 = vld [vmem:[%s5318_s1 + $0x728] sm:$0xff] }
  0xc5   :  { %2810 = vmatpush.bf16.msra.mxu3 %v4308_v6  ;;  %v4322_v6 = vld [vmem:[%s5318_s1 + $0x768] sm:$0xff] }
  0xc6   :  { %2772 = vmatpush.bf16.msra.mxu0 %v4283_v11  ;;  %v2546_v31 = vpop.f32.mrf.mxu2  ;;  %v2522_v34 = vpop.f32.mrf.mxu0  ;;  %v4313_v11 = vld [vmem:[%s5318_s1 + $0x720] sm:$0xff] }
  0xc7   :  { %2785 = vmatpush.bf16.msra.mxu1 %v4291_v12  ;;  %v2547_v32 = vadd.f32 %v2546_v31, %v2534_v26  ;;  %v2559_v33 = vpop.f32.mrf.mxu3  ;;  %v2535_v38 = vpop.f32.mrf.mxu1  ;;  %v4321_v12 = vld [vmem:[%s5318_s1 + $0x760] sm:$0xff]  ;;  %v4311_v26 = vld [vmem:[%s5318_s1 + $0x710] sm:$0xff]  ;;  %v4310_v31 = vld [vmem:[%s5318_s1 + $0x708] sm:$0xff] }
  0xc8   :  { %2798 = vmatpush.bf16.msra.mxu2 %v4299_v13  ;;  %v4334_v34 = vld [vmem:[%s5318_s1 + $0x7c8] sm:$0xff] }
  0xc9   :  { %2811 = vmatpush.bf16.msra.mxu3 %v4307_v14  ;;  %v5069_v37 = vadd.f32 %v2559_v33, %v2547_v32  ;;  %v4329_v14 = vld [vmem:[%s5318_s1 + $0x7a0] sm:$0xff]  ;;  %v4318_v32 = vld [vmem:[%s5318_s1 + $0x748] sm:$0xff] }
  0xca   :  { %2773 = vmatpush.bf16.msra.mxu0 %v4282_v15  ;;  %v4337_v15 = vld [vmem:[%s5318_s1 + $0x7e0] sm:$0xff]  ;;  %v4326_v33 = vld [vmem:[%s5318_s1 + $0x788] sm:$0xff] }
  0xcb   :  { %2786 = vmatpush.bf16.msra.mxu1 %v4290_v16 }
  0xcc   :  { %2799 = vmatpush.bf16.msra.mxu2 %v4298_v17  ;;  %v4312_v17 = vld [vmem:[%s5318_s1 + $0x718] sm:$0xff] }
  0xcd   :  { %2812 = vmatpush.bf16.msra.mxu3 %v4306_v18  ;;  %v4320_v18 = vld [vmem:[%s5318_s1 + $0x758] sm:$0xff] }
  0xce   :  { %2774 = vmatpush.bf16.msra.mxu0 %v4281_v20  ;;  %v2548_v47 = vpop.f32.mrf.mxu2  ;;  %v4336_v20 = vld [vmem:[%s5318_s1 + $0x7d8] sm:$0xff] }
  0xcf   :  { %2787 = vmatpush.bf16.msra.mxu1 %v4289_v21  ;;  %v2561_v48 = vpop.f32.mrf.mxu3  ;;  %v4348_v47 = vld [vmem:[%s5318_s1 + $0x838] sm:$0xff] }
  0xd0   :  { %2800 = vmatpush.bf16.msra.mxu2 %v4297_v24  ;;  %v4356_v48 = vld [vmem:[%s5318_s1 + $0x878] sm:$0xff] }
  0xd1   :  { %2813 = vmatpush.bf16.msra.mxu3 %v4305_v25 }
  0xd2   :  { %2775 = vmatpush.bf16.msra.mxu0 %v4280_v27  ;;  %v4319_v27 = vld [vmem:[%s5318_s1 + $0x750] sm:$0xff] }
  0xd3   :  { %2788 = vmatpush.bf16.msra.mxu1 %v4288_v28 }
  0xd4   :  { %2801 = vmatpush.bf16.msra.mxu2 %v4296_v29  ;;  %v4327_v29 = vld [vmem:[%s5318_s1 + $0x790] sm:$0xff] }
  0xd5   :  { %2814 = vmatpush.bf16.msra.mxu3 %v4304_v30  ;;  %v4335_v30 = vld [vmem:[%s5318_s1 + $0x7d0] sm:$0xff] }
  0xd6   :  { %2776 = vmatpush.bf16.msra.mxu0 %v4279_v35  ;;  %v25_v35 = vld [vmem:[%s5319_s0 + $0x70] sm:$0x77] }
  0xd7   :  { %2789 = vmatpush.bf16.msra.mxu1 %v4287_v36  ;;  %v26_v36 = vld [vmem:[%s5319_s0 + $0x78] sm:$0x77]  ;;  %v652_v45 = vunpack.c.h.b16 %v25_v35 }
  0xd8   :  { %2802 = vmatpush.bf16.msra.mxu2 %v4295_v39  ;;  %v4309_v39 = vld [vmem:[%s5318_s1 + $0x700] sm:$0xff]  ;;  %v654_v46 = vunpack.c.h.b16 %v26_v36 }
  0xd9   :  { %2815 = vmatpush.bf16.msra.mxu3 %v4303_v40  ;;  %v4317_v40 = vld [vmem:[%s5318_s1 + $0x740] sm:$0xff] }
  0xda   :  { %2777 = vmatpush.bf16.msra.mxu0 %v4278_v41  ;;  %v651_v41 = vunpack.c.l.b16 %v25_v35  ;;  %v4357_v35 = vld [vmem:[%s5318_s1 + $0x880] sm:$0xff] }
  0xdb   :  { %2790 = vmatpush.bf16.msra.mxu1 %v4286_v42  ;;  %v653_v42 = vunpack.c.l.b16 %v26_v36  ;;  %v4365_v36 = vld [vmem:[%s5318_s1 + $0x8c0] sm:$0xff] }
  0xdc   :  { %2803 = vmatpush.bf16.msra.mxu2 %v4294_v43  ;;  %v4325_v43 = vld [vmem:[%s5318_s1 + $0x780] sm:$0xff]  ;;  %v687_v51 = vpack.c.b16 %v651_v41, %v651_v41 }
  0xdd   :  { %2816 = vmatpush.bf16.msra.mxu3 %v4302_v44  ;;  %v4333_v44 = vld [vmem:[%s5318_s1 + $0x7c0] sm:$0xff]  ;;  %v689_v52 = vpack.c.b16 %v653_v42, %v653_v42 }
  0xde   :  { %2778 = vmatpush.bf16.msra.mxu0 %v4277_v49  ;;  %v2572_v9 = vpop.f32.mrf.mxu0  ;;  %v4364_v49 = vld [vmem:[%s5318_s1 + $0x8b8] sm:$0xff] }
  0xdf   :  { %2791 = vmatpush.bf16.msra.mxu1 %v4285_v50  ;;  %v2573_v10 = vadd.f32 %v2572_v9, %v5069_v37  ;;  %v2585_v13 = vpop.f32.mrf.mxu1  ;;  %v4372_v50 = vld [vmem:[%s5318_s1 + $0x8f8] sm:$0xff] }
  0xe0   :  { %2804 = vmatpush.bf16.msra.mxu2 %v4293_v53  ;;  %v688_v53 = vpack.c.b16 %v652_v45, %v652_v45  ;;  %v4360_v9 = vld [vmem:[%s5318_s1 + $0x898] sm:$0xff] }
  0xe1   :  { %2817 = vmatpush.bf16.msra.mxu3 %v4301_v54  ;;  %2779 = vmatmul.bf16.vlgmr.msra.gmra.mxu0 %v683_v61  ;;  %v2586_v16 = vadd.f32 %v2585_v13, %v2573_v10  ;;  %v690_v54 = vpack.c.b16 %v654_v46, %v654_v46  ;;  %v4362_v61 = vld [vmem:[%s5318_s1 + $0x8a8] sm:$0xff]  ;;  %v4368_v10 = vld [vmem:[%s5318_s1 + $0x8d8] sm:$0xff] }
  0xe2   :  { %2823 = vmatpush.bf16.msrb.mxu0 %v4316_v57  ;;  %2792 = vmatmul.bf16.vlgmr.msra.gmra.mxu1 %v684_v63  ;;  %v4363_v57 = vld [vmem:[%s5318_s1 + $0x8b0] sm:$0xff] }
  0xe3   :  { %2836 = vmatpush.bf16.msrb.mxu1 %v4324_v58  ;;  %2805 = vmatmul.bf16.vlgmr.msra.gmra.mxu2 %v685_v62  ;;  %v4371_v58 = vld [vmem:[%s5318_s1 + $0x8f0] sm:$0xff]  ;;  %v4370_v62 = vld [vmem:[%s5318_s1 + $0x8e8] sm:$0xff] }
  0xe4   :  { %2849 = vmatpush.bf16.msrb.mxu2 %v4332_v59  ;;  %2818 = vmatmul.bf16.vlgmr.msra.gmra.mxu3 %v686_v0  ;;  %v4346_v59 = vld [vmem:[%s5318_s1 + $0x828] sm:$0xff] }
  0xe5   :  { %2862 = vmatpush.bf16.msrb.mxu3 %v4340_v60  ;;  %v4354_v60 = vld [vmem:[%s5318_s1 + $0x868] sm:$0xff] }
  0xe6   :  { %2824 = vmatpush.bf16.msrb.mxu0 %v4315_v1  ;;  %v2598_v21 = vpop.f32.mrf.mxu2  ;;  %v2574_v24 = vpop.f32.mrf.mxu0  ;;  %v4345_v1 = vld [vmem:[%s5318_s1 + $0x820] sm:$0xff] }
  0xe7   :  { %2837 = vmatpush.bf16.msrb.mxu1 %v4323_v2  ;;  %v2599_v22 = vadd.f32 %v2598_v21, %v2586_v16  ;;  %v2611_v23 = vpop.f32.mrf.mxu3  ;;  %v2587_v28 = vpop.f32.mrf.mxu1  ;;  %v4353_v2 = vld [vmem:[%s5318_s1 + $0x860] sm:$0xff]  ;;  %v4343_v16 = vld [vmem:[%s5318_s1 + $0x810] sm:$0xff]  ;;  %v4342_v21 = vld [vmem:[%s5318_s1 + $0x808] sm:$0xff] }
  0xe8   :  { %2850 = vmatpush.bf16.msrb.mxu2 %v4331_v3  ;;  %v4358_v24 = vld [vmem:[%s5318_s1 + $0x888] sm:$0xff] }
  0xe9   :  { %2863 = vmatpush.bf16.msrb.mxu3 %v4339_v4  ;;  %v5168_v25 = vadd.f32 %v2611_v23, %v2599_v22  ;;  %v4361_v4 = vld [vmem:[%s5318_s1 + $0x8a0] sm:$0xff]  ;;  %v4350_v22 = vld [vmem:[%s5318_s1 + $0x848] sm:$0xff] }
  0xea   :  { %2825 = vmatpush.bf16.msrb.mxu0 %v4314_v5  ;;  %v4369_v5 = vld [vmem:[%s5318_s1 + $0x8e0] sm:$0xff] }
  0xeb   :  { %2838 = vmatpush.bf16.msrb.mxu1 %v4322_v6  ;;  %v27_v23 = vld [vmem:[%s5319_s0 + $0x80] sm:$0x77] }
  0xec   :  { %2851 = vmatpush.bf16.msrb.mxu2 %v4330_v7  ;;  %v4344_v7 = vld [vmem:[%s5318_s1 + $0x818] sm:$0xff] }
  0xed   :  { %2864 = vmatpush.bf16.msrb.mxu3 %v4338_v8  ;;  %v4352_v8 = vld [vmem:[%s5318_s1 + $0x858] sm:$0xff] }
  0xee   :  { %2826 = vmatpush.bf16.msrb.mxu0 %v4313_v11  ;;  %v2600_v37 = vpop.f32.mrf.mxu2 }
  0xef   :  { %2839 = vmatpush.bf16.msrb.mxu1 %v4321_v12  ;;  %v2613_v38 = vpop.f32.mrf.mxu3 }
  0xf0   :  { %2852 = vmatpush.bf16.msrb.mxu2 %v4329_v14 }
  0xf1   :  { %2865 = vmatpush.bf16.msrb.mxu3 %v4337_v15 }
  0xf2   :  { %2827 = vmatpush.bf16.msrb.mxu0 %v4312_v17  ;;  %v4351_v17 = vld [vmem:[%s5318_s1 + $0x850] sm:$0xff] }
  0xf3   :  { %2840 = vmatpush.bf16.msrb.mxu1 %v4320_v18 }
  0xf4   :  { %2853 = vmatpush.bf16.msrb.mxu2 %v4328_v19  ;;  %v4359_v19 = vld [vmem:[%s5318_s1 + $0x890] sm:$0xff] }
  0xf5   :  { %2866 = vmatpush.bf16.msrb.mxu3 %v4336_v20  ;;  %v4367_v20 = vld [vmem:[%s5318_s1 + $0x8d0] sm:$0xff] }
  0xf6   :  { %2828 = vmatpush.bf16.msrb.mxu0 %v4311_v26  ;;  %v28_v26 = vld [vmem:[%s5319_s0 + $0x88] sm:$0x77] }
  0xf7   :  { %2841 = vmatpush.bf16.msrb.mxu1 %v4319_v27 }
  0xf8   :  { %2854 = vmatpush.bf16.msrb.mxu2 %v4327_v29  ;;  %v655_v29 = vunpack.c.l.b16 %v27_v23 }
  0xf9   :  { %2867 = vmatpush.bf16.msrb.mxu3 %v4335_v30  ;;  %v656_v30 = vunpack.c.h.b16 %v27_v23 }
  0xfa   :  { %2829 = vmatpush.bf16.msrb.mxu0 %v4310_v31  ;;  %v4341_v31 = vld [vmem:[%s5318_s1 + $0x800] sm:$0xff]  ;;  %v691_v37 = vpack.c.b16 %v655_v29, %v655_v29 }
  0xfb   :  { %2842 = vmatpush.bf16.msrb.mxu1 %v4318_v32  ;;  %v4349_v32 = vld [vmem:[%s5318_s1 + $0x840] sm:$0xff]  ;;  %v692_v38 = vpack.c.b16 %v656_v30, %v656_v30 }
  0xfc   :  { %2855 = vmatpush.bf16.msrb.mxu2 %v4326_v33  ;;  %v657_v33 = vunpack.c.l.b16 %v28_v26 }
  0xfd   :  { %2868 = vmatpush.bf16.msrb.mxu3 %v4334_v34  ;;  %v658_v34 = vunpack.c.h.b16 %v28_v26 }
  0xfe   :  { %2830 = vmatpush.bf16.msrb.mxu0 %v4309_v39  ;;  %v2624_v63 = vpop.f32.mrf.mxu0  ;;  %v693_v39 = vpack.c.b16 %v657_v33, %v657_v33 }
  0xff   :  { %2843 = vmatpush.bf16.msrb.mxu1 %v4317_v40  ;;  %v2625_v0 = vadd.f32 %v2624_v63, %v5168_v25  ;;  %v2637_v3 = vpop.f32.mrf.mxu1  ;;  %v4366_v25 = vld [vmem:[%s5318_s1 + $0x8c8] sm:$0xff]  ;;  %v694_v40 = vpack.c.b16 %v658_v34, %v658_v34 }
 0x100   :  { %2856 = vmatpush.bf16.msrb.mxu2 %v4325_v43 }
 0x101   :  { %2869 = vmatpush.bf16.msrb.mxu3 %v4333_v44  ;;  %2831 = vmatmul.bf16.vlgmr.msrb.gmra.mxu0 %v687_v51  ;;  %v2638_v6 = vadd.f32 %v2637_v3, %v2625_v0 }
 0x102   :  { %2875 = vmatpush.bf16.msra.mxu0 %v4348_v47  ;;  %2844 = vmatmul.bf16.vlgmr.msrb.gmra.mxu1 %v688_v53 }
 0x103   :  { %2888 = vmatpush.bf16.msra.mxu1 %v4356_v48  ;;  %2857 = vmatmul.bf16.vlgmr.msrb.gmra.mxu2 %v689_v52 }
 0x104   :  { %2901 = vmatpush.bf16.msra.mxu2 %v4364_v49  ;;  %2870 = vmatmul.bf16.vlgmr.msrb.gmra.mxu3 %v690_v54 }
 0x105   :  { %2914 = vmatpush.bf16.msra.mxu3 %v4372_v50 }
 0x106   :  { %2876 = vmatpush.bf16.msra.mxu0 %v4347_v55  ;;  %v2650_v11 = vpop.f32.mrf.mxu2  ;;  %v2626_v14 = vpop.f32.mrf.mxu0 }
 0x107   :  { %2889 = vmatpush.bf16.msra.mxu1 %v4355_v56  ;;  %v2651_v12 = vadd.f32 %v2650_v11, %v2638_v6  ;;  %v2663_v13 = vpop.f32.mrf.mxu3  ;;  %v2639_v18 = vpop.f32.mrf.mxu1 }
 0x108   :  { %2902 = vmatpush.bf16.msra.mxu2 %v4363_v57 }
 0x109   :  { %2915 = vmatpush.bf16.msra.mxu3 %v4371_v58  ;;  %v2664_v15 = vadd.f32 %v2663_v13, %v2651_v12 }
 0x10a   :  { %2877 = vmatpush.bf16.msra.mxu0 %v4346_v59 }
 0x10b   :  { %2890 = vmatpush.bf16.msra.mxu1 %v4354_v60 }
 0x10c   :  { %2903 = vmatpush.bf16.msra.mxu2 %v4362_v61 }
 0x10d   :  { %2916 = vmatpush.bf16.msra.mxu3 %v4370_v62 }
 0x10e   :  { %2878 = vmatpush.bf16.msra.mxu0 %v4345_v1  ;;  %v2652_v27 = vpop.f32.mrf.mxu2 }
 0x10f   :  { %2891 = vmatpush.bf16.msra.mxu1 %v4353_v2  ;;  %v2665_v28 = vpop.f32.mrf.mxu3 }
 0x110   :  { %2904 = vmatpush.bf16.msra.mxu2 %v4361_v4 }
 0x111   :  { %2917 = vmatpush.bf16.msra.mxu3 %v4369_v5 }
 0x112   :  { %2879 = vmatpush.bf16.msra.mxu0 %v4344_v7 }
 0x113   :  { %2892 = vmatpush.bf16.msra.mxu1 %v4352_v8 }
 0x114   :  { %2905 = vmatpush.bf16.msra.mxu2 %v4360_v9 }
 0x115   :  { %2918 = vmatpush.bf16.msra.mxu3 %v4368_v10 }
 0x116   :  { %2880 = vmatpush.bf16.msra.mxu0 %v4343_v16 }
 0x117   :  { %2893 = vmatpush.bf16.msra.mxu1 %v4351_v17 }
 0x118   :  { %2906 = vmatpush.bf16.msra.mxu2 %v4359_v19 }
 0x119   :  { %2919 = vmatpush.bf16.msra.mxu3 %v4367_v20 }
 0x11a   :  { %2881 = vmatpush.bf16.msra.mxu0 %v4342_v21 }
 0x11b   :  { %2894 = vmatpush.bf16.msra.mxu1 %v4350_v22 }
 0x11c   :  { %2907 = vmatpush.bf16.msra.mxu2 %v4358_v24 }
 0x11d   :  { %2920 = vmatpush.bf16.msra.mxu3 %v4366_v25 }
 0x11e   :  { %2882 = vmatpush.bf16.msra.mxu0 %v4341_v31  ;;  %v2676_v41 = vpop.f32.mrf.mxu0 }
 0x11f   :  { %2895 = vmatpush.bf16.msra.mxu1 %v4349_v32  ;;  %v2677_v42 = vadd.f32 %v2676_v41, %v2664_v15  ;;  %v2689_v43 = vpop.f32.mrf.mxu1 }
 0x120   :  { %2908 = vmatpush.bf16.msra.mxu2 %v4357_v35 }
 0x121   :  { %2921 = vmatpush.bf16.msra.mxu3 %v4365_v36  ;;  %2883 = vmatmul.bf16.vlgmr.msra.gmra.mxu0 %v691_v37  ;;  %v2690_v44 = vadd.f32 %v2689_v43, %v2677_v42 }
 0x122   :  { %2896 = vmatmul.bf16.vlgmr.msra.gmra.mxu1 %v692_v38 }
 0x123   :  { %2909 = vmatmul.bf16.vlgmr.msra.gmra.mxu2 %v693_v39 }
 0x124   :  { %2922 = vmatmul.bf16.vlgmr.msra.gmra.mxu3 %v694_v40 }
 0x126   :  { %v2702_v45 = vpop.f32.mrf.mxu2  ;;  %v2678_v48 = vpop.f32.mrf.mxu0 }
 0x127   :  { %v2703_v46 = vadd.f32 %v2702_v45, %v2690_v44  ;;  %v2715_v47 = vpop.f32.mrf.mxu3  ;;  %v2691_v50 = vpop.f32.mrf.mxu1 }
 0x129   :  { %v2716_v49 = vadd.f32 %v2715_v47, %v2703_v46 }
 0x12e   :  { %v2704_v51 = vpop.f32.mrf.mxu2 }
 0x12f   :  { %v2717_v52 = vpop.f32.mrf.mxu3 }
 0x13e   :  { %v2728_v53 = vpop.f32.mrf.mxu0 }
 0x13f   :  { %v2729_v54 = vadd.f32 %v2728_v53, %v2716_v49  ;;  %v2741_v55 = vpop.f32.mrf.mxu1 }
 0x141   :  { %v2742_v56 = vadd.f32 %v2741_v55, %v2729_v54 }
 0x146   :  { %v2754_v57 = vpop.f32.mrf.mxu2  ;;  %v2730_v60 = vpop.f32.mrf.mxu0 }
 0x147   :  { %v2755_v58 = vadd.f32 %v2754_v57, %v2742_v56  ;;  %v2767_v59 = vpop.f32.mrf.mxu3  ;;  %v2743_v62 = vpop.f32.mrf.mxu1 }
 0x149   :  { %v2768_v61 = vadd.f32 %v2767_v59, %v2755_v58 }
 0x14e   :  { %v2756_v63 = vpop.f32.mrf.mxu2 }
 0x14f   :  { %v2769_v0 = vpop.f32.mrf.mxu3 }
 0x15e   :  { %v2780_v1 = vpop.f32.mrf.mxu0 }
 0x15f   :  { %v2793_v2 = vpop.f32.mrf.mxu1  ;;  %v2781_v12 = vadd.f32 %v2780_v1, %v2768_v61 }
 0x161   :  { %v2794_v16 = vadd.f32 %v2793_v2, %v2781_v12 }
 0x166   :  { %v2806_v3 = vpop.f32.mrf.mxu2  ;;  %v2782_v5 = vpop.f32.mrf.mxu0 }
 0x167   :  { %v2819_v4 = vpop.f32.mrf.mxu3  ;;  %v2795_v6 = vpop.f32.mrf.mxu1  ;;  %v2807_v17 = vadd.f32 %v2806_v3, %v2794_v16 }
 0x169   :  { %v2820_v20 = vadd.f32 %v2819_v4, %v2807_v17 }
 0x16e   :  { %v2808_v7 = vpop.f32.mrf.mxu2 }
 0x16f   :  { %v2821_v8 = vpop.f32.mrf.mxu3 }
 0x17e   :  { %v2832_v9 = vpop.f32.mrf.mxu0 }
 0x17f   :  { %v2845_v10 = vpop.f32.mrf.mxu1  ;;  %v2833_v21 = vadd.f32 %v2832_v9, %v2820_v20 }
 0x181   :  { %v2846_v22 = vadd.f32 %v2845_v10, %v2833_v21 }
 0x186   :  { %v2858_v11 = vpop.f32.mrf.mxu2  ;;  %v2834_v14 = vpop.f32.mrf.mxu0 }
 0x187   :  { %v2871_v13 = vpop.f32.mrf.mxu3  ;;  %v2847_v15 = vpop.f32.mrf.mxu1  ;;  %v2859_v23 = vadd.f32 %v2858_v11, %v2846_v22 }
 0x189   :  { %v2872_v24 = vadd.f32 %v2871_v13, %v2859_v23 }
 0x18e   :  { %v2860_v18 = vpop.f32.mrf.mxu2 }
 0x18f   :  { %v2873_v19 = vpop.f32.mrf.mxu3 }
 0x19e   :  { %v2884_v25 = vpop.f32.mrf.mxu0 }
 0x19f   :  { %v2897_v26 = vpop.f32.mrf.mxu1  ;;  %v2885_v27 = vadd.f32 %v2884_v25, %v2872_v24 }
 0x1a1   :  { %v2898_v28 = vadd.f32 %v2897_v26, %v2885_v27 }
 0x1a6   :  { %v2910_v29 = vpop.f32.mrf.mxu2  ;;  %v2886_v32 = vpop.f32.mrf.mxu0 }
 0x1a7   :  { %v2923_v30 = vpop.f32.mrf.mxu3  ;;  %v2911_v31 = vadd.f32 %v2910_v29, %v2898_v28  ;;  %v2899_v33 = vpop.f32.mrf.mxu1 }
 0x1a9   :  { %v2924_v34 = vadd.f32 %v2923_v30, %v2911_v31 }
 0x1ab   :  { %2928 = vst.msk [vmem:[%s5320_s2] sm:$0x1f] %vm2927_vm0, %v2924_v34 }
 0x1ae   :  { %v2912_v35 = vpop.f32.mrf.mxu2 }
 0x1af   :  { %v2925_v36 = vpop.f32.mrf.mxu3 }

</bundles_post_ra>
